<compile_context>
chip_gen: v7x
topology: tpu7x:2x2x1
jax: 0.10.0
libtpu: 0.0.40
codegen_flags: <defaults>
</compile_context>

<pallas_src>
import functools

import jax
import jax.numpy as jnp
from jax.experimental import pallas as pl
from jax.experimental.pallas import tpu as pltpu


def _vmem_limit_bytes():
    # ~48 MiB on v5e/v6e (128 MiB physical VMEM), ~32 MiB on v7x (64 MiB per TC).
    try:
        cap = pltpu.get_tpu_info().vmem_capacity_bytes
        return int(min(48 * 1024 * 1024, cap // 2))
    except Exception:
        return 32 * 1024 * 1024


_VMEM_LIMIT = _vmem_limit_bytes()


def _pick_tile(total, target, align):
    """Largest tile <= target that divides `total` and is a multiple of `align`,
    falling back to the full dimension (full-dim blocks always satisfy the
    (8,128) tiling constraint)."""
    if total <= target:
        return total
    t = (min(target, total) // align) * align
    while t >= align:
        if total % t == 0:
            return t
        t -= align
    return total


def _pick_row_tile(M, target, align=16):
    """Row (M) tile: prefer >= 2 blocks when M allows it so both v7x TensorCores get work
    on the 'parallel' grid axis; 16-aligned so bf16 row blocks stay packed-friendly."""
    if M >= 2 * align:
        target = min(target, max(align, (M // 2 // align) * align))
    return _pick_tile(M, target, align)


def _gelu_tanh(x):
    # tanh-approx GELU (== jax.nn.gelu(approximate=True)); tanh runs on the EUP slot,
    # keeping the VALU epilogue cheap.  ~1e-3 max abs error vs exact-erf nn.GELU().
    c = 0.7978845608028654  # sqrt(2/pi)
    return 0.5 * x * (1.0 + jnp.tanh(c * (x + 0.044715 * x * x * x)))


# ----------------------------- Pallas kernels -----------------------------

def _linear_kernel(*refs, activation, has_residual, has_ln, ln_eps):
    """o = act( LN?(x) @ w + b ) [+ residual]  (M/N/K tiled, f32 VMEM accumulator, bf16 MXU)."""
    idx = 0
    x_ref = refs[idx]; idx += 1
    w_ref = refs[idx]; idx += 1
    b_ref = refs[idx]; idx += 1
    g_ref = bb_ref = res_ref = None
    if has_ln:
        g_ref = refs[idx]; idx += 1
        bb_ref = refs[idx]; idx += 1
    if has_residual:
        res_ref = refs[idx]; idx += 1
    o_ref = refs[idx]; idx += 1
    acc_ref = refs[idx]

    k = pl.program_id(2)

    @pl.when(k == 0)
    def _():
        acc_ref[...] = jnp.zeros_like(acc_ref)

    x = x_ref[...]
    if has_ln:
        # LN fused as a prologue; only valid when the contraction fits one K tile
        # (enforced by the wrapper), so the full feature row is visible here.
        xf = x.astype(jnp.float32)
        mu = jnp.mean(xf, axis=-1, keepdims=True)
        xc = xf - mu
        var = jnp.mean(xc * xc, axis=-1, keepdims=True)
        inv = jax.lax.rsqrt(var + ln_eps)
        x = xc * inv * g_ref[...].astype(jnp.float32) + bb_ref[...].astype(jnp.float32)

    acc_ref[...] += jnp.dot(x.astype(jnp.bfloat16),
                            w_ref[...].astype(jnp.bfloat16),
                            preferred_element_type=jnp.float32)

    @pl.when(k == pl.num_programs(2) - 1)
    def _():
        out = acc_ref[...] + b_ref[...].astype(jnp.float32)
        if activation == "gelu":
            out = _gelu_tanh(out)
        if has_residual:
            out = out + res_ref[...].astype(jnp.float32)
        o_ref[...] = out.astype(o_ref.dtype)


def pallas_linear(x, w, b, residual=None, activation=None,
                  ln_gamma=None, ln_beta=None, ln_eps=1e-5,
                  out_dtype=None, tm=512, tn=512, tk=512):
    M, K = x.shape
    Kw, N = w.shape
    assert K == Kw
    has_ln = ln_gamma is not None
    out_dtype = out_dtype or x.dtype

    TM = _pick_row_tile(M, tm)
    TN = _pick_tile(N, tn, 128)
    # LN prologue needs the whole feature row in one K tile.
    TK = K if has_ln else _pick_tile(K, tk, 128)

    in_specs = [
        pl.BlockSpec((TM, TK), lambda i, j, k: (i, k)),
        pl.BlockSpec((TK, TN), lambda i, j, k: (k, j)),
        pl.BlockSpec((1, TN), lambda i, j, k: (0, j)),
    ]
    args = [x, w, b.reshape(1, N)]
    if has_ln:
        in_specs.append(pl.BlockSpec((1, TK), lambda i, j, k: (0, k)))
        in_specs.append(pl.BlockSpec((1, TK), lambda i, j, k: (0, k)))
        args.append(ln_gamma.reshape(1, K))
        args.append(ln_beta.reshape(1, K))
    if residual is not None:
        # Block index is constant over k -> residual is DMA'd once per (i, j) tile.
        in_specs.append(pl.BlockSpec((TM, TN), lambda i, j, k: (i, j)))
        args.append(residual)

    kernel = functools.partial(_linear_kernel, activation=activation,
                               has_residual=residual is not None,
                               has_ln=has_ln, ln_eps=ln_eps)
    return pl.pallas_call(
        kernel,
        out_shape=jax.ShapeDtypeStruct((M, N), out_dtype),
        grid_spec=pltpu.PrefetchScalarGridSpec(
            num_scalar_prefetch=0,
            grid=(M // TM, N // TN, K // TK),
            in_specs=in_specs,
            out_specs=pl.BlockSpec((TM, TN), lambda i, j, k: (i, j)),
            scratch_shapes=[pltpu.VMEM((TM, TN), jnp.float32)],
        ),
        compiler_params=pltpu.CompilerParams(
            dimension_semantics=("parallel", "parallel", "arbitrary"),
            vmem_limit_bytes=_VMEM_LIMIT),
    )(*args)


def _attention_kernel(qkv_ref, o_ref, *, heads, dim_head):
    """Multi-head softmax(q k^T) v for one batch element.

    Loads the fused qkv slab once (q | k | v, head-major within each), does per-head
    softmax attention in f32 with bf16 MXU operands, and writes ONE lane-dense
    (Np, heads*dim_head) store (no per-head masked stores).  The softmax scale is
    already folded into the q projection weights."""
    inner = heads * dim_head
    qkv = qkv_ref[0]                                  # (Np, 3*inner)
    q = qkv[:, :inner].astype(jnp.bfloat16)
    kk = qkv[:, inner:2 * inner].astype(jnp.bfloat16)
    v = qkv[:, 2 * inner:].astype(jnp.bfloat16)

    # TODO(synk): switch to a flash-style kv-tiled online-softmax path if Np ever grows
    # large enough that the Np x Np f32 score matrices stress VMEM (esp. v7x, 64 MiB/TC).
    outs = []
    for h in range(heads):
        sl = slice(h * dim_head, (h + 1) * dim_head)
        s = jax.lax.dot_general(q[:, sl], kk[:, sl], (((1,), (1,)), ((), ())),
                                preferred_element_type=jnp.float32)
        s = s - jnp.max(s, axis=-1, keepdims=True)
        p = jnp.exp(s)
        p = p * pl.reciprocal(jnp.sum(p, axis=-1, keepdims=True), approx=True)
        outs.append(jnp.dot(p.astype(jnp.bfloat16), v[:, sl],
                            preferred_element_type=jnp.float32))
    o_ref[0] = jnp.concatenate(outs, axis=-1).astype(o_ref.dtype)


def pallas_attention(qkv, heads, dim_head):
    B, Np, three_inner = qkv.shape
    inner = heads * dim_head
    assert three_inner == 3 * inner
    return pl.pallas_call(
        functools.partial(_attention_kernel, heads=heads, dim_head=dim_head),
        out_shape=jax.ShapeDtypeStruct((B, Np, inner), qkv.dtype),
        grid_spec=pltpu.PrefetchScalarGridSpec(
            num_scalar_prefetch=0,
            grid=(B,),
            in_specs=[pl.BlockSpec((1, Np, 3 * inner), lambda b: (b, 0, 0))],
            out_specs=pl.BlockSpec((1, Np, inner), lambda b: (b, 0, 0)),
        ),
        compiler_params=pltpu.CompilerParams(
            dimension_semantics=("parallel",),
            vmem_limit_bytes=_VMEM_LIMIT),
    )(qkv)


# ----------------------------- parameters -----------------------------

def init_params(key, cfg):
    D = cfg["encoder_dim"]
    heads, dh = cfg["heads"], cfg["dim_head"]
    inner = heads * dh
    mlp = cfg["mlp_dim"]
    p = cfg["patch_size"]
    C = cfg["channels"]
    patch_dim = C * p * p * p
    X, Y, Z = (s // p for s in cfg["image_size"])
    Np = X * Y * Z
    scale = dh ** -0.5

    keys = iter(jax.random.split(key, 8 + 8 * cfg["depth"]))

    def w(shape, std=0.02):
        return std * jax.random.normal(next(keys), shape, jnp.float32)

    def bf(a):
        return a.astype(jnp.bfloat16)

    # ConvTranspose3d(dim -> C, kernel=stride=(4,4,4)): kernel == stride => no overlap, so it is
    # an exact per-token linear map dim -> C*4*4*4 followed by depth-to-space.  Precompute the
    # matmul form padded to a multiple of 128 output lanes so stores stay unmasked.
    convt_w = w((D, C, 4, 4, 4))
    nct = C * 64
    npad = ((nct + 127) // 128) * 128
    convt_w_mat = jnp.pad(convt_w.reshape(D, nct), ((0, 0), (0, npad - nct)))
    convt_b = jnp.zeros((C,), jnp.float32)
    convt_b_mat = jnp.pad(jnp.repeat(convt_b, 64), (0, npad - nct))

    params = {
        "patch_w": bf(w((patch_dim, D))),
        "patch_b": jnp.zeros((D,), jnp.float32),
        "pos_emb": w((1, Np, D), std=1.0),          # ~ torch.randn
        "layers": [],
        "convt_w": bf(convt_w_mat),                 # (D, Npad) bf16
        "convt_b": convt_b_mat,                     # (Npad,) f32
    }
    for _ in range(cfg["depth"]):
        qkv_w = w((D, 3 * inner))
        # Fold the softmax scale (dim_head**-0.5) into the q projection columns.
        qkv_w = qkv_w.at[:, :inner].multiply(scale)
        params["layers"].append({
            "ln1_g": jnp.ones((D,), jnp.float32), "ln1_b": jnp.zeros((D,), jnp.float32),
            "qkv_w": bf(qkv_w),                                   # to_qkv has no bias
            "qkv_b": jnp.zeros((3 * inner,), jnp.float32),
            "out_w": bf(w((inner, D))), "out_b": jnp.zeros((D,), jnp.float32),
            "ln2_g": jnp.ones((D,), jnp.float32), "ln2_b": jnp.zeros((D,), jnp.float32),
            "ff1_w": bf(w((D, mlp))), "ff1_b": jnp.zeros((mlp,), jnp.float32),
            "ff2_w": bf(w((mlp, D))), "ff2_b": jnp.zeros((D,), jnp.float32),
        })
    return params


# ----------------------------- forward -----------------------------

def vit_forward(params, img, cfg):
    B, C, H, W, D3 = img.shape
    p = cfg["patch_size"]
    dim = cfg["encoder_dim"]
    heads, dh = cfg["heads"], cfg["dim_head"]
    inner = heads * dh
    X, Y, Z = H // p, W // p, D3 // p
    Np = X * Y * Z

    # to_patch: 'b c (x p1) (y p2) (z p3) -> b (x y z) (p1 p2 p3 c)'
    patches = img.reshape(B, C, X, p, Y, p, Z, p)
    patches = patches.transpose(0, 2, 4, 6, 3, 5, 7, 1)
    patches = patches.reshape(B * Np, p * p * p * C)

    # patch_to_emb + pos_embedding
    tokens = pallas_linear(patches, params["patch_w"], params["patch_b"])
    x = (tokens.reshape(B, Np, dim) + params["pos_emb"][:, :Np]).reshape(B * Np, dim)

    for layer in params["layers"]:
        # ---- pre-norm MHSA: LN fused into qkv projection, residual fused into out proj ----
        qkv = pallas_linear(x, layer["qkv_w"], layer["qkv_b"],
                            ln_gamma=layer["ln1_g"], ln_beta=layer["ln1_b"],
                            out_dtype=jnp.bfloat16)                      # (B*Np, 3*inner) bf16
        a = pallas_attention(qkv.reshape(B, Np, 3 * inner), heads, dh)   # (B, Np, inner) bf16
        x = pallas_linear(a.reshape(B * Np, inner), layer["out_w"], layer["out_b"],
                          residual=x, out_dtype=jnp.float32)
        # TODO(synk): dropout (p=0.1) is treated as identity (inference mode).

        # ---- pre-norm MLP: LN fused into ff1, GELU in ff1 epilogue, residual in ff2 ----
        h = pallas_linear(x, layer["ff1_w"], layer["ff1_b"], activation="gelu",
                          ln_gamma=layer["ln2_g"], ln_beta=layer["ln2_b"],
                          out_dtype=jnp.bfloat16)                        # (B*Np, mlp) bf16
        x = pallas_linear(h, layer["ff2_w"], layer["ff2_b"],
                          residual=x, out_dtype=jnp.float32)

    # encoded_tokens.transpose(1,2).reshape(B, dim, X, Y, Z) then ConvTranspose3d(dim->C,
    # kernel=stride=(4,4,4)) == per-token linear (dim -> C*64, lane-padded) + depth-to-space.
    nct = C * 64
    y = pallas_linear(x, params["convt_w"], params["convt_b"], out_dtype=jnp.float32)
    y = y[:, :nct]
    y = y.reshape(B, X, Y, Z, C, 4, 4, 4)
    y = y.transpose(0, 4, 1, 5, 2, 6, 3, 7)                              # (B, C, X,4, Y,4, Z,4)
    y = y.reshape(B, C, 4 * X, 4 * Y, 4 * Z)
    return y


# ----------------------------- main -----------------------------

if __name__ == "__main__":
    # Small config (same structure as ViT(image_size, patch_size, encoder_dim, mlp_dim, channels);
    # depth/heads/dim_head scaled down from 12/12/64 for the smoke test).
    cfg = dict(image_size=(16, 16, 16), patch_size=4, encoder_dim=128,
               mlp_dim=256, channels=1, depth=2, heads=4, dim_head=32)

    key = jax.random.PRNGKey(0)
    pkey, xkey = jax.random.split(key)
    params = init_params(pkey, cfg)

    B = 2
    img = jax.random.normal(
        xkey, (B, cfg["channels"]) + tuple(cfg["image_size"]), dtype=jnp.float32)

    fwd = jax.jit(functools.partial(vit_forward, cfg=cfg))
    out = jax.block_until_ready(fwd(params, img))

    p = cfg["patch_size"]
    expected = (B, cfg["channels"],
                4 * (cfg["image_size"][0] // p),
                4 * (cfg["image_size"][1] // p),
                4 * (cfg["image_size"][2] // p))
    assert out.shape == expected, (out.shape, expected)
    assert bool(jnp.all(jnp.isfinite(out)))
    print("KERNEL_OK")
</pallas_src>

<mosaic_0001>
module attributes {stable_mosaic.version = 11 : i64} {
  func.func @_linear_kernel(%arg0: i32, %arg1: i32, %arg2: i32, %arg3: memref<64x64xf32, #tpu.memory_space<vmem>>, %arg4: memref<64x128xbf16, #tpu.memory_space<vmem>>, %arg5: memref<1x128xf32, #tpu.memory_space<vmem>>, %arg6: memref<64x128xf32, #tpu.memory_space<vmem>>, %arg7: memref<64x128xf32, #tpu.memory_space<vmem>>) attributes {dimension_semantics = [#tpu.dimension_semantics<parallel>, #tpu.dimension_semantics<parallel>, #tpu.dimension_semantics<arbitrary>], iteration_bounds = array<i64: 2, 1, 1>, scalar_prefetch = 0 : i64, scratch_operands = 1 : i64, tpu.core_type = #tpu.core_type<tc>, window_params = [{transform_indices = @transform_0, window_bounds = array<i64: 64, 64>}, {transform_indices = @transform_1, window_bounds = array<i64: 64, 128>}, {transform_indices = @transform_2, window_bounds = array<i64: 1, 128>}, {transform_indices = @transform_3, window_bounds = array<i64: 64, 128>}]} {
    %c0_i32 = arith.constant 0 : i32
    %0 = arith.cmpi eq, %arg2, %c0_i32 : i32
    %1 = arith.extui %0 : i1 to i32
    %c0_i32_0 = arith.constant 0 : i32
    %2 = arith.cmpi ne, %1, %c0_i32_0 : i32
    scf.if %2 {
      %cst_10 = arith.constant 0.000000e+00 : f32
      %13 = vector.broadcast %cst_10 : f32 to vector<64x128xf32>
      %c0_11 = arith.constant 0 : index
      %c0_12 = arith.constant 0 : index
      %14 = vector.load %arg7[%c0_11, %c0_12] : memref<64x128xf32, #tpu.memory_space<vmem>>, vector<64x128xf32>
      tpu.vector_store %arg7[%c0_11, %c0_12], %13 {strides = array<i32>} : memref<64x128xf32, #tpu.memory_space<vmem>>, vector<64x128xf32>,
    } else {
    }
    %c0 = arith.constant 0 : index
    %c0_1 = arith.constant 0 : index
    %3 = vector.load %arg3[%c0, %c0_1] : memref<64x64xf32, #tpu.memory_space<vmem>>, vector<64x64xf32>
    %c0_2 = arith.constant 0 : index
    %c0_3 = arith.constant 0 : index
    %4 = vector.load %arg7[%c0_2, %c0_3] : memref<64x128xf32, #tpu.memory_space<vmem>>, vector<64x128xf32>
    %5 = arith.truncf %3 : vector<64x64xf32> to vector<64x64xbf16>
    %c0_4 = arith.constant 0 : index
    %c0_5 = arith.constant 0 : index
    %6 = vector.load %arg4[%c0_4, %c0_5] : memref<64x128xbf16, #tpu.memory_space<vmem>>, vector<64x128xbf16>
    %cst = arith.constant dense<0.000000e+00> : vector<64x128xf32>
    %7 = tpu.matmul %5, %6, %cst {dimension_numbers = #tpu.dot_dimension_numbers<[1], [0], [0], [1], [0, 0, 1, 1], [], []>} : vector<64x64xbf16>, vector<64x128xbf16>, vector<64x128xf32> -> vector<64x128xf32>
    %8 = arith.addf %4, %7 : vector<64x128xf32>
    %c0_6 = arith.constant 0 : index
    %c0_7 = arith.constant 0 : index
    %9 = vector.load %arg7[%c0_6, %c0_7] : memref<64x128xf32, #tpu.memory_space<vmem>>, vector<64x128xf32>
    tpu.vector_store %arg7[%c0_6, %c0_7], %8 {strides = array<i32>} : memref<64x128xf32, #tpu.memory_space<vmem>>, vector<64x128xf32>,
    %c0_i32_8 = arith.constant 0 : i32
    %10 = arith.cmpi eq, %arg2, %c0_i32_8 : i32
    %11 = arith.extui %10 : i1 to i32
    %c0_i32_9 = arith.constant 0 : i32
    %12 = arith.cmpi ne, %11, %c0_i32_9 : i32
    scf.if %12 {
      %c0_10 = arith.constant 0 : index
      %c0_11 = arith.constant 0 : index
      %13 = vector.load %arg7[%c0_10, %c0_11] : memref<64x128xf32, #tpu.memory_space<vmem>>, vector<64x128xf32>
      %c0_12 = arith.constant 0 : index
      %c0_13 = arith.constant 0 : index
      %14 = vector.load %arg5[%c0_12, %c0_13] : memref<1x128xf32, #tpu.memory_space<vmem>>, vector<1x128xf32>
      %15 = vector.broadcast %14 : vector<1x128xf32> to vector<64x128xf32>
      %16 = arith.addf %13, %15 : vector<64x128xf32>
      %c0_14 = arith.constant 0 : index
      %c0_15 = arith.constant 0 : index
      %17 = vector.load %arg6[%c0_14, %c0_15] : memref<64x128xf32, #tpu.memory_space<vmem>>, vector<64x128xf32>
      tpu.vector_store %arg6[%c0_14, %c0_15], %16 {strides = array<i32>} : memref<64x128xf32, #tpu.memory_space<vmem>>, vector<64x128xf32>,
    } else {
    }
    return
  }
  func.func @transform_0(%arg0: i32, %arg1: i32, %arg2: i32) -> (i32, i32) {
    %c0_i32 = arith.constant 0 : i32
    return %arg0, %arg2 : i32, i32
  }
  func.func @transform_1(%arg0: i32, %arg1: i32, %arg2: i32) -> (i32, i32) {
    %c0_i32 = arith.constant 0 : i32
    return %arg2, %arg1 : i32, i32
  }
  func.func @transform_2(%arg0: i32, %arg1: i32, %arg2: i32) -> (i32, i32) {
    %c0_i32 = arith.constant 0 : i32
    %c0_i32_0 = arith.constant 0 : i32
    return %c0_i32, %arg1 : i32, i32
  }
  func.func @transform_3(%arg0: i32, %arg1: i32, %arg2: i32) -> (i32, i32) {
    %c0_i32 = arith.constant 0 : i32
    return %arg0, %arg1 : i32, i32
  }
}

module attributes {stable_mosaic.version = 11 : i64} {
  func.func @_linear_kernel(%arg0: i32, %arg1: i32, %arg2: i32, %arg3: memref<64x128xf32, #tpu.memory_space<vmem>>, %arg4: memref<128x384xbf16, #tpu.memory_space<vmem>>, %arg5: memref<1x384xf32, #tpu.memory_space<vmem>>, %arg6: memref<1x128xf32, #tpu.memory_space<vmem>>, %arg7: memref<1x128xf32, #tpu.memory_space<vmem>>, %arg8: memref<64x384xbf16, #tpu.memory_space<vmem>>, %arg9: memref<64x384xf32, #tpu.memory_space<vmem>>) attributes {dimension_semantics = [#tpu.dimension_semantics<parallel>, #tpu.dimension_semantics<parallel>, #tpu.dimension_semantics<arbitrary>], iteration_bounds = array<i64: 2, 1, 1>, scalar_prefetch = 0 : i64, scratch_operands = 1 : i64, tpu.core_type = #tpu.core_type<tc>, window_params = [{transform_indices = @transform_0, window_bounds = array<i64: 64, 128>}, {transform_indices = @transform_1, window_bounds = array<i64: 128, 384>}, {transform_indices = @transform_2, window_bounds = array<i64: 1, 384>}, {transform_indices = @transform_3, window_bounds = array<i64: 1, 128>}, {transform_indices = @transform_4, window_bounds = array<i64: 1, 128>}, {transform_indices = @transform_5, window_bounds = array<i64: 64, 384>}]} {
    %c0_i32 = arith.constant 0 : i32
    %0 = arith.cmpi eq, %arg2, %c0_i32 : i32
    %1 = arith.extui %0 : i1 to i32
    %c0_i32_0 = arith.constant 0 : i32
    %2 = arith.cmpi ne, %1, %c0_i32_0 : i32
    scf.if %2 {
      %cst_19 = arith.constant 0.000000e+00 : f32
      %35 = vector.broadcast %cst_19 : f32 to vector<64x384xf32>
      %c0_20 = arith.constant 0 : index
      %c0_21 = arith.constant 0 : index
      %36 = vector.load %arg9[%c0_20, %c0_21] : memref<64x384xf32, #tpu.memory_space<vmem>>, vector<64x384xf32>
      tpu.vector_store %arg9[%c0_20, %c0_21], %35 {strides = array<i32>} : memref<64x384xf32, #tpu.memory_space<vmem>>, vector<64x384xf32>,
    } else {
    }
    %c0 = arith.constant 0 : index
    %c0_1 = arith.constant 0 : index
    %3 = vector.load %arg3[%c0, %c0_1] : memref<64x128xf32, #tpu.memory_space<vmem>>, vector<64x128xf32>
    %cst = arith.constant dense<0.000000e+00> : vector<64xf32>
    %4 = vector.multi_reduction <add>, %3, %cst [1] : vector<64x128xf32> to vector<64xf32>
    %5 = vector.shape_cast %4 : vector<64xf32> to vector<64x1xf32>
    %cst_2 = arith.constant 1.280000e+02 : f32
    %6 = vector.broadcast %cst_2 : f32 to vector<64x1xf32>
    %7 = arith.divf %5, %6 : vector<64x1xf32>
    %8 = vector.broadcast %7 : vector<64x1xf32> to vector<64x128xf32>
    %9 = arith.subf %3, %8 : vector<64x128xf32>
    %10 = arith.mulf %9, %9 : vector<64x128xf32>
    %cst_3 = arith.constant dense<0.000000e+00> : vector<64xf32>
    %11 = vector.multi_reduction <add>, %10, %cst_3 [1] : vector<64x128xf32> to vector<64xf32>
    %12 = vector.shape_cast %11 : vector<64xf32> to vector<64x1xf32>
    %cst_4 = arith.constant 1.280000e+02 : f32
    %13 = vector.broadcast %cst_4 : f32 to vector<64x1xf32>
    %14 = arith.divf %12, %13 : vector<64x1xf32>
    %cst_5 = arith.constant 9.99999974E-6 : f32
    %15 = vector.broadcast %cst_5 : f32 to vector<64x1xf32>
    %16 = arith.addf %14, %15 : vector<64x1xf32>
    %17 = math.rsqrt %16 : vector<64x1xf32>
    %18 = vector.broadcast %17 : vector<64x1xf32> to vector<64x128xf32>
    %19 = arith.mulf %9, %18 : vector<64x128xf32>
    %c0_6 = arith.constant 0 : index
    %c0_7 = arith.constant 0 : index
    %20 = vector.load %arg6[%c0_6, %c0_7] : memref<1x128xf32, #tpu.memory_space<vmem>>, vector<1x128xf32>
    %21 = vector.broadcast %20 : vector<1x128xf32> to vector<64x128xf32>
    %22 = arith.mulf %19, %21 : vector<64x128xf32>
    %c0_8 = arith.constant 0 : index
    %c0_9 = arith.constant 0 : index
    %23 = vector.load %arg7[%c0_8, %c0_9] : memref<1x128xf32, #tpu.memory_space<vmem>>, vector<1x128xf32>
    %24 = vector.broadcast %23 : vector<1x128xf32> to vector<64x128xf32>
    %25 = arith.addf %22, %24 : vector<64x128xf32>
    %c0_10 = arith.constant 0 : index
    %c0_11 = arith.constant 0 : index
    %26 = vector.load %arg9[%c0_10, %c0_11] : memref<64x384xf32, #tpu.memory_space<vmem>>, vector<64x384xf32>
    %27 = arith.truncf %25 : vector<64x128xf32> to vector<64x128xbf16>
    %c0_12 = arith.constant 0 : index
    %c0_13 = arith.constant 0 : index
    %28 = vector.load %arg4[%c0_12, %c0_13] : memref<128x384xbf16, #tpu.memory_space<vmem>>, vector<128x384xbf16>
    %cst_14 = arith.constant dense<0.000000e+00> : vector<64x384xf32>
    %29 = tpu.matmul %27, %28, %cst_14 {dimension_numbers = #tpu.dot_dimension_numbers<[1], [0], [0], [1], [0, 0, 1, 1], [], []>} : vector<64x128xbf16>, vector<128x384xbf16>, vector<64x384xf32> -> vector<64x384xf32>
    %30 = arith.addf %26, %29 : vector<64x384xf32>
    %c0_15 = arith.constant 0 : index
    %c0_16 = arith.constant 0 : index
    %31 = vector.load %arg9[%c0_15, %c0_16] : memref<64x384xf32, #tpu.memory_space<vmem>>, vector<64x384xf32>
    tpu.vector_store %arg9[%c0_15, %c0_16], %30 {strides = array<i32>} : memref<64x384xf32, #tpu.memory_space<vmem>>, vector<64x384xf32>,
    %c0_i32_17 = arith.constant 0 : i32
    %32 = arith.cmpi eq, %arg2, %c0_i32_17 : i32
    %33 = arith.extui %32 : i1 to i32
    %c0_i32_18 = arith.constant 0 : i32
    %34 = arith.cmpi ne, %33, %c0_i32_18 : i32
    scf.if %34 {
      %c0_19 = arith.constant 0 : index
      %c0_20 = arith.constant 0 : index
      %35 = vector.load %arg9[%c0_19, %c0_20] : memref<64x384xf32, #tpu.memory_space<vmem>>, vector<64x384xf32>
      %c0_21 = arith.constant 0 : index
      %c0_22 = arith.constant 0 : index
      %36 = vector.load %arg5[%c0_21, %c0_22] : memref<1x384xf32, #tpu.memory_space<vmem>>, vector<1x384xf32>
      %37 = vector.broadcast %36 : vector<1x384xf32> to vector<64x384xf32>
      %38 = arith.addf %35, %37 : vector<64x384xf32>
      %39 = arith.truncf %38 : vector<64x384xf32> to vector<64x384xbf16>
      %c0_23 = arith.constant 0 : index
      %c0_24 = arith.constant 0 : index
      %40 = vector.load %arg8[%c0_23, %c0_24] : memref<64x384xbf16, #tpu.memory_space<vmem>>, vector<64x384xbf16>
      tpu.vector_store %arg8[%c0_23, %c0_24], %39 {strides = array<i32>} : memref<64x384xbf16, #tpu.memory_space<vmem>>, vector<64x384xbf16>,
    } else {
    }
    return
  }
  func.func @transform_0(%arg0: i32, %arg1: i32, %arg2: i32) -> (i32, i32) {
    %c0_i32 = arith.constant 0 : i32
    return %arg0, %arg2 : i32, i32
  }
  func.func @transform_1(%arg0: i32, %arg1: i32, %arg2: i32) -> (i32, i32) {
    %c0_i32 = arith.constant 0 : i32
    return %arg2, %arg1 : i32, i32
  }
  func.func @transform_2(%arg0: i32, %arg1: i32, %arg2: i32) -> (i32, i32) {
    %c0_i32 = arith.constant 0 : i32
    %c0_i32_0 = arith.constant 0 : i32
    return %c0_i32, %arg1 : i32, i32
  }
  func.func @transform_3(%arg0: i32, %arg1: i32, %arg2: i32) -> (i32, i32) {
    %c0_i32 = arith.constant 0 : i32
    %c0_i32_0 = arith.constant 0 : i32
    return %c0_i32, %arg2 : i32, i32
  }
  func.func @transform_4(%arg0: i32, %arg1: i32, %arg2: i32) -> (i32, i32) {
    %c0_i32 = arith.constant 0 : i32
    %c0_i32_0 = arith.constant 0 : i32
    return %c0_i32, %arg2 : i32, i32
  }
  func.func @transform_5(%arg0: i32, %arg1: i32, %arg2: i32) -> (i32, i32) {
    %c0_i32 = arith.constant 0 : i32
    return %arg0, %arg1 : i32, i32
  }
}

module attributes {stable_mosaic.version = 11 : i64} {
  func.func @_attention_kernel(%arg0: i32, %arg1: memref<1x64x384xbf16, #tpu.memory_space<vmem>>, %arg2: memref<1x64x128xbf16, #tpu.memory_space<vmem>>) attributes {dimension_semantics = [#tpu.dimension_semantics<parallel>], iteration_bounds = array<i64: 2>, scalar_prefetch = 0 : i64, scratch_operands = 0 : i64, tpu.core_type = #tpu.core_type<tc>, window_params = [{transform_indices = @transform_0, window_bounds = array<i64: 1, 64, 384>}, {transform_indices = @transform_1, window_bounds = array<i64: 1, 64, 128>}]} {
    %c0 = arith.constant 0 : index
    %c0_0 = arith.constant 0 : index
    %c0_1 = arith.constant 0 : index
    %0 = vector.load %arg1[%c0, %c0_0, %c0_1] : memref<1x64x384xbf16, #tpu.memory_space<vmem>>, vector<1x64x384xbf16>
    %1 = vector.shape_cast %0 : vector<1x64x384xbf16> to vector<64x384xbf16>
    %2 = vector.extract_strided_slice %1 {offsets = [0, 0], sizes = [64, 128], strides = [1, 1]} : vector<64x384xbf16> to vector<64x128xbf16>
    %3 = vector.extract_strided_slice %1 {offsets = [0, 128], sizes = [64, 128], strides = [1, 1]} : vector<64x384xbf16> to vector<64x128xbf16>
    %4 = vector.extract_strided_slice %1 {offsets = [0, 256], sizes = [64, 128], strides = [1, 1]} : vector<64x384xbf16> to vector<64x128xbf16>
    %5 = vector.extract_strided_slice %2 {offsets = [0, 0], sizes = [64, 32], strides = [1, 1]} : vector<64x128xbf16> to vector<64x32xbf16>
    %6 = vector.extract_strided_slice %3 {offsets = [0, 0], sizes = [64, 32], strides = [1, 1]} : vector<64x128xbf16> to vector<64x32xbf16>
    %cst = arith.constant dense<0.000000e+00> : vector<64x64xf32>
    %7 = tpu.matmul %5, %6, %cst {dimension_numbers = #tpu.dot_dimension_numbers<[1], [1], [0], [0], [0, 0, 1, 0], [], []>} : vector<64x32xbf16>, vector<64x32xbf16>, vector<64x64xf32> -> vector<64x64xf32>
    %cst_2 = arith.constant dense<0xFF800000> : vector<64xf32>
    %8 = vector.multi_reduction <maximumf>, %7, %cst_2 [1] : vector<64x64xf32> to vector<64xf32>
    %9 = vector.shape_cast %8 : vector<64xf32> to vector<64x1xf32>
    %10 = vector.broadcast %9 : vector<64x1xf32> to vector<64x64xf32>
    %11 = arith.subf %7, %10 : vector<64x64xf32>
    %12 = math.exp %11 : vector<64x64xf32>
    %cst_3 = arith.constant dense<0.000000e+00> : vector<64xf32>
    %13 = vector.multi_reduction <add>, %12, %cst_3 [1] : vector<64x64xf32> to vector<64xf32>
    %14 = vector.shape_cast %13 : vector<64xf32> to vector<64x1xf32>
    %15 = tpu.reciprocal %14 {approx = true} : vector<64x1xf32> -> vector<64x1xf32>
    %16 = vector.broadcast %15 : vector<64x1xf32> to vector<64x64xf32>
    %17 = arith.mulf %12, %16 : vector<64x64xf32>
    %18 = arith.truncf %17 : vector<64x64xf32> to vector<64x64xbf16>
    %19 = vector.extract_strided_slice %4 {offsets = [0, 0], sizes = [64, 32], strides = [1, 1]} : vector<64x128xbf16> to vector<64x32xbf16>
    %cst_4 = arith.constant dense<0.000000e+00> : vector<64x32xf32>
    %20 = tpu.matmul %18, %19, %cst_4 {dimension_numbers = #tpu.dot_dimension_numbers<[1], [0], [0], [1], [0, 0, 1, 1], [], []>} : vector<64x64xbf16>, vector<64x32xbf16>, vector<64x32xf32> -> vector<64x32xf32>
    %21 = vector.extract_strided_slice %2 {offsets = [0, 32], sizes = [64, 32], strides = [1, 1]} : vector<64x128xbf16> to vector<64x32xbf16>
    %22 = vector.extract_strided_slice %3 {offsets = [0, 32], sizes = [64, 32], strides = [1, 1]} : vector<64x128xbf16> to vector<64x32xbf16>
    %cst_5 = arith.constant dense<0.000000e+00> : vector<64x64xf32>
    %23 = tpu.matmul %21, %22, %cst_5 {dimension_numbers = #tpu.dot_dimension_numbers<[1], [1], [0], [0], [0, 0, 1, 0], [], []>} : vector<64x32xbf16>, vector<64x32xbf16>, vector<64x64xf32> -> vector<64x64xf32>
    %cst_6 = arith.constant dense<0xFF800000> : vector<64xf32>
    %24 = vector.multi_reduction <maximumf>, %23, %cst_6 [1] : vector<64x64xf32> to vector<64xf32>
    %25 = vector.shape_cast %24 : vector<64xf32> to vector<64x1xf32>
    %26 = vector.broadcast %25 : vector<64x1xf32> to vector<64x64xf32>
    %27 = arith.subf %23, %26 : vector<64x64xf32>
    %28 = math.exp %27 : vector<64x64xf32>
    %cst_7 = arith.constant dense<0.000000e+00> : vector<64xf32>
    %29 = vector.multi_reduction <add>, %28, %cst_7 [1] : vector<64x64xf32> to vector<64xf32>
    %30 = vector.shape_cast %29 : vector<64xf32> to vector<64x1xf32>
    %31 = tpu.reciprocal %30 {approx = true} : vector<64x1xf32> -> vector<64x1xf32>
    %32 = vector.broadcast %31 : vector<64x1xf32> to vector<64x64xf32>
    %33 = arith.mulf %28, %32 : vector<64x64xf32>
    %34 = arith.truncf %33 : vector<64x64xf32> to vector<64x64xbf16>
    %35 = vector.extract_strided_slice %4 {offsets = [0, 32], sizes = [64, 32], strides = [1, 1]} : vector<64x128xbf16> to vector<64x32xbf16>
    %cst_8 = arith.constant dense<0.000000e+00> : vector<64x32xf32>
    %36 = tpu.matmul %34, %35, %cst_8 {dimension_numbers = #tpu.dot_dimension_numbers<[1], [0], [0], [1], [0, 0, 1, 1], [], []>} : vector<64x64xbf16>, vector<64x32xbf16>, vector<64x32xf32> -> vector<64x32xf32>
    %37 = vector.extract_strided_slice %2 {offsets = [0, 64], sizes = [64, 32], strides = [1, 1]} : vector<64x128xbf16> to vector<64x32xbf16>
    %38 = vector.extract_strided_slice %3 {offsets = [0, 64], sizes = [64, 32], strides = [1, 1]} : vector<64x128xbf16> to vector<64x32xbf16>
    %cst_9 = arith.constant dense<0.000000e+00> : vector<64x64xf32>
    %39 = tpu.matmul %37, %38, %cst_9 {dimension_numbers = #tpu.dot_dimension_numbers<[1], [1], [0], [0], [0, 0, 1, 0], [], []>} : vector<64x32xbf16>, vector<64x32xbf16>, vector<64x64xf32> -> vector<64x64xf32>
    %cst_10 = arith.constant dense<0xFF800000> : vector<64xf32>
    %40 = vector.multi_reduction <maximumf>, %39, %cst_10 [1] : vector<64x64xf32> to vector<64xf32>
    %41 = vector.shape_cast %40 : vector<64xf32> to vector<64x1xf32>
    %42 = vector.broadcast %41 : vector<64x1xf32> to vector<64x64xf32>
    %43 = arith.subf %39, %42 : vector<64x64xf32>
    %44 = math.exp %43 : vector<64x64xf32>
    %cst_11 = arith.constant dense<0.000000e+00> : vector<64xf32>
    %45 = vector.multi_reduction <add>, %44, %cst_11 [1] : vector<64x64xf32> to vector<64xf32>
    %46 = vector.shape_cast %45 : vector<64xf32> to vector<64x1xf32>
    %47 = tpu.reciprocal %46 {approx = true} : vector<64x1xf32> -> vector<64x1xf32>
    %48 = vector.broadcast %47 : vector<64x1xf32> to vector<64x64xf32>
    %49 = arith.mulf %44, %48 : vector<64x64xf32>
    %50 = arith.truncf %49 : vector<64x64xf32> to vector<64x64xbf16>
    %51 = vector.extract_strided_slice %4 {offsets = [0, 64], sizes = [64, 32], strides = [1, 1]} : vector<64x128xbf16> to vector<64x32xbf16>
    %cst_12 = arith.constant dense<0.000000e+00> : vector<64x32xf32>
    %52 = tpu.matmul %50, %51, %cst_12 {dimension_numbers = #tpu.dot_dimension_numbers<[1], [0], [0], [1], [0, 0, 1, 1], [], []>} : vector<64x64xbf16>, vector<64x32xbf16>, vector<64x32xf32> -> vector<64x32xf32>
    %53 = vector.extract_strided_slice %2 {offsets = [0, 96], sizes = [64, 32], strides = [1, 1]} : vector<64x128xbf16> to vector<64x32xbf16>
    %54 = vector.extract_strided_slice %3 {offsets = [0, 96], sizes = [64, 32], strides = [1, 1]} : vector<64x128xbf16> to vector<64x32xbf16>
    %cst_13 = arith.constant dense<0.000000e+00> : vector<64x64xf32>
    %55 = tpu.matmul %53, %54, %cst_13 {dimension_numbers = #tpu.dot_dimension_numbers<[1], [1], [0], [0], [0, 0, 1, 0], [], []>} : vector<64x32xbf16>, vector<64x32xbf16>, vector<64x64xf32> -> vector<64x64xf32>
    %cst_14 = arith.constant dense<0xFF800000> : vector<64xf32>
    %56 = vector.multi_reduction <maximumf>, %55, %cst_14 [1] : vector<64x64xf32> to vector<64xf32>
    %57 = vector.shape_cast %56 : vector<64xf32> to vector<64x1xf32>
    %58 = vector.broadcast %57 : vector<64x1xf32> to vector<64x64xf32>
    %59 = arith.subf %55, %58 : vector<64x64xf32>
    %60 = math.exp %59 : vector<64x64xf32>
    %cst_15 = arith.constant dense<0.000000e+00> : vector<64xf32>
    %61 = vector.multi_reduction <add>, %60, %cst_15 [1] : vector<64x64xf32> to vector<64xf32>
    %62 = vector.shape_cast %61 : vector<64xf32> to vector<64x1xf32>
    %63 = tpu.reciprocal %62 {approx = true} : vector<64x1xf32> -> vector<64x1xf32>
    %64 = vector.broadcast %63 : vector<64x1xf32> to vector<64x64xf32>
    %65 = arith.mulf %60, %64 : vector<64x64xf32>
    %66 = arith.truncf %65 : vector<64x64xf32> to vector<64x64xbf16>
    %67 = vector.extract_strided_slice %4 {offsets = [0, 96], sizes = [64, 32], strides = [1, 1]} : vector<64x128xbf16> to vector<64x32xbf16>
    %cst_16 = arith.constant dense<0.000000e+00> : vector<64x32xf32>
    %68 = tpu.matmul %66, %67, %cst_16 {dimension_numbers = #tpu.dot_dimension_numbers<[1], [0], [0], [1], [0, 0, 1, 1], [], []>} : vector<64x64xbf16>, vector<64x32xbf16>, vector<64x32xf32> -> vector<64x32xf32>
    %69 = tpu.concatenate %20, %36, %52, %68 in 1 : vector<64x32xf32>, vector<64x32xf32>, vector<64x32xf32>, vector<64x32xf32> -> vector<64x128xf32>
    %70 = arith.truncf %69 : vector<64x128xf32> to vector<64x128xbf16>
    %c0_17 = arith.constant 0 : index
    %c0_18 = arith.constant 0 : index
    %c0_19 = arith.constant 0 : index
    %71 = vector.load %arg2[%c0_17, %c0_18, %c0_19] : memref<1x64x128xbf16, #tpu.memory_space<vmem>>, vector<1x64x128xbf16>
    %72 = vector.shape_cast %71 : vector<1x64x128xbf16> to vector<64x128xbf16>
    %73 = vector.shape_cast %70 : vector<64x128xbf16> to vector<1x64x128xbf16>
    tpu.vector_store %arg2[%c0_17, %c0_18, %c0_19], %73 {strides = array<i32>} : memref<1x64x128xbf16, #tpu.memory_space<vmem>>, vector<1x64x128xbf16>,
    return
  }
  func.func @transform_0(%arg0: i32) -> (i32, i32, i32) {
    %c0_i32 = arith.constant 0 : i32
    %c0_i32_0 = arith.constant 0 : i32
    %c0_i32_1 = arith.constant 0 : i32
    return %arg0, %c0_i32, %c0_i32_0 : i32, i32, i32
  }
  func.func @transform_1(%arg0: i32) -> (i32, i32, i32) {
    %c0_i32 = arith.constant 0 : i32
    %c0_i32_0 = arith.constant 0 : i32
    %c0_i32_1 = arith.constant 0 : i32
    return %arg0, %c0_i32, %c0_i32_0 : i32, i32, i32
  }
}

module attributes {stable_mosaic.version = 11 : i64} {
  func.func @_linear_kernel(%arg0: i32, %arg1: i32, %arg2: i32, %arg3: memref<64x128xbf16, #tpu.memory_space<vmem>>, %arg4: memref<128x128xbf16, #tpu.memory_space<vmem>>, %arg5: memref<1x128xf32, #tpu.memory_space<vmem>>, %arg6: memref<64x128xf32, #tpu.memory_space<vmem>>, %arg7: memref<64x128xf32, #tpu.memory_space<vmem>>, %arg8: memref<64x128xf32, #tpu.memory_space<vmem>>) attributes {dimension_semantics = [#tpu.dimension_semantics<parallel>, #tpu.dimension_semantics<parallel>, #tpu.dimension_semantics<arbitrary>], iteration_bounds = array<i64: 2, 1, 1>, scalar_prefetch = 0 : i64, scratch_operands = 1 : i64, tpu.core_type = #tpu.core_type<tc>, window_params = [{transform_indices = @transform_0, window_bounds = array<i64: 64, 128>}, {transform_indices = @transform_1, window_bounds = array<i64: 128, 128>}, {transform_indices = @transform_2, window_bounds = array<i64: 1, 128>}, {transform_indices = @transform_3, window_bounds = array<i64: 64, 128>}, {transform_indices = @transform_4, window_bounds = array<i64: 64, 128>}]} {
    %c0_i32 = arith.constant 0 : i32
    %0 = arith.cmpi eq, %arg2, %c0_i32 : i32
    %1 = arith.extui %0 : i1 to i32
    %c0_i32_0 = arith.constant 0 : i32
    %2 = arith.cmpi ne, %1, %c0_i32_0 : i32
    scf.if %2 {
      %cst_10 = arith.constant 0.000000e+00 : f32
      %12 = vector.broadcast %cst_10 : f32 to vector<64x128xf32>
      %c0_11 = arith.constant 0 : index
      %c0_12 = arith.constant 0 : index
      %13 = vector.load %arg8[%c0_11, %c0_12] : memref<64x128xf32, #tpu.memory_space<vmem>>, vector<64x128xf32>
      tpu.vector_store %arg8[%c0_11, %c0_12], %12 {strides = array<i32>} : memref<64x128xf32, #tpu.memory_space<vmem>>, vector<64x128xf32>,
    } else {
    }
    %c0 = arith.constant 0 : index
    %c0_1 = arith.constant 0 : index
    %3 = vector.load %arg3[%c0, %c0_1] : memref<64x128xbf16, #tpu.memory_space<vmem>>, vector<64x128xbf16>
    %c0_2 = arith.constant 0 : index
    %c0_3 = arith.constant 0 : index
    %4 = vector.load %arg8[%c0_2, %c0_3] : memref<64x128xf32, #tpu.memory_space<vmem>>, vector<64x128xf32>
    %c0_4 = arith.constant 0 : index
    %c0_5 = arith.constant 0 : index
    %5 = vector.load %arg4[%c0_4, %c0_5] : memref<128x128xbf16, #tpu.memory_space<vmem>>, vector<128x128xbf16>
    %cst = arith.constant dense<0.000000e+00> : vector<64x128xf32>
    %6 = tpu.matmul %3, %5, %cst {dimension_numbers = #tpu.dot_dimension_numbers<[1], [0], [0], [1], [0, 0, 1, 1], [], []>} : vector<64x128xbf16>, vector<128x128xbf16>, vector<64x128xf32> -> vector<64x128xf32>
    %7 = arith.addf %4, %6 : vector<64x128xf32>
    %c0_6 = arith.constant 0 : index
    %c0_7 = arith.constant 0 : index
    %8 = vector.load %arg8[%c0_6, %c0_7] : memref<64x128xf32, #tpu.memory_space<vmem>>, vector<64x128xf32>
    tpu.vector_store %arg8[%c0_6, %c0_7], %7 {strides = array<i32>} : memref<64x128xf32, #tpu.memory_space<vmem>>, vector<64x128xf32>,
    %c0_i32_8 = arith.constant 0 : i32
    %9 = arith.cmpi eq, %arg2, %c0_i32_8 : i32
    %10 = arith.extui %9 : i1 to i32
    %c0_i32_9 = arith.constant 0 : i32
    %11 = arith.cmpi ne, %10, %c0_i32_9 : i32
    scf.if %11 {
      %c0_10 = arith.constant 0 : index
      %c0_11 = arith.constant 0 : index
      %12 = vector.load %arg8[%c0_10, %c0_11] : memref<64x128xf32, #tpu.memory_space<vmem>>, vector<64x128xf32>
      %c0_12 = arith.constant 0 : index
      %c0_13 = arith.constant 0 : index
      %13 = vector.load %arg5[%c0_12, %c0_13] : memref<1x128xf32, #tpu.memory_space<vmem>>, vector<1x128xf32>
      %14 = vector.broadcast %13 : vector<1x128xf32> to vector<64x128xf32>
      %15 = arith.addf %12, %14 : vector<64x128xf32>
      %c0_14 = arith.constant 0 : index
      %c0_15 = arith.constant 0 : index
      %16 = vector.load %arg6[%c0_14, %c0_15] : memref<64x128xf32, #tpu.memory_space<vmem>>, vector<64x128xf32>
      %17 = arith.addf %15, %16 : vector<64x128xf32>
      %c0_16 = arith.constant 0 : index
      %c0_17 = arith.constant 0 : index
      %18 = vector.load %arg7[%c0_16, %c0_17] : memref<64x128xf32, #tpu.memory_space<vmem>>, vector<64x128xf32>
      tpu.vector_store %arg7[%c0_16, %c0_17], %17 {strides = array<i32>} : memref<64x128xf32, #tpu.memory_space<vmem>>, vector<64x128xf32>,
    } else {
    }
    return
  }
  func.func @transform_0(%arg0: i32, %arg1: i32, %arg2: i32) -> (i32, i32) {
    %c0_i32 = arith.constant 0 : i32
    return %arg0, %arg2 : i32, i32
  }
  func.func @transform_1(%arg0: i32, %arg1: i32, %arg2: i32) -> (i32, i32) {
    %c0_i32 = arith.constant 0 : i32
    return %arg2, %arg1 : i32, i32
  }
  func.func @transform_2(%arg0: i32, %arg1: i32, %arg2: i32) -> (i32, i32) {
    %c0_i32 = arith.constant 0 : i32
    %c0_i32_0 = arith.constant 0 : i32
    return %c0_i32, %arg1 : i32, i32
  }
  func.func @transform_3(%arg0: i32, %arg1: i32, %arg2: i32) -> (i32, i32) {
    %c0_i32 = arith.constant 0 : i32
    return %arg0, %arg1 : i32, i32
  }
  func.func @transform_4(%arg0: i32, %arg1: i32, %arg2: i32) -> (i32, i32) {
    %c0_i32 = arith.constant 0 : i32
    return %arg0, %arg1 : i32, i32
  }
}

module attributes {stable_mosaic.version = 11 : i64} {
  func.func @_linear_kernel(%arg0: i32, %arg1: i32, %arg2: i32, %arg3: memref<64x128xf32, #tpu.memory_space<vmem>>, %arg4: memref<128x256xbf16, #tpu.memory_space<vmem>>, %arg5: memref<1x256xf32, #tpu.memory_space<vmem>>, %arg6: memref<1x128xf32, #tpu.memory_space<vmem>>, %arg7: memref<1x128xf32, #tpu.memory_space<vmem>>, %arg8: memref<64x256xbf16, #tpu.memory_space<vmem>>, %arg9: memref<64x256xf32, #tpu.memory_space<vmem>>) attributes {dimension_semantics = [#tpu.dimension_semantics<parallel>, #tpu.dimension_semantics<parallel>, #tpu.dimension_semantics<arbitrary>], iteration_bounds = array<i64: 2, 1, 1>, scalar_prefetch = 0 : i64, scratch_operands = 1 : i64, tpu.core_type = #tpu.core_type<tc>, window_params = [{transform_indices = @transform_0, window_bounds = array<i64: 64, 128>}, {transform_indices = @transform_1, window_bounds = array<i64: 128, 256>}, {transform_indices = @transform_2, window_bounds = array<i64: 1, 256>}, {transform_indices = @transform_3, window_bounds = array<i64: 1, 128>}, {transform_indices = @transform_4, window_bounds = array<i64: 1, 128>}, {transform_indices = @transform_5, window_bounds = array<i64: 64, 256>}]} {
    %c0_i32 = arith.constant 0 : i32
    %0 = arith.cmpi eq, %arg2, %c0_i32 : i32
    %1 = arith.extui %0 : i1 to i32
    %c0_i32_0 = arith.constant 0 : i32
    %2 = arith.cmpi ne, %1, %c0_i32_0 : i32
    scf.if %2 {
      %cst_19 = arith.constant 0.000000e+00 : f32
      %35 = vector.broadcast %cst_19 : f32 to vector<64x256xf32>
      %c0_20 = arith.constant 0 : index
      %c0_21 = arith.constant 0 : index
      %36 = vector.load %arg9[%c0_20, %c0_21] : memref<64x256xf32, #tpu.memory_space<vmem>>, vector<64x256xf32>
      tpu.vector_store %arg9[%c0_20, %c0_21], %35 {strides = array<i32>} : memref<64x256xf32, #tpu.memory_space<vmem>>, vector<64x256xf32>,
    } else {
    }
    %c0 = arith.constant 0 : index
    %c0_1 = arith.constant 0 : index
    %3 = vector.load %arg3[%c0, %c0_1] : memref<64x128xf32, #tpu.memory_space<vmem>>, vector<64x128xf32>
    %cst = arith.constant dense<0.000000e+00> : vector<64xf32>
    %4 = vector.multi_reduction <add>, %3, %cst [1] : vector<64x128xf32> to vector<64xf32>
    %5 = vector.shape_cast %4 : vector<64xf32> to vector<64x1xf32>
    %cst_2 = arith.constant 1.280000e+02 : f32
    %6 = vector.broadcast %cst_2 : f32 to vector<64x1xf32>
    %7 = arith.divf %5, %6 : vector<64x1xf32>
    %8 = vector.broadcast %7 : vector<64x1xf32> to vector<64x128xf32>
    %9 = arith.subf %3, %8 : vector<64x128xf32>
    %10 = arith.mulf %9, %9 : vector<64x128xf32>
    %cst_3 = arith.constant dense<0.000000e+00> : vector<64xf32>
    %11 = vector.multi_reduction <add>, %10, %cst_3 [1] : vector<64x128xf32> to vector<64xf32>
    %12 = vector.shape_cast %11 : vector<64xf32> to vector<64x1xf32>
    %cst_4 = arith.constant 1.280000e+02 : f32
    %13 = vector.broadcast %cst_4 : f32 to vector<64x1xf32>
    %14 = arith.divf %12, %13 : vector<64x1xf32>
    %cst_5 = arith.constant 9.99999974E-6 : f32
    %15 = vector.broadcast %cst_5 : f32 to vector<64x1xf32>
    %16 = arith.addf %14, %15 : vector<64x1xf32>
    %17 = math.rsqrt %16 : vector<64x1xf32>
    %18 = vector.broadcast %17 : vector<64x1xf32> to vector<64x128xf32>
    %19 = arith.mulf %9, %18 : vector<64x128xf32>
    %c0_6 = arith.constant 0 : index
    %c0_7 = arith.constant 0 : index
    %20 = vector.load %arg6[%c0_6, %c0_7] : memref<1x128xf32, #tpu.memory_space<vmem>>, vector<1x128xf32>
    %21 = vector.broadcast %20 : vector<1x128xf32> to vector<64x128xf32>
    %22 = arith.mulf %19, %21 : vector<64x128xf32>
    %c0_8 = arith.constant 0 : index
    %c0_9 = arith.constant 0 : index
    %23 = vector.load %arg7[%c0_8, %c0_9] : memref<1x128xf32, #tpu.memory_space<vmem>>, vector<1x128xf32>
    %24 = vector.broadcast %23 : vector<1x128xf32> to vector<64x128xf32>
    %25 = arith.addf %22, %24 : vector<64x128xf32>
    %c0_10 = arith.constant 0 : index
    %c0_11 = arith.constant 0 : index
    %26 = vector.load %arg9[%c0_10, %c0_11] : memref<64x256xf32, #tpu.memory_space<vmem>>, vector<64x256xf32>
    %27 = arith.truncf %25 : vector<64x128xf32> to vector<64x128xbf16>
    %c0_12 = arith.constant 0 : index
    %c0_13 = arith.constant 0 : index
    %28 = vector.load %arg4[%c0_12, %c0_13] : memref<128x256xbf16, #tpu.memory_space<vmem>>, vector<128x256xbf16>
    %cst_14 = arith.constant dense<0.000000e+00> : vector<64x256xf32>
    %29 = tpu.matmul %27, %28, %cst_14 {dimension_numbers = #tpu.dot_dimension_numbers<[1], [0], [0], [1], [0, 0, 1, 1], [], []>} : vector<64x128xbf16>, vector<128x256xbf16>, vector<64x256xf32> -> vector<64x256xf32>
    %30 = arith.addf %26, %29 : vector<64x256xf32>
    %c0_15 = arith.constant 0 : index
    %c0_16 = arith.constant 0 : index
    %31 = vector.load %arg9[%c0_15, %c0_16] : memref<64x256xf32, #tpu.memory_space<vmem>>, vector<64x256xf32>
    tpu.vector_store %arg9[%c0_15, %c0_16], %30 {strides = array<i32>} : memref<64x256xf32, #tpu.memory_space<vmem>>, vector<64x256xf32>,
    %c0_i32_17 = arith.constant 0 : i32
    %32 = arith.cmpi eq, %arg2, %c0_i32_17 : i32
    %33 = arith.extui %32 : i1 to i32
    %c0_i32_18 = arith.constant 0 : i32
    %34 = arith.cmpi ne, %33, %c0_i32_18 : i32
    scf.if %34 {
      %c0_19 = arith.constant 0 : index
      %c0_20 = arith.constant 0 : index
      %35 = vector.load %arg9[%c0_19, %c0_20] : memref<64x256xf32, #tpu.memory_space<vmem>>, vector<64x256xf32>
      %c0_21 = arith.constant 0 : index
      %c0_22 = arith.constant 0 : index
      %36 = vector.load %arg5[%c0_21, %c0_22] : memref<1x256xf32, #tpu.memory_space<vmem>>, vector<1x256xf32>
      %37 = vector.broadcast %36 : vector<1x256xf32> to vector<64x256xf32>
      %38 = arith.addf %35, %37 : vector<64x256xf32>
      %cst_23 = arith.constant 5.000000e-01 : f32
      %39 = vector.broadcast %cst_23 : f32 to vector<64x256xf32>
      %40 = arith.mulf %39, %38 : vector<64x256xf32>
      %cst_24 = arith.constant 4.471500e-02 : f32
      %41 = vector.broadcast %cst_24 : f32 to vector<64x256xf32>
      %42 = arith.mulf %41, %38 : vector<64x256xf32>
      %43 = arith.mulf %42, %38 : vector<64x256xf32>
      %44 = arith.mulf %43, %38 : vector<64x256xf32>
      %45 = arith.addf %38, %44 : vector<64x256xf32>
      %cst_25 = arith.constant 0.797884583 : f32
      %46 = vector.broadcast %cst_25 : f32 to vector<64x256xf32>
      %47 = arith.mulf %46, %45 : vector<64x256xf32>
      %48 = math.tanh %47 : vector<64x256xf32>
      %cst_26 = arith.constant 1.000000e+00 : f32
      %49 = vector.broadcast %cst_26 : f32 to vector<64x256xf32>
      %50 = arith.addf %49, %48 : vector<64x256xf32>
      %51 = arith.mulf %40, %50 : vector<64x256xf32>
      %52 = arith.truncf %51 : vector<64x256xf32> to vector<64x256xbf16>
      %c0_27 = arith.constant 0 : index
      %c0_28 = arith.constant 0 : index
      %53 = vector.load %arg8[%c0_27, %c0_28] : memref<64x256xbf16, #tpu.memory_space<vmem>>, vector<64x256xbf16>
      tpu.vector_store %arg8[%c0_27, %c0_28], %52 {strides = array<i32>} : memref<64x256xbf16, #tpu.memory_space<vmem>>, vector<64x256xbf16>,
    } else {
    }
    return
  }
  func.func @transform_0(%arg0: i32, %arg1: i32, %arg2: i32) -> (i32, i32) {
    %c0_i32 = arith.constant 0 : i32
    return %arg0, %arg2 : i32, i32
  }
  func.func @transform_1(%arg0: i32, %arg1: i32, %arg2: i32) -> (i32, i32) {
    %c0_i32 = arith.constant 0 : i32
    return %arg2, %arg1 : i32, i32
  }
  func.func @transform_2(%arg0: i32, %arg1: i32, %arg2: i32) -> (i32, i32) {
    %c0_i32 = arith.constant 0 : i32
    %c0_i32_0 = arith.constant 0 : i32
    return %c0_i32, %arg1 : i32, i32
  }
  func.func @transform_3(%arg0: i32, %arg1: i32, %arg2: i32) -> (i32, i32) {
    %c0_i32 = arith.constant 0 : i32
    %c0_i32_0 = arith.constant 0 : i32
    return %c0_i32, %arg2 : i32, i32
  }
  func.func @transform_4(%arg0: i32, %arg1: i32, %arg2: i32) -> (i32, i32) {
    %c0_i32 = arith.constant 0 : i32
    %c0_i32_0 = arith.constant 0 : i32
    return %c0_i32, %arg2 : i32, i32
  }
  func.func @transform_5(%arg0: i32, %arg1: i32, %arg2: i32) -> (i32, i32) {
    %c0_i32 = arith.constant 0 : i32
    return %arg0, %arg1 : i32, i32
  }
}

module attributes {stable_mosaic.version = 11 : i64} {
  func.func @_linear_kernel(%arg0: i32, %arg1: i32, %arg2: i32, %arg3: memref<64x256xbf16, #tpu.memory_space<vmem>>, %arg4: memref<256x128xbf16, #tpu.memory_space<vmem>>, %arg5: memref<1x128xf32, #tpu.memory_space<vmem>>, %arg6: memref<64x128xf32, #tpu.memory_space<vmem>>, %arg7: memref<64x128xf32, #tpu.memory_space<vmem>>, %arg8: memref<64x128xf32, #tpu.memory_space<vmem>>) attributes {dimension_semantics = [#tpu.dimension_semantics<parallel>, #tpu.dimension_semantics<parallel>, #tpu.dimension_semantics<arbitrary>], iteration_bounds = array<i64: 2, 1, 1>, scalar_prefetch = 0 : i64, scratch_operands = 1 : i64, tpu.core_type = #tpu.core_type<tc>, window_params = [{transform_indices = @transform_0, window_bounds = array<i64: 64, 256>}, {transform_indices = @transform_1, window_bounds = array<i64: 256, 128>}, {transform_indices = @transform_2, window_bounds = array<i64: 1, 128>}, {transform_indices = @transform_3, window_bounds = array<i64: 64, 128>}, {transform_indices = @transform_4, window_bounds = array<i64: 64, 128>}]} {
    %c0_i32 = arith.constant 0 : i32
    %0 = arith.cmpi eq, %arg2, %c0_i32 : i32
    %1 = arith.extui %0 : i1 to i32
    %c0_i32_0 = arith.constant 0 : i32
    %2 = arith.cmpi ne, %1, %c0_i32_0 : i32
    scf.if %2 {
      %cst_10 = arith.constant 0.000000e+00 : f32
      %12 = vector.broadcast %cst_10 : f32 to vector<64x128xf32>
      %c0_11 = arith.constant 0 : index
      %c0_12 = arith.constant 0 : index
      %13 = vector.load %arg8[%c0_11, %c0_12] : memref<64x128xf32, #tpu.memory_space<vmem>>, vector<64x128xf32>
      tpu.vector_store %arg8[%c0_11, %c0_12], %12 {strides = array<i32>} : memref<64x128xf32, #tpu.memory_space<vmem>>, vector<64x128xf32>,
    } else {
    }
    %c0 = arith.constant 0 : index
    %c0_1 = arith.constant 0 : index
    %3 = vector.load %arg3[%c0, %c0_1] : memref<64x256xbf16, #tpu.memory_space<vmem>>, vector<64x256xbf16>
    %c0_2 = arith.constant 0 : index
    %c0_3 = arith.constant 0 : index
    %4 = vector.load %arg8[%c0_2, %c0_3] : memref<64x128xf32, #tpu.memory_space<vmem>>, vector<64x128xf32>
    %c0_4 = arith.constant 0 : index
    %c0_5 = arith.constant 0 : index
    %5 = vector.load %arg4[%c0_4, %c0_5] : memref<256x128xbf16, #tpu.memory_space<vmem>>, vector<256x128xbf16>
    %cst = arith.constant dense<0.000000e+00> : vector<64x128xf32>
    %6 = tpu.matmul %3, %5, %cst {dimension_numbers = #tpu.dot_dimension_numbers<[1], [0], [0], [1], [0, 0, 1, 1], [], []>} : vector<64x256xbf16>, vector<256x128xbf16>, vector<64x128xf32> -> vector<64x128xf32>
    %7 = arith.addf %4, %6 : vector<64x128xf32>
    %c0_6 = arith.constant 0 : index
    %c0_7 = arith.constant 0 : index
    %8 = vector.load %arg8[%c0_6, %c0_7] : memref<64x128xf32, #tpu.memory_space<vmem>>, vector<64x128xf32>
    tpu.vector_store %arg8[%c0_6, %c0_7], %7 {strides = array<i32>} : memref<64x128xf32, #tpu.memory_space<vmem>>, vector<64x128xf32>,
    %c0_i32_8 = arith.constant 0 : i32
    %9 = arith.cmpi eq, %arg2, %c0_i32_8 : i32
    %10 = arith.extui %9 : i1 to i32
    %c0_i32_9 = arith.constant 0 : i32
    %11 = arith.cmpi ne, %10, %c0_i32_9 : i32
    scf.if %11 {
      %c0_10 = arith.constant 0 : index
      %c0_11 = arith.constant 0 : index
      %12 = vector.load %arg8[%c0_10, %c0_11] : memref<64x128xf32, #tpu.memory_space<vmem>>, vector<64x128xf32>
      %c0_12 = arith.constant 0 : index
      %c0_13 = arith.constant 0 : index
      %13 = vector.load %arg5[%c0_12, %c0_13] : memref<1x128xf32, #tpu.memory_space<vmem>>, vector<1x128xf32>
      %14 = vector.broadcast %13 : vector<1x128xf32> to vector<64x128xf32>
      %15 = arith.addf %12, %14 : vector<64x128xf32>
      %c0_14 = arith.constant 0 : index
      %c0_15 = arith.constant 0 : index
      %16 = vector.load %arg6[%c0_14, %c0_15] : memref<64x128xf32, #tpu.memory_space<vmem>>, vector<64x128xf32>
      %17 = arith.addf %15, %16 : vector<64x128xf32>
      %c0_16 = arith.constant 0 : index
      %c0_17 = arith.constant 0 : index
      %18 = vector.load %arg7[%c0_16, %c0_17] : memref<64x128xf32, #tpu.memory_space<vmem>>, vector<64x128xf32>
      tpu.vector_store %arg7[%c0_16, %c0_17], %17 {strides = array<i32>} : memref<64x128xf32, #tpu.memory_space<vmem>>, vector<64x128xf32>,
    } else {
    }
    return
  }
  func.func @transform_0(%arg0: i32, %arg1: i32, %arg2: i32) -> (i32, i32) {
    %c0_i32 = arith.constant 0 : i32
    return %arg0, %arg2 : i32, i32
  }
  func.func @transform_1(%arg0: i32, %arg1: i32, %arg2: i32) -> (i32, i32) {
    %c0_i32 = arith.constant 0 : i32
    return %arg2, %arg1 : i32, i32
  }
  func.func @transform_2(%arg0: i32, %arg1: i32, %arg2: i32) -> (i32, i32) {
    %c0_i32 = arith.constant 0 : i32
    %c0_i32_0 = arith.constant 0 : i32
    return %c0_i32, %arg1 : i32, i32
  }
  func.func @transform_3(%arg0: i32, %arg1: i32, %arg2: i32) -> (i32, i32) {
    %c0_i32 = arith.constant 0 : i32
    return %arg0, %arg1 : i32, i32
  }
  func.func @transform_4(%arg0: i32, %arg1: i32, %arg2: i32) -> (i32, i32) {
    %c0_i32 = arith.constant 0 : i32
    return %arg0, %arg1 : i32, i32
  }
}

module attributes {stable_mosaic.version = 11 : i64} {
  func.func @_linear_kernel(%arg0: i32, %arg1: i32, %arg2: i32, %arg3: memref<64x128xf32, #tpu.memory_space<vmem>>, %arg4: memref<128x128xbf16, #tpu.memory_space<vmem>>, %arg5: memref<1x128xf32, #tpu.memory_space<vmem>>, %arg6: memref<64x128xf32, #tpu.memory_space<vmem>>, %arg7: memref<64x128xf32, #tpu.memory_space<vmem>>) attributes {dimension_semantics = [#tpu.dimension_semantics<parallel>, #tpu.dimension_semantics<parallel>, #tpu.dimension_semantics<arbitrary>], iteration_bounds = array<i64: 2, 1, 1>, scalar_prefetch = 0 : i64, scratch_operands = 1 : i64, tpu.core_type = #tpu.core_type<tc>, window_params = [{transform_indices = @transform_0, window_bounds = array<i64: 64, 128>}, {transform_indices = @transform_1, window_bounds = array<i64: 128, 128>}, {transform_indices = @transform_2, window_bounds = array<i64: 1, 128>}, {transform_indices = @transform_3, window_bounds = array<i64: 64, 128>}]} {
    %c0_i32 = arith.constant 0 : i32
    %0 = arith.cmpi eq, %arg2, %c0_i32 : i32
    %1 = arith.extui %0 : i1 to i32
    %c0_i32_0 = arith.constant 0 : i32
    %2 = arith.cmpi ne, %1, %c0_i32_0 : i32
    scf.if %2 {
      %cst_10 = arith.constant 0.000000e+00 : f32
      %13 = vector.broadcast %cst_10 : f32 to vector<64x128xf32>
      %c0_11 = arith.constant 0 : index
      %c0_12 = arith.constant 0 : index
      %14 = vector.load %arg7[%c0_11, %c0_12] : memref<64x128xf32, #tpu.memory_space<vmem>>, vector<64x128xf32>
      tpu.vector_store %arg7[%c0_11, %c0_12], %13 {strides = array<i32>} : memref<64x128xf32, #tpu.memory_space<vmem>>, vector<64x128xf32>,
    } else {
    }
    %c0 = arith.constant 0 : index
    %c0_1 = arith.constant 0 : index
    %3 = vector.load %arg3[%c0, %c0_1] : memref<64x128xf32, #tpu.memory_space<vmem>>, vector<64x128xf32>
    %c0_2 = arith.constant 0 : index
    %c0_3 = arith.constant 0 : index
    %4 = vector.load %arg7[%c0_2, %c0_3] : memref<64x128xf32, #tpu.memory_space<vmem>>, vector<64x128xf32>
    %5 = arith.truncf %3 : vector<64x128xf32> to vector<64x128xbf16>
    %c0_4 = arith.constant 0 : index
    %c0_5 = arith.constant 0 : index
    %6 = vector.load %arg4[%c0_4, %c0_5] : memref<128x128xbf16, #tpu.memory_space<vmem>>, vector<128x128xbf16>
    %cst = arith.constant dense<0.000000e+00> : vector<64x128xf32>
    %7 = tpu.matmul %5, %6, %cst {dimension_numbers = #tpu.dot_dimension_numbers<[1], [0], [0], [1], [0, 0, 1, 1], [], []>} : vector<64x128xbf16>, vector<128x128xbf16>, vector<64x128xf32> -> vector<64x128xf32>
    %8 = arith.addf %4, %7 : vector<64x128xf32>
    %c0_6 = arith.constant 0 : index
    %c0_7 = arith.constant 0 : index
    %9 = vector.load %arg7[%c0_6, %c0_7] : memref<64x128xf32, #tpu.memory_space<vmem>>, vector<64x128xf32>
    tpu.vector_store %arg7[%c0_6, %c0_7], %8 {strides = array<i32>} : memref<64x128xf32, #tpu.memory_space<vmem>>, vector<64x128xf32>,
    %c0_i32_8 = arith.constant 0 : i32
    %10 = arith.cmpi eq, %arg2, %c0_i32_8 : i32
    %11 = arith.extui %10 : i1 to i32
    %c0_i32_9 = arith.constant 0 : i32
    %12 = arith.cmpi ne, %11, %c0_i32_9 : i32
    scf.if %12 {
      %c0_10 = arith.constant 0 : index
      %c0_11 = arith.constant 0 : index
      %13 = vector.load %arg7[%c0_10, %c0_11] : memref<64x128xf32, #tpu.memory_space<vmem>>, vector<64x128xf32>
      %c0_12 = arith.constant 0 : index
      %c0_13 = arith.constant 0 : index
      %14 = vector.load %arg5[%c0_12, %c0_13] : memref<1x128xf32, #tpu.memory_space<vmem>>, vector<1x128xf32>
      %15 = vector.broadcast %14 : vector<1x128xf32> to vector<64x128xf32>
      %16 = arith.addf %13, %15 : vector<64x128xf32>
      %c0_14 = arith.constant 0 : index
      %c0_15 = arith.constant 0 : index
      %17 = vector.load %arg6[%c0_14, %c0_15] : memref<64x128xf32, #tpu.memory_space<vmem>>, vector<64x128xf32>
      tpu.vector_store %arg6[%c0_14, %c0_15], %16 {strides = array<i32>} : memref<64x128xf32, #tpu.memory_space<vmem>>, vector<64x128xf32>,
    } else {
    }
    return
  }
  func.func @transform_0(%arg0: i32, %arg1: i32, %arg2: i32) -> (i32, i32) {
    %c0_i32 = arith.constant 0 : i32
    return %arg0, %arg2 : i32, i32
  }
  func.func @transform_1(%arg0: i32, %arg1: i32, %arg2: i32) -> (i32, i32) {
    %c0_i32 = arith.constant 0 : i32
    return %arg2, %arg1 : i32, i32
  }
  func.func @transform_2(%arg0: i32, %arg1: i32, %arg2: i32) -> (i32, i32) {
    %c0_i32 = arith.constant 0 : i32
    %c0_i32_0 = arith.constant 0 : i32
    return %c0_i32, %arg1 : i32, i32
  }
  func.func @transform_3(%arg0: i32, %arg1: i32, %arg2: i32) -> (i32, i32) {
    %c0_i32 = arith.constant 0 : i32
    return %arg0, %arg1 : i32, i32
  }
}

</mosaic_0001>

<bundles_post_ra>
// kernel: vit_forward.12
= control target key start
LH: loop header
LB: loop body
LE: loop exit
PB: predicated region body
PF: predicated region fallthrough
CT: control target
= control target key end

     0   :  { %s689_s12 = smov 0   ;;  %s691_s13 = smov 0   ;;  %s748_s0 = inlined_call_operand.vmem [shape: f32[128,64], index: 0, kind: input, shape index: {}]   ;;  %s749_s1 = inlined_call_operand.vmem [shape: bf16[64,128], index: 1, kind: input, shape index: {}]   ;;  %s750_s2 = inlined_call_operand.vmem [shape: f32[1,128], index: 2, kind: input, shape index: {}]   ;;  %s751_s3 = inlined_call_operand.vmem [shape: f32[128,128], index: 3, kind: output, shape index: {}]  }
   0x1   :  { %s693_s14 = smov 0  }
   0x2 LB: > { %s32_s15 = sadd.s32 1, %s663_s13  ;;  %p569_p0 = scmp.ge.s32.totalorder %s667_s14, 1  ;;  %s667_s14 = sphi %s693_s14, %s13_s14   ;;  %s663_s13 = sphi %s691_s13, %s753_s13   ;;  %s659_s12 = sphi %s689_s12, %s752_s12  }
   0x3   : > { %p34_p1 = scmp.ge.s32.totalorder %s32_s15, 2  ;;  %p188_p2 = scmp.lt.s32.totalorder %s667_s14, 3 }
   0x5   : > { %s755_s15 = smov (%p34_p1, %s32_s15), 0  ;;  %p189_p3 = pnand %p569_p0, %p188_p2 }
   0x6   : > { %v641_v0 = vld [vmem:[%s749_s1] sm:$0xff] (!%p189_p3)   ;;  %s570_s18 = sshll.u32 (!%p189_p3), %s659_s12, 3  ;;  %v642_v1 = vld [vmem:[%s749_s1 + $0x8] sm:$0xff] (!%p189_p3)   ;;  %v643_v2 = vld [vmem:[%s749_s1 + $0x10] sm:$0xff] (!%p189_p3)   ;;  %vm324_vm0 = vcmask (!%p189_p3), 523264  }
   0x7   : > { %192 = sbr.rel (%p189_p3) target bundleno = 242 (0xf2), region = 32  ;;  %p230_p4 = scmp.lt.s32.totalorder (!%p189_p3), %s570_s18, 15  ;;  %593 = vmatprep.subr.bf16.mxu0 (!%p189_p3), %v641_v0  ;;  %609 = vmatprep.subr.bf16.mxu1 (!%p189_p3), %v641_v0  ;;  %v644_v6 = vld [vmem:[%s749_s1 + $0x18] sm:$0xff] (!%p189_p3)   ;;  %v582_v16 = vld [vmem:[%s750_s2] ss:$0 sm:$0xff] (!%p189_p3) }
   0x8   : > { %594 = vmatpush3.bf16.msra.mxu0 (!%p189_p3), %v641_v0  ;;  %613 = vmatpush3.bf16.msra.mxu1 (!%p189_p3), %v641_v0 }
   0x9   : > { %595 = vmatprep.subr.bf16.mxu0 (!%p189_p3), %v642_v1  ;;  %610 = vmatprep.subr.bf16.mxu1 (!%p189_p3), %v642_v1 }
   0xc   : > { %596 = vmatpush3.bf16.msra.mxu0 (!%p189_p3), %v642_v1  ;;  %614 = vmatpush3.bf16.msra.mxu1 (!%p189_p3), %v642_v1 }
   0xd   : > { %597 = vmatprep.subr.bf16.mxu0 (!%p189_p3), %v643_v2  ;;  %611 = vmatprep.subr.bf16.mxu1 (!%p189_p3), %v643_v2 }
   0xe   : > { %s757_s18 = smov (!%p230_p4, %s570_s18), 15 }
   0xf   : > { %s571_s23 = sshll.u32 %s757_s18, 3 }
  0x10   : > { %s236_s26 = scalar_lea.vmem %s748_s0, %s571_s23  ;;  %598 = vmatpush3.bf16.msra.mxu0 %v643_v2  ;;  %615 = vmatpush3.bf16.msra.mxu1 %v643_v2  ;;  %s257_s6 = scalar_lea.vmem %s751_s3, %s571_s23 }
  0x11   : > { %v272_v3 = vld [vmem:[%s236_s26] sm:$0xff]  ;;  %v273_v4 = vld [vmem:[%s236_s26 + $0x8] sm:$0xff]  ;;  %v274_v10 = vld [vmem:[%s236_s26 + $0x10] sm:$0xff]  ;;  %599 = vmatprep.subr.bf16.mxu0 %v644_v6  ;;  %612 = vmatprep.subr.bf16.mxu1 %v644_v6 }
  0x12   : > { %v276_v5 = vld [vmem:[%s236_s26 + $0x20] sm:$0xff]  ;;  %v288_v7 = vpack.c.bf16 %v273_v4, %v272_v3  ;;  %v277_v8 = vld [vmem:[%s236_s26 + $0x28] sm:$0xff]  ;;  %v275_v11 = vld [vmem:[%s236_s26 + $0x18] sm:$0xff] }
  0x13   : > { %v290_v9 = vpack.c.bf16 %v277_v8, %v276_v5  ;;  %v278_v12 = vld [vmem:[%s236_s26 + $0x30] sm:$0xff]  ;;  %v279_v13 = vld [vmem:[%s236_s26 + $0x38] sm:$0xff]  ;;  %v289_v14 = vpack.c.bf16 %v275_v11, %v274_v10 }
  0x14   : > { %601 = vmatprep.mubr.msk.bf16.mxu0 %vm324_vm0, %v288_v7  ;;  %v291_v15 = vpack.c.bf16 %v279_v13, %v278_v12  ;;  %600 = vmatpush3.bf16.msra.mxu0 %v644_v6 }
  0x15   : > { %605 = vmatprep.mubr.msk.bf16.mxu1 %vm324_vm0, %v290_v9  ;;  %616 = vmatpush3.bf16.msra.mxu1 %v644_v6 }
  0x17   : > { %602 = vmatmul.mubr.msk.bf16.vlgmr.msra.gmra.mrb[0].mxu0 %vm324_vm0, %v289_v14 }
  0x18   : > { %606 = vmatmul.mubr.msk.bf16.vlgmr.msra.gmra.mrb[0].mxu1 %vm324_vm0, %v291_v15 }
  0xea   : > { %v603_v17 = vpop.f32.mrb[0].mxu0 }
  0xeb   : > { %v607_v18 = vpop.f32.mrb[0].mxu1  ;;  %v438_v19 = vadd.f32 %v603_v17, %v582_v16  ;;  %v371_v21 = vpop.f32.mrb[1].mxu0 }
  0xec   : > { %v442_v20 = vadd.f32 %v607_v18, %v582_v16  ;;  %v387_v22 = vpop.f32.mrb[1].mxu1  ;;  %v436_v23 = vadd.f32 %v582_v16, %v371_v21  ;;  %v604_v25 = vpop.f32.mrb[2].mxu0 }
  0xed   : > { %v440_v24 = vadd.f32 %v582_v16, %v387_v22  ;;  %v608_v26 = vpop.f32.mrb[2].mxu1  ;;  %446 = vst [vmem:[%s257_s6 + $0x10] sm:$0xff] %v438_v19  ;;  %v439_v27 = vadd.f32 %v604_v25, %v582_v16  ;;  %v374_v29 = vpop.f32.mrb[3].mxu0 }
  0xee   : > { %450 = vst [vmem:[%s257_s6 + $0x30] sm:$0xff] %v442_v20  ;;  %v443_v28 = vadd.f32 %v608_v26, %v582_v16  ;;  %v390_v30 = vpop.f32.mrb[3].mxu1  ;;  %444 = vst [vmem:[%s257_s6] sm:$0xff] %v436_v23  ;;  %v437_v31 = vadd.f32 %v582_v16, %v374_v29 }
  0xef   : > { %448 = vst [vmem:[%s257_s6 + $0x20] sm:$0xff] %v440_v24  ;;  %v441_v32 = vadd.f32 %v582_v16, %v390_v30  ;;  %447 = vst [vmem:[%s257_s6 + $0x18] sm:$0xff] %v439_v27 }
  0xf0   : > { %451 = vst [vmem:[%s257_s6 + $0x38] sm:$0xff] %v443_v28  ;;  %445 = vst [vmem:[%s257_s6 + $0x8] sm:$0xff] %v437_v31 }
  0xf1   : > { %449 = vst [vmem:[%s257_s6 + $0x28] sm:$0xff] %v441_v32 }
  0xf2 PF: > { %s13_s14 = sadd.s32 1, %s667_s14   ;;  %s752_s12 = smov %s663_s13 }
  0xf3   : > { %p10_p5 = scmp.ge.s32.totalorder %s13_s14, 4   ;;  %s753_s13 = smov %s755_s15 }
  0xf5   :  { %12 = sbr.rel (!%p10_p5) target bundleno = 2 (0x2), region = 76 }

// kernel: vit_forward.13
= control target key start
LH: loop header
LB: loop body
LE: loop exit
PB: predicated region body
PF: predicated region fallthrough
CT: control target
= control target key end

     0   :  { %s1438_s18 = smov 0   ;;  %s1440_s19 = smov 0   ;;  %s1638_s0 = inlined_call_operand.vmem [shape: f32[128,128], index: 0, kind: input, shape index: {}]   ;;  %s1639_s1 = inlined_call_operand.vmem [shape: bf16[128,384], index: 1, kind: input, shape index: {}]   ;;  %s1640_s2 = inlined_call_operand.vmem [shape: f32[1,384], index: 2, kind: input, shape index: {}]   ;;  %s1641_s3 = inlined_call_operand.vmem [shape: f32[1,128], index: 3, kind: input, shape index: {}]   ;;  %s1642_s4 = inlined_call_operand.vmem [shape: f32[1,128], index: 4, kind: input, shape index: {}]   ;;  %s1643_s5 = inlined_call_operand.vmem [shape: bf16[128,384], index: 5, kind: output, shape index: {}]  }
   0x1   :  { %s1442_s20 = smov 0  }
   0x2 LB: > { %s34_s21 = sadd.s32 1, %s1401_s19  ;;  %p1208_p0 = scmp.ge.s32.totalorder %s1405_s20, 1  ;;  %s1405_s20 = sphi %s1442_s20, %s15_s20   ;;  %s1401_s19 = sphi %s1440_s19, %s1645_s19   ;;  %s1397_s18 = sphi %s1438_s18, %s1644_s18  }
   0x3   : > { %p36_p1 = scmp.ge.s32.totalorder %s34_s21, 2  ;;  %p259_p2 = scmp.lt.s32.totalorder %s1405_s20, 3 }
   0x5   : > { %s1647_s21 = smov (%p36_p1, %s34_s21), 0  ;;  %p260_p3 = pnand %p1208_p0, %p259_p2 }
   0x6   : > { %s1209_s22 = sshll.u32 (!%p260_p3), %s1397_s18, 3  ;;  %v1335_v8 = vld [vmem:[%s1639_s1 + $0x4] ss:$12 sps:$4 sm:$0xff] (!%p260_p3)   ;;  %v1337_v9 = vld [vmem:[%s1639_s1] ss:$12 sps:$4 sm:$0xff] (!%p260_p3)   ;;  %v1407_v63 = vmov (!%p260_p3), 0  }
   0x7   : > { %263 = sbr.rel (%p260_p3) target bundleno = 579 (0x243), region = 40  ;;  %p316_p4 = scmp.lt.s32.totalorder (!%p260_p3), %s1209_s22, 15  ;;  %v1338_v10 = vld [vmem:[%s1639_s1 + $0x1c] ss:$12 sps:$4 sm:$0xff] (!%p260_p3)   ;;  %703 = vmatprep.subr.bf16.mxu0 (!%p260_p3), %v1335_v8  ;;  %v1341_v44 = vld [vmem:[%s1639_s1 + $0x18] ss:$12 sps:$4 sm:$0xff] (!%p260_p3)   ;;  %735 = vmatprep.mubr.bf16.mxu0 (!%p260_p3), %v1407_v63 }
   0x8   : > { %v1340_v11 = vld [vmem:[%s1639_s1 + $0x8] ss:$12 sps:$4 sm:$0xff] (!%p260_p3)   ;;  %704 = vmatpush1.bf16.msra.mxu0 (!%p260_p3), %v1337_v9  ;;  %v1344_v46 = vld [vmem:[%s1639_s1 + $0x20] ss:$12 sps:$4 sm:$0xff] (!%p260_p3)   ;;  %v1345_v47 = vld [vmem:[%s1639_s1 + $0x30] ss:$12 sps:$4 sm:$0xff] (!%p260_p3)  }
   0x9   : > { %1285 = vmatprep.subr.bf16.mxu1 (!%p260_p3), %v1340_v11  ;;  %705 = vmatprep.subr.bf16.mxu0 (!%p260_p3), %v1338_v10  ;;  %v1342_v45 = vld [vmem:[%s1639_s1 + $0x34] ss:$12 sps:$4 sm:$0xff] (!%p260_p3)   ;;  %v1346_v48 = vld [vmem:[%s1639_s1 + $0x4c] ss:$12 sps:$4 sm:$0xff] (!%p260_p3)   ;;  %v1350_v51 = vld [vmem:[%s1639_s1 + $0x64] ss:$12 sps:$4 sm:$0xff] (!%p260_p3)  }
   0xa   : > { %1286 = vmatpush3.bf16.msra.mxu1 (!%p260_p3), %v1340_v11  ;;  %v1348_v49 = vld [vmem:[%s1639_s1 + $0x38] ss:$12 sps:$4 sm:$0xff] (!%p260_p3)   ;;  %v1349_v50 = vld [vmem:[%s1639_s1 + $0x48] ss:$12 sps:$4 sm:$0xff] (!%p260_p3)   ;;  %v1352_v52 = vld [vmem:[%s1639_s1 + $0x50] ss:$12 sps:$4 sm:$0xff] (!%p260_p3)  }
   0xb   : > { %1287 = vmatprep.subr.bf16.mxu1 (!%p260_p3), %v1344_v46  ;;  %v1353_v53 = vld [vmem:[%s1639_s1 + $0x60] ss:$12 sps:$4 sm:$0xff] (!%p260_p3)   ;;  %v1354_v54 = vld [vmem:[%s1639_s1 + $0x7c] ss:$12 sps:$4 sm:$0xff] (!%p260_p3)   ;;  %v1357_v56 = vld [vmem:[%s1639_s1 + $0x78] ss:$12 sps:$4 sm:$0xff] (!%p260_p3)  }
   0xc   : > { %706 = vmatpush1.bf16.msra.mxu0 (!%p260_p3), %v1341_v44  ;;  %v1356_v55 = vld [vmem:[%s1639_s1 + $0x68] ss:$12 sps:$4 sm:$0xff] (!%p260_p3)   ;;  %v1360_v58 = vld [vmem:[%s1639_s1 + $0x80] ss:$12 sps:$4 sm:$0xff] (!%p260_p3)   ;;  %v1361_v59 = vld [vmem:[%s1639_s1 + $0x90] ss:$12 sps:$4 sm:$0xff] (!%p260_p3)  }
   0xd   : > { %707 = vmatprep.subr.bf16.mxu0 (!%p260_p3), %v1342_v45  ;;  %v1358_v57 = vld [vmem:[%s1639_s1 + $0x94] ss:$12 sps:$4 sm:$0xff] (!%p260_p3)   ;;  %v1362_v60 = vld [vmem:[%s1639_s1 + $0xac] ss:$12 sps:$4 sm:$0xff] (!%p260_p3)  }
   0xe   : > { %s1649_s22 = smov (!%p316_p4, %s1209_s22), 15  ;;  %1288 = vmatpush3.bf16.msra.mxu1 %v1344_v46  ;;  %v1364_v61 = vld [vmem:[%s1639_s1 + $0x98] ss:$12 sps:$4 sm:$0xff]   ;;  %v1365_v62 = vld [vmem:[%s1639_s1 + $0xa8] ss:$12 sps:$4 sm:$0xff]  }
   0xf   : > { %s1210_s23 = sshll.u32 %s1649_s22, 3  ;;  %1289 = vmatprep.subr.bf16.mxu1 %v1348_v49  ;;  %s1309_s14 = smul.u32 12, %s1649_s22 }
  0x10   : > { %s322_s26 = scalar_lea.vmem %s1638_s0, %s1210_s23  ;;  %708 = vmatpush1.bf16.msra.mxu0 %v1345_v47 }
  0x11   : > { %v388_v0 = vld [vmem:[%s322_s26] sm:$0xff]  ;;  %v390_v1 = vld [vmem:[%s322_s26 + $0x10] sm:$0xff]  ;;  %v389_v2 = vld [vmem:[%s322_s26 + $0x8] sm:$0xff]  ;;  %709 = vmatprep.subr.bf16.mxu0 %v1346_v48  ;;  %s1597_s17 = scalar_lea.vmem %s1643_s5, %s1309_s14 }
  0x12   : > { %396 = vadd.xlane.f32.xlu0 %v388_v0  ;;  %400 = vadd.xlane.f32.xlu1 %v390_v1  ;;  %v391_v3 = vld [vmem:[%s322_s26 + $0x18] sm:$0xff]  ;;  %v392_v4 = vld [vmem:[%s322_s26 + $0x20] sm:$0xff]  ;;  %v393_v5 = vld [vmem:[%s322_s26 + $0x28] sm:$0xff] }
  0x13   : > { %v394_v6 = vld [vmem:[%s322_s26 + $0x30] sm:$0xff]  ;;  %v395_v7 = vld [vmem:[%s322_s26 + $0x38] sm:$0xff]  ;;  %1290 = vmatpush3.bf16.msra.mxu1 %v1348_v49 }
  0x14   : > { %710 = vmatpush1.bf16.msra.mxu0 %v1349_v50  ;;  %1291 = vmatprep.subr.bf16.mxu1 %v1352_v52 }
  0x15   : > { %711 = vmatprep.subr.bf16.mxu0 %v1350_v51 }
  0x16   : > { %398 = vadd.xlane.f32.xlu0 %v389_v2  ;;  %402 = vadd.xlane.f32.xlu1 %v391_v3 }
  0x17   : > { %1292 = vmatpush3.bf16.msra.mxu1 %v1352_v52 }
  0x18   : > { %712 = vmatpush1.bf16.msra.mxu0 %v1353_v53  ;;  %1293 = vmatprep.subr.bf16.mxu1 %v1356_v55 }
  0x19   : > { %713 = vmatprep.subr.bf16.mxu0 %v1354_v54 }
  0x1a   : > { %404 = vadd.xlane.f32.xlu0 %v392_v4  ;;  %406 = vadd.xlane.f32.xlu1 %v393_v5 }
  0x1b   : > { %1294 = vmatpush3.bf16.msra.mxu1 %v1356_v55 }
  0x1c   : > { %714 = vmatpush1.bf16.msra.mxu0 %v1357_v56  ;;  %1295 = vmatprep.subr.bf16.mxu1 %v1360_v58 }
  0x1d   : > { %715 = vmatprep.subr.bf16.mxu0 %v1358_v57 }
  0x1e   : > { %408 = vadd.xlane.f32.xlu0 %v394_v6  ;;  %410 = vadd.xlane.f32.xlu1 %v395_v7 }
  0x1f   : > { %1296 = vmatpush3.bf16.msra.mxu1 %v1360_v58 }
  0x20   : > { %716 = vmatpush1.bf16.msra.mxu0 %v1361_v59  ;;  %1297 = vmatprep.subr.bf16.mxu1 %v1364_v61 }
  0x21   : > { %717 = vmatprep.subr.bf16.mxu0 %v1362_v60 }
  0x23   : > { %1298 = vmatpush3.bf16.msra.mxu1 %v1364_v61 }
  0x24   : > { %718 = vmatpush1.bf16.msra.mxu0 %v1365_v62 }
  0x9f   : > { %v397_v12 = vpop.xlane.xlu0 %396  ;;  %v401_v13 = vpop.xlane.xlu1 %400 }
  0xa0   : > { %v413_v14 = vmul.f32 0.0078125, %v397_v12  ;;  %v415_v15 = vmul.f32 0.0078125, %v401_v13 }
  0xa2   : > { %v1474_v16 = vsub.f32 %v388_v0, %v413_v14  ;;  %v1476_v17 = vsub.f32 %v390_v1, %v415_v15  ;;  %v1366_v0 = vld [vmem:[%s1639_s1 + $0xb0] ss:$12 sps:$4 sm:$0xff]  }
  0xa3   : > { %v399_v18 = vpop.xlane.xlu0 %398  ;;  %v403_v19 = vpop.xlane.xlu1 %402  ;;  %1299 = vmatprep.subr.bf16.mxu1 %v1366_v0 }
  0xa4   : > { %v414_v20 = vmul.f32 0.0078125, %v399_v18  ;;  %v429_v21 = vmul.f32 %v1474_v16, %v1474_v16  ;;  %v416_v22 = vmul.f32 0.0078125, %v403_v19  ;;  %v431_v25 = vmul.f32 %v1476_v17, %v1476_v17  ;;  %1300 = vmatpush3.bf16.msra.mxu1 %v1366_v0 }
  0xa6   : > { %v1480_v23 = vsub.f32 %v389_v2, %v414_v20  ;;  %437 = vadd.xlane.f32.xlu0 %v429_v21  ;;  %v1482_v24 = vsub.f32 %v391_v3, %v416_v22 }
  0xa7   : > { %v405_v26 = vpop.xlane.xlu0 %404  ;;  %v407_v27 = vpop.xlane.xlu1 %406 }
  0xa8   : > { %v417_v28 = vmul.f32 0.0078125, %v405_v26  ;;  %v430_v29 = vmul.f32 %v1480_v23, %v1480_v23  ;;  %v418_v30 = vmul.f32 0.0078125, %v407_v27  ;;  %v432_v33 = vmul.f32 %v1482_v24, %v1482_v24 }
  0xaa   : > { %v1488_v31 = vsub.f32 %v392_v4, %v417_v28  ;;  %441 = vadd.xlane.f32.xlu0 %v431_v25  ;;  %439 = vadd.xlane.f32.xlu1 %v430_v29  ;;  %v1490_v32 = vsub.f32 %v393_v5, %v418_v30  ;;  %v1213_v30 = vld [vmem:[%s1641_s3] ss:$0 sm:$0xff] }
  0xab   : > { %v409_v34 = vpop.xlane.xlu0 %408  ;;  %v411_v35 = vpop.xlane.xlu1 %410 }
  0xac   : > { %v419_v36 = vmul.f32 0.0078125, %v409_v34  ;;  %v433_v37 = vmul.f32 %v1488_v31, %v1488_v31  ;;  %v420_v38 = vmul.f32 0.0078125, %v411_v35  ;;  %v434_v41 = vmul.f32 %v1490_v32, %v1490_v32 }
  0xae   : > { %v1496_v39 = vsub.f32 %v394_v6, %v419_v36  ;;  %443 = vadd.xlane.f32.xlu1 %v432_v33  ;;  %445 = vadd.xlane.f32.xlu0 %v433_v37  ;;  %v1498_v40 = vsub.f32 %v395_v7, %v420_v38  ;;  %v1214_v38 = vld [vmem:[%s1642_s4] ss:$0 sm:$0xff] }
  0xb0   : > { %v435_v42 = vmul.f32 %v1496_v39, %v1496_v39  ;;  %v436_v43 = vmul.f32 %v1498_v40, %v1498_v40 }
  0xb2   : > { %447 = vadd.xlane.f32.xlu1 %v434_v41  ;;  %449 = vadd.xlane.f32.xlu0 %v435_v42 }
  0xb6   : > { %451 = vadd.xlane.f32.xlu1 %v436_v43 }
 0x133   : > { %v438_v1 = vpop.xlane.xlu0 %437 }
 0x134   : > { %v453_v2 = vmul.f32 0.0078125, %v438_v1 }
 0x136   : > { %v461_v3 = vadd.f32 1e-05, %v453_v2 }
 0x137   : > { %v440_v4 = vpop.xlane.xlu1 %439  ;;  %v442_v5 = vpop.xlane.xlu0 %441 }
 0x138   : > { %1367 = vrsqrt.f32 %v461_v3  ;;  %v454_v6 = vmul.f32 0.0078125, %v440_v4  ;;  %v455_v7 = vmul.f32 0.0078125, %v442_v5 }
 0x13a   : > { %v462_v8 = vadd.f32 1e-05, %v454_v6  ;;  %v463_v9 = vadd.f32 1e-05, %v455_v7 }
 0x13b   : > { %v444_v10 = vpop.xlane.xlu1 %443  ;;  %v446_v11 = vpop.xlane.xlu0 %445 }
 0x13c   : > { %1369 = vrsqrt.f32 %v462_v8  ;;  %v456_v12 = vmul.f32 0.0078125, %v444_v10  ;;  %v457_v13 = vmul.f32 0.0078125, %v446_v11 }
 0x13d   : > { %1371 = vrsqrt.f32 %v463_v9 }
 0x13e   : > { %v464_v14 = vadd.f32 1e-05, %v456_v12  ;;  %v465_v15 = vadd.f32 1e-05, %v457_v13 }
 0x13f   : > { %v448_v18 = vpop.xlane.xlu1 %447  ;;  %v450_v19 = vpop.xlane.xlu0 %449 }
 0x140   : > { %1373 = vrsqrt.f32 %v464_v14  ;;  %v458_v20 = vmul.f32 0.0078125, %v448_v18  ;;  %v459_v21 = vmul.f32 0.0078125, %v450_v19 }
 0x141   : > { %1375 = vrsqrt.f32 %v465_v15 }
 0x142   : > { %v1368_v22 = vpop.eup %1367  ;;  %v466_v25 = vadd.f32 1e-05, %v458_v20  ;;  %v467_v26 = vadd.f32 1e-05, %v459_v21 }
 0x143   : > { %v452_v27 = vpop.xlane.xlu1 %451  ;;  %v477_v28 = vmul.f32 %v1368_v22, %v1474_v16 }
 0x144   : > { %1377 = vrsqrt.f32 %v466_v25  ;;  %v460_v29 = vmul.f32 0.0078125, %v452_v27 }
 0x145   : > { %1379 = vrsqrt.f32 %v467_v26  ;;  %v492_v37 = vmul.f32 %v1213_v30, %v477_v28 }
 0x146   : > { %v1370_v33 = vpop.eup %1369  ;;  %v468_v34 = vadd.f32 1e-05, %v460_v29 }
 0x147   : > { %v1372_v35 = vpop.eup %1371  ;;  %v478_v36 = vmul.f32 %v1370_v33, %v1480_v23  ;;  %v507_v45 = vadd.f32 %v1214_v38, %v492_v37 }
 0x148   : > { %1381 = vrsqrt.f32 %v468_v34  ;;  %v479_v16 = vmul.f32 %v1372_v35, %v1476_v17 }
 0x149   : > { %v493_v41 = vmul.f32 %v1213_v30, %v478_v36 }
 0x14a   : > { %v1374_v42 = vpop.eup %1373  ;;  %v494_v43 = vmul.f32 %v1213_v30, %v479_v16 }
 0x14b   : > { %v1376_v44 = vpop.eup %1375  ;;  %v508_v46 = vadd.f32 %v1214_v38, %v493_v41  ;;  %v480_v47 = vmul.f32 %v1374_v42, %v1482_v24 }
 0x14c   : > { %v481_v48 = vmul.f32 %v1376_v44, %v1488_v31  ;;  %v509_v51 = vadd.f32 %v1214_v38, %v494_v43 }
 0x14d   : > { %v539_v49 = vpack.c.bf16 %v508_v46, %v507_v45  ;;  %v495_v23 = vmul.f32 %v1213_v30, %v480_v47 }
 0x14e   : > { %v1378_v50 = vpop.eup %1377  ;;  %v496_v54 = vmul.f32 %v1213_v30, %v481_v48 }
 0x14f   : > { %v1380_v52 = vpop.eup %1379  ;;  %736 = vmatmul.mubr.bf16.vlgmr.msra.gmra.mrb[0].mxu0 %v539_v49  ;;  %1301 = vmatprep.mubr.bf16.mxu1 %v539_v49  ;;  %v510_v53 = vadd.f32 %v1214_v38, %v495_v23  ;;  %v482_v17 = vmul.f32 %v1378_v50, %v1490_v32 }
 0x150   : > { %745 = vmatprep.mubr.bf16.mxu0 %v1407_v63  ;;  %v483_v55 = vmul.f32 %v1380_v52, %v1496_v39  ;;  %v511_v31 = vadd.f32 %v1214_v38, %v496_v54  ;;  %v918_v39 = vlaneseq }
 0x151   : > { %v540_v56 = vpack.c.bf16 %v510_v53, %v509_v51  ;;  %v497_v57 = vmul.f32 %v1213_v30, %v482_v17 }
 0x152   : > { %v1382_v24 = vpop.eup %1381  ;;  %v498_v60 = vmul.f32 %v1213_v30, %v483_v55  ;;  %v919_v2 = vshrl.u32 %v918_v39, 7 }
 0x153   : > { %1302 = vmatmul.mubr.bf16.vlgmr.msra.gmra.mrb[0].mxu1 %v540_v56  ;;  %v512_v58 = vadd.f32 %v1214_v38, %v497_v57  ;;  %v484_v59 = vmul.f32 %v1382_v24, %v1498_v40  ;;  %v916_v40 = vld [vmem:[%s1640_s2] sm:$0x7] }
 0x154   : > { %v513_v0 = vadd.f32 %v1214_v38, %v498_v60  ;;  %v920_v3 = vsub.s32 0, %v919_v2  ;;  %v924_v4 = vsub.s32 1, %v919_v2  ;;  %v928_v6 = vsub.s32 2, %v919_v2 }
 0x155   : > { %v541_v61 = vpack.c.bf16 %v512_v58, %v511_v31  ;;  %v499_v62 = vmul.f32 %v1213_v30, %v484_v59 }
 0x156   : > { %v1587_v5 = vrot.slane %v916_v40, %v920_v3  ;;  %v1589_v7 = vrot.slane %v916_v40, %v924_v4 }
 0x157   : > { %746 = vmatmul.mubr.bf16.gmra.mrb[4].mxu0 %v540_v56  ;;  %1305 = vmatprep.mubr.bf16.mxu1 %v541_v61  ;;  %v514_v32 = vadd.f32 %v1214_v38, %v499_v62 }
 0x158   : > { %755 = vmatprep.mubr.bf16.mxu0 %v1407_v63 }
 0x159   : > { %v542_v1 = vpack.c.bf16 %v514_v32, %v513_v0 }
 0x15b   : > { %1306 = vmatmul.mubr.bf16.gmra.mrb[4].mxu1 %v542_v1 }
 0x15f   : > { %756 = vmatmul.mubr.bf16.gmra.mrb[8].mxu0 %v541_v61 }
 0x160   : > { %765 = vmatprep.mubr.bf16.mxu0 %v1407_v63  ;;  %v929_v63 = vrot.slane %v916_v40, %v928_v6 }
 0x167   : > { %766 = vmatmul.mubr.bf16.gmra.mrb[12].mxu0 %v542_v1 }
 0x222   : > { %v737_v8 = vpop.f32.mrb[0].mxu0 }
 0x223   : > { %v933_v9 = vadd.f32 %v1587_v5, %v737_v8  ;;  %v739_v10 = vpop.f32.mrb[1].mxu0 }
 0x224   : > { %v934_v11 = vadd.f32 %v1589_v7, %v739_v10  ;;  %v741_v12 = vpop.f32.mrb[2].mxu0 }
 0x225   : > { %v936_v13 = vadd.f32 %v1587_v5, %v741_v12  ;;  %v743_v14 = vpop.f32.mrb[3].mxu0 }
 0x226   : > { %v1257_v15 = vpack.c.bf16 %v934_v11, %v933_v9  ;;  %v937_v18 = vadd.f32 %v1589_v7, %v743_v14  ;;  %v1303_v19 = vpop.f32.mrb[0].mxu1 }
 0x227   : > { %v941_v20 = vadd.f32 %v1303_v19, %v929_v63  ;;  %v810_v21 = vpop.f32.mrb[1].mxu1 }
 0x228   : > { %1037 = vst [vmem:[%s1597_s17] sm:$0xff] %v1257_v15  ;;  %v1259_v22 = vpack.c.bf16 %v937_v18, %v936_v13  ;;  %v935_v25 = vadd.f32 %v929_v63, %v810_v21  ;;  %v1304_v26 = vpop.f32.mrb[2].mxu1 }
 0x229   : > { %v1262_v27 = vpack.c.bf16 %v941_v20, %v941_v20  ;;  %v944_v28 = vadd.f32 %v1304_v26, %v929_v63  ;;  %v813_v29 = vpop.f32.mrb[3].mxu1 }
 0x22a   : > { %1039 = vst [vmem:[%s1597_s17 + $0xc] sm:$0xff] %v1259_v22  ;;  %v1258_v30 = vpack.c.bf16 %v935_v25, %v935_v25  ;;  %v938_v33 = vadd.f32 %v929_v63, %v813_v29  ;;  %v747_v34 = vpop.f32.mrb[4].mxu0 }
 0x22b   : > { %1042 = vst [vmem:[%s1597_s17 + $0x20] sm:$0xf] %v1262_v27  ;;  %v1264_v35 = vpack.c.bf16 %v944_v28, %v944_v28  ;;  %v939_v36 = vadd.f32 %v1587_v5, %v747_v34  ;;  %v749_v37 = vpop.f32.mrb[5].mxu0 }
 0x22c   : > { %1038 = vst [vmem:[%s1597_s17 + $0x8] sm:$0xf] %v1258_v30  ;;  %v1260_v38 = vpack.c.bf16 %v938_v33, %v938_v33  ;;  %v940_v16 = vadd.f32 %v1589_v7, %v749_v37  ;;  %v751_v41 = vpop.f32.mrb[6].mxu0 }
 0x22d   : > { %1044 = vst [vmem:[%s1597_s17 + $0x2c] sm:$0xf] %v1264_v35  ;;  %v942_v42 = vadd.f32 %v1587_v5, %v751_v41  ;;  %v753_v43 = vpop.f32.mrb[7].mxu0 }
 0x22e   : > { %1040 = vst [vmem:[%s1597_s17 + $0x14] sm:$0xf] %v1260_v38  ;;  %v1261_v44 = vpack.c.bf16 %v940_v16, %v939_v36  ;;  %v943_v45 = vadd.f32 %v1589_v7, %v753_v43  ;;  %v1307_v46 = vpop.f32.mrb[4].mxu1 }
 0x22f   : > { %v953_v47 = vadd.f32 %v1307_v46, %v929_v63  ;;  %v826_v48 = vpop.f32.mrb[5].mxu1 }
 0x230   : > { %1041 = vst [vmem:[%s1597_s17 + $0x18] sm:$0xff] %v1261_v44  ;;  %v1263_v49 = vpack.c.bf16 %v943_v45, %v942_v42  ;;  %v947_v23 = vadd.f32 %v929_v63, %v826_v48  ;;  %v1308_v50 = vpop.f32.mrb[6].mxu1 }
 0x231   : > { %v1270_v51 = vpack.c.bf16 %v953_v47, %v953_v47  ;;  %v956_v52 = vadd.f32 %v1308_v50, %v929_v63  ;;  %v829_v53 = vpop.f32.mrb[7].mxu1 }
 0x232   : > { %1043 = vst [vmem:[%s1597_s17 + $0x24] sm:$0xff] %v1263_v49  ;;  %v1266_v17 = vpack.c.bf16 %v947_v23, %v947_v23  ;;  %v950_v54 = vadd.f32 %v929_v63, %v829_v53  ;;  %v757_v55 = vpop.f32.mrb[8].mxu0 }
 0x233   : > { %1050 = vst [vmem:[%s1597_s17 + $0x50] sm:$0xf] %v1270_v51  ;;  %v1272_v56 = vpack.c.bf16 %v956_v52, %v956_v52  ;;  %v945_v57 = vadd.f32 %v1587_v5, %v757_v55  ;;  %v759_v24 = vpop.f32.mrb[9].mxu0 }
 0x234   : > { %1046 = vst [vmem:[%s1597_s17 + $0x38] sm:$0xf] %v1266_v17  ;;  %v1268_v31 = vpack.c.bf16 %v950_v54, %v950_v54  ;;  %v946_v58 = vadd.f32 %v1589_v7, %v759_v24  ;;  %v761_v59 = vpop.f32.mrb[10].mxu0 }
 0x235   : > { %1052 = vst [vmem:[%s1597_s17 + $0x5c] sm:$0xf] %v1272_v56  ;;  %v948_v60 = vadd.f32 %v1587_v5, %v761_v59  ;;  %v763_v61 = vpop.f32.mrb[11].mxu0 }
 0x236   : > { %1048 = vst [vmem:[%s1597_s17 + $0x44] sm:$0xf] %v1268_v31  ;;  %v1265_v62 = vpack.c.bf16 %v946_v58, %v945_v57  ;;  %v949_v0 = vadd.f32 %v1589_v7, %v763_v61 }
 0x238   : > { %1045 = vst [vmem:[%s1597_s17 + $0x30] sm:$0xff] %v1265_v62  ;;  %v1267_v32 = vpack.c.bf16 %v949_v0, %v948_v60 }
 0x23a   : > { %1047 = vst [vmem:[%s1597_s17 + $0x3c] sm:$0xff] %v1267_v32  ;;  %v767_v1 = vpop.f32.mrb[12].mxu0 }
 0x23b   : > { %v951_v39 = vadd.f32 %v1587_v5, %v767_v1  ;;  %v769_v2 = vpop.f32.mrb[13].mxu0 }
 0x23c   : > { %v952_v3 = vadd.f32 %v1589_v7, %v769_v2  ;;  %v771_v40 = vpop.f32.mrb[14].mxu0 }
 0x23d   : > { %v954_v4 = vadd.f32 %v1587_v5, %v771_v40  ;;  %v773_v6 = vpop.f32.mrb[15].mxu0 }
 0x23e   : > { %v1269_v8 = vpack.c.bf16 %v952_v3, %v951_v39  ;;  %v955_v9 = vadd.f32 %v1589_v7, %v773_v6 }
 0x240   : > { %1049 = vst [vmem:[%s1597_s17 + $0x48] sm:$0xff] %v1269_v8  ;;  %v1271_v10 = vpack.c.bf16 %v955_v9, %v954_v4 }
 0x242   : > { %1051 = vst [vmem:[%s1597_s17 + $0x54] sm:$0xff] %v1271_v10 }
 0x243 PF: > { %s15_s20 = sadd.s32 1, %s1405_s20   ;;  %s1644_s18 = smov %s1401_s19 }
 0x244   : > { %p12_p5 = scmp.ge.s32.totalorder %s15_s20, 4   ;;  %s1645_s19 = smov %s1647_s21 }
 0x246   :  { %14 = sbr.rel (!%p12_p5) target bundleno = 2 (0x2), region = 90 }

// kernel: vit_forward.15
= control target key start
LH: loop header
LB: loop body
LE: loop exit
PB: predicated region body
PF: predicated region fallthrough
CT: control target
= control target key end

     0   :  { %s858_s15 = smov 0   ;;  %s860_s16 = smov 0   ;;  %s931_s0 = inlined_call_operand.vmem [shape: bf16[128,128], index: 0, kind: input, shape index: {}]   ;;  %s932_s1 = inlined_call_operand.vmem [shape: bf16[128,128], index: 1, kind: input, shape index: {}]   ;;  %s933_s2 = inlined_call_operand.vmem [shape: f32[1,128], index: 2, kind: input, shape index: {}]   ;;  %s934_s3 = inlined_call_operand.vmem [shape: f32[128,128], index: 3, kind: input, shape index: {}]   ;;  %s935_s4 = inlined_call_operand.vmem [shape: f32[128,128], index: 4, kind: output, shape index: {}]  }
   0x1   :  { %s862_s17 = smov 0  }
   0x2 LB: > { %s33_s18 = sadd.s32 1, %s827_s16  ;;  %p699_p0 = scmp.ge.s32.totalorder %s831_s17, 1  ;;  %s831_s17 = sphi %s862_s17, %s14_s17   ;;  %s827_s16 = sphi %s860_s16, %s937_s16   ;;  %s823_s15 = sphi %s858_s15, %s936_s15  }
   0x3   : > { %p35_p1 = scmp.ge.s32.totalorder %s33_s18, 2  ;;  %p229_p2 = scmp.lt.s32.totalorder %s831_s17, 3 }
   0x5   : > { %s939_s18 = smov (%p35_p1, %s33_s18), 0  ;;  %p230_p3 = pnand %p699_p0, %p229_p2 }
   0x6   : > { %v797_v0 = vld [vmem:[%s932_s1] sm:$0xff] (!%p230_p3)   ;;  %s700_s21 = sshll.u32 (!%p230_p3), %s823_s15, 3  ;;  %v798_v1 = vld [vmem:[%s932_s1 + $0x8] sm:$0xff] (!%p230_p3)   ;;  %v799_v2 = vld [vmem:[%s932_s1 + $0x10] sm:$0xff] (!%p230_p3)  }
   0x7   : > { %233 = sbr.rel (%p230_p3) target bundleno = 259 (0x103), region = 36  ;;  %p281_p4 = scmp.lt.s32.totalorder (!%p230_p3), %s700_s21, 15  ;;  %733 = vmatprep.subr.bf16.mxu0 (!%p230_p3), %v797_v0  ;;  %757 = vmatprep.subr.bf16.mxu1 (!%p230_p3), %v797_v0  ;;  %v800_v3 = vld [vmem:[%s932_s1 + $0x18] sm:$0xff] (!%p230_p3)   ;;  %v801_v6 = vld [vmem:[%s932_s1 + $0x20] sm:$0xff] (!%p230_p3)   ;;  %v802_v7 = vld [vmem:[%s932_s1 + $0x28] sm:$0xff] (!%p230_p3)  }
   0x8   : > { %734 = vmatpush3.bf16.msra.mxu0 (!%p230_p3), %v797_v0  ;;  %765 = vmatpush3.bf16.msra.mxu1 (!%p230_p3), %v797_v0  ;;  %v803_v8 = vld [vmem:[%s932_s1 + $0x30] sm:$0xff] (!%p230_p3)   ;;  %v804_v9 = vld [vmem:[%s932_s1 + $0x38] sm:$0xff] (!%p230_p3)   ;;  %v718_v12 = vld [vmem:[%s933_s2] ss:$0 sm:$0xff] (!%p230_p3) }
   0x9   : > { %735 = vmatprep.subr.bf16.mxu0 (!%p230_p3), %v798_v1  ;;  %758 = vmatprep.subr.bf16.mxu1 (!%p230_p3), %v798_v1 }
   0xc   : > { %736 = vmatpush3.bf16.msra.mxu0 (!%p230_p3), %v798_v1  ;;  %766 = vmatpush3.bf16.msra.mxu1 (!%p230_p3), %v798_v1 }
   0xd   : > { %737 = vmatprep.subr.bf16.mxu0 (!%p230_p3), %v799_v2  ;;  %759 = vmatprep.subr.bf16.mxu1 (!%p230_p3), %v799_v2 }
   0xe   : > { %s941_s21 = smov (!%p281_p4, %s700_s21), 15 }
   0xf   : > { %s701_s26 = sshll.u32 %s941_s21, 2  ;;  %s703_s14 = sshll.u32 %s941_s21, 3 }
  0x10   : > { %s891_s29 = scalar_lea.vmem %s931_s0, %s701_s26  ;;  %738 = vmatpush3.bf16.msra.mxu0 %v799_v2  ;;  %767 = vmatpush3.bf16.msra.mxu1 %v799_v2  ;;  %s308_s20 = scalar_lea.vmem %s934_s3, %s703_s14 }
  0x11   : > { %v805_v4 = vld [vmem:[%s891_s29] sm:$0xff]   ;;  %v806_v5 = vld [vmem:[%s891_s29 + $0x10] sm:$0xff]   ;;  %739 = vmatprep.subr.bf16.mxu0 %v800_v3  ;;  %760 = vmatprep.subr.bf16.mxu1 %v800_v3  ;;  %v807_v10 = vld [vmem:[%s891_s29 + $0x8] sm:$0xff]   ;;  %s317_s25 = scalar_lea.vmem %s935_s4, %s703_s14 }
  0x12   : > { %749 = vmatprep.mubr.bf16.mxu0 %v805_v4  ;;  %753 = vmatprep.mubr.bf16.mxu1 %v806_v5  ;;  %v808_v11 = vld [vmem:[%s891_s29 + $0x18] sm:$0xff]   ;;  %v545_v14 = vld [vmem:[%s308_s20 + $0x10] sm:$0xff]  ;;  %v543_v20 = vld [vmem:[%s308_s20] sm:$0xff] }
  0x13   : > { %v549_v16 = vld [vmem:[%s308_s20 + $0x30] sm:$0xff]  ;;  %v547_v22 = vld [vmem:[%s308_s20 + $0x20] sm:$0xff]  ;;  %v546_v26 = vld [vmem:[%s308_s20 + $0x18] sm:$0xff] }
  0x14   : > { %740 = vmatpush3.bf16.msra.mxu0 %v800_v3  ;;  %768 = vmatpush3.bf16.msra.mxu1 %v800_v3  ;;  %v550_v28 = vld [vmem:[%s308_s20 + $0x38] sm:$0xff]  ;;  %v544_v34 = vld [vmem:[%s308_s20 + $0x8] sm:$0xff] }
  0x15   : > { %741 = vmatprep.subr.bf16.mxu0 %v801_v6  ;;  %761 = vmatprep.subr.bf16.mxu1 %v801_v6  ;;  %v548_v36 = vld [vmem:[%s308_s20 + $0x28] sm:$0xff] }
  0x18   : > { %742 = vmatpush3.bf16.msra.mxu0 %v801_v6  ;;  %769 = vmatpush3.bf16.msra.mxu1 %v801_v6 }
  0x19   : > { %743 = vmatprep.subr.bf16.mxu0 %v802_v7  ;;  %762 = vmatprep.subr.bf16.mxu1 %v802_v7 }
  0x1c   : > { %744 = vmatpush3.bf16.msra.mxu0 %v802_v7  ;;  %770 = vmatpush3.bf16.msra.mxu1 %v802_v7 }
  0x1d   : > { %745 = vmatprep.subr.bf16.mxu0 %v803_v8  ;;  %763 = vmatprep.subr.bf16.mxu1 %v803_v8 }
  0x20   : > { %746 = vmatpush3.bf16.msra.mxu0 %v803_v8  ;;  %771 = vmatpush3.bf16.msra.mxu1 %v803_v8 }
  0x21   : > { %747 = vmatprep.subr.bf16.mxu0 %v804_v9  ;;  %764 = vmatprep.subr.bf16.mxu1 %v804_v9 }
  0x24   : > { %748 = vmatpush3.bf16.msra.mxu0 %v804_v9  ;;  %772 = vmatpush3.bf16.msra.mxu1 %v804_v9 }
  0x27   : > { %750 = vmatmul.mubr.bf16.vlgmr.msra.gmra.mrb[0].mxu0 %v807_v10  ;;  %754 = vmatmul.mubr.bf16.vlgmr.msra.gmra.mrb[0].mxu1 %v808_v11 }
  0xfa   : > { %v751_v13 = vpop.f32.mrb[0].mxu0  ;;  %v755_v15 = vpop.f32.mrb[0].mxu1 }
  0xfb   : > { %v537_v17 = vadd.f32 %v751_v13, %v718_v12  ;;  %v541_v18 = vadd.f32 %v755_v15, %v718_v12  ;;  %v470_v19 = vpop.f32.mrb[1].mxu0  ;;  %v486_v21 = vpop.f32.mrb[1].mxu1 }
  0xfc   : > { %v535_v23 = vadd.f32 %v718_v12, %v470_v19  ;;  %v539_v24 = vadd.f32 %v718_v12, %v486_v21  ;;  %v752_v25 = vpop.f32.mrb[2].mxu0  ;;  %v756_v27 = vpop.f32.mrb[2].mxu1 }
  0xfd   : > { %v553_v29 = vadd.f32 %v545_v14, %v537_v17  ;;  %v557_v30 = vadd.f32 %v549_v16, %v541_v18  ;;  %v538_v31 = vadd.f32 %v752_v25, %v718_v12  ;;  %v542_v32 = vadd.f32 %v756_v27, %v718_v12  ;;  %v473_v33 = vpop.f32.mrb[3].mxu0  ;;  %v489_v35 = vpop.f32.mrb[3].mxu1 }
  0xfe   : > { %v551_v37 = vadd.f32 %v543_v20, %v535_v23  ;;  %v555_v38 = vadd.f32 %v547_v22, %v539_v24  ;;  %v536_v39 = vadd.f32 %v718_v12, %v473_v33  ;;  %v540_v40 = vadd.f32 %v718_v12, %v489_v35 }
  0xff   : > { %561 = vst [vmem:[%s317_s25 + $0x10] sm:$0xff] %v553_v29  ;;  %565 = vst [vmem:[%s317_s25 + $0x30] sm:$0xff] %v557_v30  ;;  %v554_v41 = vadd.f32 %v546_v26, %v538_v31  ;;  %v558_v42 = vadd.f32 %v550_v28, %v542_v32 }
 0x100   : > { %559 = vst [vmem:[%s317_s25] sm:$0xff] %v551_v37  ;;  %563 = vst [vmem:[%s317_s25 + $0x20] sm:$0xff] %v555_v38  ;;  %v552_v43 = vadd.f32 %v544_v34, %v536_v39  ;;  %v556_v44 = vadd.f32 %v548_v36, %v540_v40 }
 0x101   : > { %562 = vst [vmem:[%s317_s25 + $0x18] sm:$0xff] %v554_v41  ;;  %566 = vst [vmem:[%s317_s25 + $0x38] sm:$0xff] %v558_v42 }
 0x102   : > { %560 = vst [vmem:[%s317_s25 + $0x8] sm:$0xff] %v552_v43  ;;  %564 = vst [vmem:[%s317_s25 + $0x28] sm:$0xff] %v556_v44 }
 0x103 PF: > { %s14_s17 = sadd.s32 1, %s831_s17   ;;  %s936_s15 = smov %s827_s16 }
 0x104   : > { %p11_p5 = scmp.ge.s32.totalorder %s14_s17, 4   ;;  %s937_s16 = smov %s939_s18 }
 0x106   :  { %13 = sbr.rel (!%p11_p5) target bundleno = 2 (0x2), region = 83 }

// kernel: vit_forward.14
= control target key start
LH: loop header
LB: loop body
LE: loop exit
PB: predicated region body
PF: predicated region fallthrough
CT: control target
= control target key end

     0   :  { %s2067_s6 = smov 0   ;;  %s2584_s0 = inlined_call_operand.vmem [shape: bf16[2,64,384], index: 0, kind: input, shape index: {}]   ;;  %s2585_s1 = inlined_call_operand.vmem [shape: bf16[2,64,128], index: 1, kind: output, shape index: {}]  }
   0x1 LB: > { %s1524_s7 = sadd.s32 4294967295, %s2052_s6   ;;  %p1528_p0 = scmp.ge.s32.totalorder %s2052_s6, 1  ;;  %s2052_s6 = sphi %s2067_s6, %s11_s6  }
   0x2   : > { %p87_p1 = scmp.lt.s32.totalorder %s2052_s6, 3 }
   0x4   : > { %p88_p2 = pnand %p1528_p0, %p87_p1 }
   0x5   : > { %p107_p3 = scmp.lt.s32.totalorder (!%p88_p2), %s1524_s7, 1  ;;  %vm166_vm0 = vcmask (!%p88_p2), 261120   ;;  %vm256_vm1 = vcmask (!%p88_p2), 523264   ;;  %s2054_s12 = smov (!%p88_p2), 96   ;;  %vm1420_vm2 = vcmask (!%p88_p2), 785408  }
   0x6   : > { %91 = sbr.rel (%p88_p2) target bundleno = 2815 (0xaff), region = 24  ;;  %s2055_s13 = smov (!%p88_p2), 64  }
   0x7   : > { %s2056_s14 = smov (!%p88_p2), 32  }
   0xd   : > { %s2587_s7 = smov (!%p107_p3, %s1524_s7), 1 }
   0xe   : > { %s1826_s8 = smul.u32 96, %s2587_s7  ;;  %s1586_s15 = sshll.u32 %s2587_s7, 5 }
   0xf   : > { %s2555_s18 = scalar_lea.vmem %s2585_s1, %s1586_s15 }
  0x10   : > { %s2081_s11 = scalar_lea.vmem %s2584_s0, %s1826_s8 }
  0x11   : > { %v2084_v0 = vld [vmem:[%s2081_s11 + $0x4] ss:$12 sps:$4 sm:$0xff]   ;;  %v2087_v1 = vld [vmem:[%s2081_s11 + $0x1c] ss:$12 sps:$4 sm:$0xff]   ;;  %v2096_v3 = vld [vmem:[%s2081_s11] ss:$12 sps:$4 sm:$0xff]  }
  0x12   : > { %1810 = vmatprep.subr.msk.bf16.mxu0 %vm166_vm0, %v2084_v0  ;;  %v180_v2 = vsel %vm166_vm0, %v2084_v0, 0  ;;  %v2099_v4 = vld [vmem:[%s2081_s11 + $0x34] ss:$12 sps:$4 sm:$0xff]   ;;  %1690 = vmatprep.mubr.msk.bf16.mxu0 %vm166_vm0, %v2096_v3  ;;  %v183_v5 = vsel %vm166_vm0, %v2087_v1, 0  ;;  %v2110_v7 = vld [vmem:[%s2081_s11 + $0x4c] ss:$12 sps:$4 sm:$0xff]  }
  0x13   : > { %1683 = vmatpush3.bf16.xpose.msra.mxu0 %v180_v2  ;;  %v186_v6 = vsel %vm166_vm0, %v2099_v4, 0  ;;  %v189_v8 = vsel %vm166_vm0, %v2110_v7, 0  ;;  %v2117_v9 = vld [vmem:[%s2081_s11 + $0x18] ss:$12 sps:$4 sm:$0xff]   ;;  %v2120_v10 = vld [vmem:[%s2081_s11 + $0x30] ss:$12 sps:$4 sm:$0xff]  }
  0x14   : > { %1811 = vmatprep.subr.msk.bf16.mxu0 %vm166_vm0, %v2087_v1  ;;  %v2127_v11 = vld [vmem:[%s2081_s11 + $0x48] ss:$12 sps:$4 sm:$0xff]   ;;  %v2172_v59 = vld [vmem:[%s2081_s11 + $0x20] ss:$12 sps:$4 sm:$0xff]   ;;  %v2177_v60 = vld [vmem:[%s2081_s11 + $0x38] ss:$12 sps:$4 sm:$0xff]  }
  0x15   : > { %v2165_v57 = vld [vmem:[%s2081_s11 + $0x8] ss:$12 sps:$4 sm:$0xff]   ;;  %v2184_v61 = vld [vmem:[%s2081_s11 + $0x50] ss:$12 sps:$4 sm:$0xff]  }
  0x16   : > { %1698 = vmatprep.subr.bf16.mxu1 %v2165_v57 }
  0x17   : > { %1699 = vmatpush3.bf16.msra.mxu1 %v2165_v57 }
  0x18   : > { %1700 = vmatprep.subr.bf16.mxu1 %v2172_v59 }
  0x1b   : > { %1685 = vmatpush3.bf16.xpose.msra.mxu0 %v183_v5  ;;  %1701 = vmatpush3.bf16.msra.mxu1 %v2172_v59 }
  0x1c   : > { %1812 = vmatprep.subr.msk.bf16.mxu0 %vm166_vm0, %v2099_v4  ;;  %1702 = vmatprep.subr.bf16.mxu1 %v2177_v60 }
  0x1f   : > { %1703 = vmatpush3.bf16.msra.mxu1 %v2177_v60 }
  0x20   : > { %1704 = vmatprep.subr.bf16.mxu1 %v2184_v61 }
  0x23   : > { %1687 = vmatpush3.bf16.xpose.msra.mxu0 %v186_v6  ;;  %1705 = vmatpush3.bf16.msra.mxu1 %v2184_v61 }
  0x24   : > { %1813 = vmatprep.subr.msk.bf16.mxu0 %vm166_vm0, %v2110_v7 }
  0x2b   : > { %1689 = vmatpush3.bf16.xpose.msra.mxu0 %v189_v8 }
  0x32   : > { %1691 = vmatmul.mubr.msk.bf16.vlgmr.msra.gmra.mrb[0].mxu0 %vm166_vm0, %v2117_v9 }
  0x33   : > { %1694 = vmatprep.mubr.msk.bf16.mxu0 %vm166_vm0, %v2120_v10 }
  0x3a   : > { %1695 = vmatmul.mubr.msk.bf16.gmra.mrb[4].mxu0 %vm166_vm0, %v2127_v11 }
 0x105   : > { %v1692_v12 = vpop.f32.mrb[0].mxu0 }
 0x106   : > { %v225_v13 = vpop.f32.mrb[1].mxu0  ;;  %v263_v14 = vsel %vm256_vm1, %v1692_v12, -inf }
 0x107   : > { %264 = vmax.xlane.f32.xlu1 %v263_v14  ;;  %v1693_v15 = vpop.f32.mrb[2].mxu0  ;;  %v257_v16 = vsel %vm256_vm1, %v225_v13, -inf }
 0x108   : > { %258 = vmax.xlane.f32.xlu0 %v257_v16  ;;  %v228_v17 = vpop.f32.mrb[3].mxu0  ;;  %v266_v18 = vsel %vm256_vm1, %v1693_v15, -inf }
 0x109   : > { %v260_v19 = vsel %vm256_vm1, %v228_v17, -inf }
 0x10b   : > { %267 = vmax.xlane.f32.xlu1 %v266_v18 }
 0x10c   : > { %261 = vmax.xlane.f32.xlu0 %v260_v19 }
 0x10d   : > { %v1696_v20 = vpop.f32.mrb[4].mxu0 }
 0x10e   : > { %v241_v21 = vpop.f32.mrb[5].mxu0  ;;  %v275_v26 = vsel %vm256_vm1, %v1696_v20, -inf }
 0x10f   : > { %v2135_v22 = vpop.f32.mrb[6].mxu0  ;;  %v269_v23 = vsel %vm256_vm1, %v241_v21, -inf }
 0x110   : > { %270 = vmax.xlane.f32.xlu0 %v269_v23  ;;  %v2138_v24 = vpop.f32.mrb[7].mxu0  ;;  %v278_v27 = vsel %vm256_vm1, %v2135_v22, -inf }
 0x111   : > { %v272_v25 = vsel %vm256_vm1, %v2138_v24, -inf }
 0x112   : > { %273 = vmax.xlane.f32.xlu1 %v272_v25 }
 0x114   : > { %276 = vmax.xlane.f32.xlu0 %v275_v26 }
 0x116   : > { %279 = vmax.xlane.f32.xlu1 %v278_v27 }
 0x194   : > { %v265_v28 = vpop.xlane.xlu1 %264 }
 0x195   : > { %v283_v29 = vsub.f32 %v1692_v12, %v265_v28  ;;  %v259_v30 = vpop.xlane.xlu0 %258 }
 0x196   : > { %v281_v31 = vsub.f32 %v225_v13, %v259_v30 }
 0x197   : > { %v293_v32 = vmul.f32 1.442695, %v283_v29 }
 0x198   : > { %v289_v33 = vmul.f32 1.442695, %v281_v31  ;;  %v268_v34 = vpop.xlane.xlu1 %267 }
 0x199   : > { %1914 = vpow2.f32 %v293_v32  ;;  %v284_v35 = vsub.f32 %v1693_v15, %v268_v34  ;;  %v262_v36 = vpop.xlane.xlu0 %261 }
 0x19a   : > { %v282_v37 = vsub.f32 %v228_v17, %v262_v36  ;;  %1916 = vpow2.f32 %v289_v33 }
 0x19b   : > { %v295_v38 = vmul.f32 1.442695, %v284_v35 }
 0x19c   : > { %v291_v39 = vmul.f32 1.442695, %v282_v37 }
 0x19d   : > { %1918 = vpow2.f32 %v295_v38  ;;  %v271_v40 = vpop.xlane.xlu0 %270 }
 0x19e   : > { %1920 = vpow2.f32 %v291_v39  ;;  %v285_v41 = vsub.f32 %v241_v21, %v271_v40 }
 0x19f   : > { %v274_v62 = vpop.xlane.xlu1 %273 }
 0x1a0   : > { %v297_v45 = vmul.f32 1.442695, %v285_v41  ;;  %v286_v5 = vsub.f32 %v2138_v24, %v274_v62 }
 0x1a1   : > { %v277_v42 = vpop.xlane.xlu0 %276 }
 0x1a2   : > { %v287_v43 = vsub.f32 %v1696_v20, %v277_v42  ;;  %v299_v8 = vmul.f32 1.442695, %v286_v5 }
 0x1a3   : > { %v2145_v44 = vpop.eup %1914  ;;  %v280_v63 = vpop.xlane.xlu1 %279 }
 0x1a4   : > { %v301_v46 = vmul.f32 1.442695, %v287_v43  ;;  %v311_v47 = vsel %vm256_vm1, %v2145_v44, 0.0  ;;  %v2149_v48 = vpop.eup %1916  ;;  %v288_v2 = vsub.f32 %v2135_v22, %v280_v63 }
 0x1a5   : > { %312 = vadd.xlane.f32.xlu0 %v311_v47  ;;  %v305_v50 = vsel %vm256_vm1, %v2149_v48, 0.0 }
 0x1a6   : > { %1922 = vpow2.f32 %v301_v46  ;;  %v303_v6 = vmul.f32 1.442695, %v288_v2 }
 0x1a7   : > { %v2151_v49 = vpop.eup %1918  ;;  %1924 = vpow2.f32 %v297_v45 }
 0x1a8   : > { %v314_v51 = vsel %vm256_vm1, %v2151_v49, 0.0  ;;  %v1921_v52 = vpop.eup %1920  ;;  %1926 = vpow2.f32 %v303_v6 }
 0x1a9   : > { %306 = vadd.xlane.f32.xlu0 %v305_v50  ;;  %315 = vadd.xlane.f32.xlu1 %v314_v51  ;;  %v308_v53 = vsel %vm256_vm1, %v1921_v52, 0.0  ;;  %1928 = vpow2.f32 %v299_v8 }
 0x1ad   : > { %309 = vadd.xlane.f32.xlu1 %v308_v53 }
 0x1b0   : > { %v2158_v54 = vpop.eup %1922 }
 0x1b1   : > { %v323_v55 = vsel %vm256_vm1, %v2158_v54, 0.0  ;;  %v2162_v56 = vpop.eup %1924 }
 0x1b2   : > { %324 = vadd.xlane.f32.xlu0 %v323_v55  ;;  %v317_v58 = vsel %vm256_vm1, %v2162_v56, 0.0  ;;  %v1927_v12 = vpop.eup %1926 }
 0x1b3   : > { %v326_v13 = vsel %vm256_vm1, %v1927_v12, 0.0  ;;  %v1929_v14 = vpop.eup %1928 }
 0x1b4   : > { %v320_v15 = vsel %vm256_vm1, %v1929_v14, 0.0 }
 0x1b6   : > { %318 = vadd.xlane.f32.xlu0 %v317_v58 }
 0x1be   : > { %460 = vrot.lane.b32.xlu1 %v2087_v1, %s2054_s12 }
 0x1c2   : > { %462 = vrot.lane.b32.xlu1 %v2099_v4, %s2054_s12 }
 0x1cc   : > { %458 = vrot.lane.b32.xlu0 %v2084_v0, %s2054_s12 }
 0x1d0   : > { %450 = vrot.lane.b32.xlu0 %v2096_v3, %s2054_s12 }
 0x1d4   : > { %454 = vrot.lane.b32.xlu0 %v2120_v10, %s2054_s12 }
 0x1e6   : > { %327 = vadd.xlane.f32.xlu1 %v326_v13 }
 0x1ea   : > { %321 = vadd.xlane.f32.xlu1 %v320_v15 }
 0x1fb   : > { %464 = vrot.lane.b32.xlu1 %v2110_v7, %s2054_s12 }
 0x1ff   : > { %452 = vrot.lane.b32.xlu1 %v2117_v9, %s2054_s12 }
 0x203   : > { %456 = vrot.lane.b32.xlu1 %v2127_v11, %s2054_s12 }
 0x232   : > { %v313_v16 = vpop.xlane.xlu0 %312 }
 0x236   : > { %v307_v17 = vpop.xlane.xlu0 %306  ;;  %v316_v18 = vpop.xlane.xlu1 %315 }
 0x237   : > { %1930 = vrcp.f32 %v316_v18 }
 0x238   : > { %1932 = vrcp.f32 %v307_v17 }
 0x239   : > { %1934 = vrcp.f32 %v313_v16 }
 0x23a   : > { %v310_v19 = vpop.xlane.xlu1 %309 }
 0x23b   : > { %1936 = vrcp.f32 %v310_v19 }
 0x23e   : > { %v461_v34 = vpop.permute.xlu1 %460 }
 0x23f   : > { %v325_v20 = vpop.xlane.xlu0 %324  ;;  %v482_v35 = vsel %vm166_vm0, %v461_v34, 0 }
 0x241   : > { %v1931_v21 = vpop.eup %1930 }
 0x242   : > { %v1933_v22 = vpop.eup %1932  ;;  %v340_v26 = vmul.f32 %v1931_v21, %v2151_v49  ;;  %v463_v36 = vpop.permute.xlu1 %462 }
 0x243   : > { %v319_v23 = vpop.xlane.xlu0 %318  ;;  %v1935_v24 = vpop.eup %1934  ;;  %v337_v27 = vmul.f32 %v1933_v22, %v2149_v48  ;;  %v485_v37 = vsel %vm166_vm0, %v463_v36, 0 }
 0x244   : > { %v339_v30 = vmul.f32 %v1935_v24, %v2145_v44 }
 0x245   : > { %v1937_v25 = vpop.eup %1936 }
 0x246   : > { %v338_v28 = vmul.f32 %v1937_v25, %v1921_v52  ;;  %v346_v33 = vpack.c.bf16 %v340_v26, %v339_v30 }
 0x247   : > { %v459_v29 = vpop.permute.xlu0 %458 }
 0x248   : > { %v345_v31 = vpack.c.bf16 %v338_v28, %v337_v27  ;;  %1814 = vmatprep.subr.msk.bf16.mxu1 %vm166_vm0, %v459_v29  ;;  %v479_v32 = vsel %vm166_vm0, %v459_v29, 0 }
 0x24a   : > { %1706 = vmatprep.mubr.msk.bf16.mxu1 %vm256_vm1, %v345_v31 }
 0x24b   : > { %1707 = vmatmul.mubr.msk.bf16.vlgmr.msra.gmra.mrb[0].mxu1 %vm256_vm1, %v346_v33  ;;  %v451_v52 = vpop.permute.xlu0 %450 }
 0x24c   : > { %1715 = vmatpush3.bf16.xpose.msra.mxu1 %v479_v32 }
 0x24d   : > { %1815 = vmatprep.subr.msk.bf16.mxu1 %vm166_vm0, %v461_v34 }
 0x24f   : > { %v455_v55 = vpop.permute.xlu0 %454 }
 0x254   : > { %1717 = vmatpush3.bf16.xpose.msra.mxu1 %v482_v35 }
 0x255   : > { %1816 = vmatprep.subr.msk.bf16.mxu1 %vm166_vm0, %v463_v36 }
 0x25c   : > { %1719 = vmatpush3.bf16.xpose.msra.mxu1 %v485_v37 }
 0x273   : > { %v328_v38 = vpop.xlane.xlu1 %327 }
 0x274   : > { %1938 = vrcp.f32 %v328_v38 }
 0x275   : > { %1940 = vrcp.f32 %v319_v23 }
 0x276   : > { %1942 = vrcp.f32 %v325_v20 }
 0x277   : > { %v322_v39 = vpop.xlane.xlu1 %321 }
 0x278   : > { %1944 = vrcp.f32 %v322_v39 }
 0x27b   : > { %v465_v40 = vpop.permute.xlu1 %464 }
 0x27c   : > { %v488_v41 = vsel %vm166_vm0, %v465_v40, 0  ;;  %1817 = vmatprep.subr.msk.bf16.mxu1 %vm166_vm0, %v465_v40 }
 0x27d   : > { %1721 = vmatpush3.bf16.xpose.msra.mxu1 %v488_v41 }
 0x27e   : > { %v1939_v42 = vpop.eup %1938 }
 0x27f   : > { %v1941_v43 = vpop.eup %1940  ;;  %v344_v46 = vmul.f32 %v1939_v42, %v1927_v12  ;;  %v453_v53 = vpop.permute.xlu1 %452 }
 0x280   : > { %v1943_v44 = vpop.eup %1942  ;;  %v341_v47 = vmul.f32 %v1941_v43, %v2162_v56 }
 0x281   : > { %v343_v49 = vmul.f32 %v1943_v44, %v2158_v54 }
 0x282   : > { %v1945_v45 = vpop.eup %1944 }
 0x283   : > { %v342_v48 = vmul.f32 %v1945_v45, %v1929_v14  ;;  %v348_v51 = vpack.c.bf16 %v344_v46, %v343_v49  ;;  %v457_v58 = vpop.permute.xlu1 %456 }
 0x285   : > { %v347_v50 = vpack.c.bf16 %v342_v48, %v341_v47 }
 0x287   : > { %1710 = vmatprep.mubr.msk.bf16.mxu1 %vm256_vm1, %v347_v50 }
 0x288   : > { %1711 = vmatmul.mubr.msk.bf16.gmra.mrb[4].mxu1 %vm256_vm1, %v348_v51 }
 0x289   : > { %1722 = vmatprep.mubr.msk.bf16.mxu1 %vm166_vm0, %v451_v52 }
 0x290   : > { %1723 = vmatmul.mubr.msk.bf16.vlgmr.msra.gmra.mrb[8].mxu1 %vm166_vm0, %v453_v53 }
 0x291   : > { %1726 = vmatprep.mubr.msk.bf16.mxu1 %vm166_vm0, %v455_v55 }
 0x298   : > { %1727 = vmatmul.mubr.msk.bf16.gmra.mrb[12].mxu1 %vm166_vm0, %v457_v58 }
 0x31e   : > { %v2227_v56 = vpop.f32.mrb[0].mxu1 }
 0x31f   : > { %v2229_v54 = vpop.f32.mrb[1].mxu1 }
 0x320   : > { %v2231_v62 = vpop.f32.mrb[2].mxu1 }
 0x321   : > { %v2233_v63 = vpop.f32.mrb[3].mxu1 }
 0x35b   : > { %v2235_v2 = vpop.f32.mrb[4].mxu1 }
 0x35c   : > { %v2237_v5 = vpop.f32.mrb[5].mxu1 }
 0x35d   : > { %v2239_v6 = vpop.f32.mrb[6].mxu1 }
 0x35e   : > { %v2241_v8 = vpop.f32.mrb[7].mxu1 }
 0x363   : > { %v1724_v12 = vpop.f32.mrb[8].mxu1 }
 0x364   : > { %v524_v13 = vpop.f32.mrb[9].mxu1  ;;  %v561_v14 = vsel %vm256_vm1, %v1724_v12, -inf }
 0x365   : > { %562 = vmax.xlane.f32.xlu0 %v561_v14  ;;  %v1725_v15 = vpop.f32.mrb[10].mxu1  ;;  %v555_v18 = vsel %vm256_vm1, %v524_v13, -inf }
 0x366   : > { %v527_v16 = vpop.f32.mrb[11].mxu1  ;;  %v564_v20 = vsel %vm256_vm1, %v1725_v15, -inf }
 0x367   : > { %v558_v17 = vsel %vm256_vm1, %v527_v16, -inf }
 0x368   : > { %559 = vmax.xlane.f32.xlu1 %v558_v17 }
 0x369   : > { %556 = vmax.xlane.f32.xlu0 %v555_v18 }
 0x36b   : > { %v1728_v19 = vpop.f32.mrb[12].mxu1 }
 0x36c   : > { %v540_v21 = vpop.f32.mrb[13].mxu1  ;;  %v573_v23 = vsel %vm256_vm1, %v1728_v19, -inf }
 0x36d   : > { %565 = vmax.xlane.f32.xlu0 %v564_v20  ;;  %v2247_v22 = vpop.f32.mrb[14].mxu1  ;;  %v567_v25 = vsel %vm256_vm1, %v540_v21, -inf }
 0x36e   : > { %v2250_v24 = vpop.f32.mrb[15].mxu1  ;;  %v576_v26 = vsel %vm256_vm1, %v2247_v22, -inf }
 0x36f   : > { %v570_v27 = vsel %vm256_vm1, %v2250_v24, -inf }
 0x371   : > { %574 = vmax.xlane.f32.xlu0 %v573_v23 }
 0x375   : > { %568 = vmax.xlane.f32.xlu0 %v567_v25 }
 0x379   : > { %649 = vrot.lane.b32.xlu1 %v2172_v59, %s2054_s12 }
 0x37d   : > { %651 = vrot.lane.b32.xlu1 %v2177_v60, %s2054_s12 }
 0x38b   : > { %647 = vrot.lane.b32.xlu0 %v2165_v57, %s2054_s12 }
 0x3a1   : > { %577 = vmax.xlane.f32.xlu1 %v576_v26 }
 0x3a5   : > { %571 = vmax.xlane.f32.xlu1 %v570_v27 }
 0x3b6   : > { %653 = vrot.lane.b32.xlu1 %v2184_v61, %s2054_s12 }
 0x3f2   : > { %v563_v28 = vpop.xlane.xlu0 %562 }
 0x3f3   : > { %v581_v29 = vsub.f32 %v1724_v12, %v563_v28 }
 0x3f5   : > { %v591_v30 = vmul.f32 1.442695, %v581_v29  ;;  %v560_v31 = vpop.xlane.xlu1 %559 }
 0x3f6   : > { %v557_v32 = vpop.xlane.xlu0 %556  ;;  %v580_v34 = vsub.f32 %v527_v16, %v560_v31 }
 0x3f7   : > { %1946 = vpow2.f32 %v591_v30  ;;  %v579_v33 = vsub.f32 %v524_v13, %v557_v32 }
 0x3f8   : > { %v589_v38 = vmul.f32 1.442695, %v580_v34 }
 0x3f9   : > { %v587_v35 = vmul.f32 1.442695, %v579_v33  ;;  %v650_v49 = vpop.permute.xlu1 %649 }
 0x3fa   : > { %v566_v36 = vpop.xlane.xlu0 %565 }
 0x3fb   : > { %1948 = vpow2.f32 %v587_v35  ;;  %v582_v37 = vsub.f32 %v1725_v15, %v566_v36 }
 0x3fd   : > { %v593_v39 = vmul.f32 1.442695, %v582_v37  ;;  %v652_v58 = vpop.permute.xlu1 %651 }
 0x3fe   : > { %v575_v40 = vpop.xlane.xlu0 %574 }
 0x3ff   : > { %1950 = vpow2.f32 %v593_v39  ;;  %v585_v41 = vsub.f32 %v1728_v19, %v575_v40 }
 0x400   : > { %1952 = vpow2.f32 %v589_v38 }
 0x401   : > { %v2265_v42 = vpop.eup %1946  ;;  %v599_v43 = vmul.f32 1.442695, %v585_v41 }
 0x402   : > { %v569_v44 = vpop.xlane.xlu0 %568  ;;  %v609_v45 = vsel %vm256_vm1, %v2265_v42, 0.0 }
 0x403   : > { %1954 = vpow2.f32 %v599_v43  ;;  %v583_v46 = vsub.f32 %v540_v21, %v569_v44  ;;  %610 = vadd.xlane.f32.xlu0 %v609_v45 }
 0x405   : > { %v2269_v47 = vpop.eup %1948  ;;  %v595_v48 = vmul.f32 1.442695, %v583_v46 }
 0x406   : > { %v648_v50 = vpop.permute.xlu0 %647  ;;  %v603_v51 = vsel %vm256_vm1, %v2269_v47, 0.0 }
 0x407   : > { %1956 = vpow2.f32 %v595_v48  ;;  %604 = vadd.xlane.f32.xlu0 %v603_v51  ;;  %1730 = vmatprep.subr.bf16.mxu0 %v648_v50 }
 0x408   : > { %1731 = vmatpush3.bf16.msra.mxu0 %v648_v50 }
 0x409   : > { %v1951_v52 = vpop.eup %1950  ;;  %1732 = vmatprep.subr.bf16.mxu0 %v650_v49 }
 0x40a   : > { %v612_v53 = vsel %vm256_vm1, %v1951_v52, 0.0  ;;  %v1953_v55 = vpop.eup %1952 }
 0x40b   : > { %613 = vadd.xlane.f32.xlu1 %v612_v53  ;;  %v606_v14 = vsel %vm256_vm1, %v1953_v55, 0.0 }
 0x40c   : > { %1733 = vmatpush3.bf16.msra.mxu0 %v650_v49 }
 0x40d   : > { %v2274_v12 = vpop.eup %1954  ;;  %1734 = vmatprep.subr.bf16.mxu0 %v652_v58 }
 0x40e   : > { %v621_v13 = vsel %vm256_vm1, %v2274_v12, 0.0 }
 0x40f   : > { %622 = vadd.xlane.f32.xlu0 %v621_v13  ;;  %607 = vadd.xlane.f32.xlu1 %v606_v14 }
 0x410   : > { %1735 = vmatpush3.bf16.msra.mxu0 %v652_v58 }
 0x411   : > { %v2279_v15 = vpop.eup %1956 }
 0x412   : > { %v615_v16 = vsel %vm256_vm1, %v2279_v15, 0.0 }
 0x413   : > { %616 = vadd.xlane.f32.xlu0 %v615_v16 }
 0x420   : > { %746 = vrot.lane.b32.xlu1 %v2087_v1, %s2055_s13 }
 0x424   : > { %748 = vrot.lane.b32.xlu1 %v2099_v4, %s2055_s13 }
 0x42e   : > { %v578_v17 = vpop.xlane.xlu1 %577 }
 0x42f   : > { %v586_v18 = vsub.f32 %v2247_v22, %v578_v17 }
 0x431   : > { %v601_v19 = vmul.f32 1.442695, %v586_v18 }
 0x432   : > { %v572_v20 = vpop.xlane.xlu1 %571 }
 0x433   : > { %1958 = vpow2.f32 %v601_v19  ;;  %v584_v21 = vsub.f32 %v2250_v24, %v572_v20 }
 0x435   : > { %v597_v23 = vmul.f32 1.442695, %v584_v21 }
 0x436   : > { %v654_v25 = vpop.permute.xlu1 %653 }
 0x437   : > { %1736 = vmatprep.subr.bf16.mxu0 %v654_v25  ;;  %1960 = vpow2.f32 %v597_v23 }
 0x438   : > { %1737 = vmatpush3.bf16.msra.mxu0 %v654_v25 }
 0x43d   : > { %v1959_v26 = vpop.eup %1958 }
 0x43e   : > { %v624_v27 = vsel %vm256_vm1, %v1959_v26, 0.0 }
 0x43f   : > { %625 = vadd.xlane.f32.xlu0 %v624_v27 }
 0x441   : > { %v1961_v28 = vpop.eup %1960 }
 0x442   : > { %v618_v29 = vsel %vm256_vm1, %v1961_v28, 0.0 }
 0x448   : > { %619 = vadd.xlane.f32.xlu1 %v618_v29 }
 0x455   : > { %744 = vrot.lane.b32.xlu0 %v2084_v0, %s2055_s13 }
 0x459   : > { %750 = vrot.lane.b32.xlu1 %v2110_v7, %s2055_s13  ;;  %736 = vrot.lane.b32.xlu0 %v2096_v3, %s2055_s13 }
 0x45d   : > { %738 = vrot.lane.b32.xlu1 %v2117_v9, %s2055_s13  ;;  %740 = vrot.lane.b32.xlu0 %v2120_v10, %s2055_s13 }
 0x461   : > { %742 = vrot.lane.b32.xlu1 %v2127_v11, %s2055_s13 }
 0x490   : > { %v611_v22 = vpop.xlane.xlu0 %610 }
 0x494   : > { %v605_v30 = vpop.xlane.xlu0 %604 }
 0x498   : > { %v614_v24 = vpop.xlane.xlu1 %613 }
 0x499   : > { %1962 = vrcp.f32 %v614_v24 }
 0x49a   : > { %1964 = vrcp.f32 %v605_v30 }
 0x49b   : > { %1966 = vrcp.f32 %v611_v22 }
 0x49c   : > { %v608_v31 = vpop.xlane.xlu1 %607  ;;  %v623_v43 = vpop.xlane.xlu0 %622 }
 0x49d   : > { %1968 = vrcp.f32 %v608_v31 }
 0x4a0   : > { %v617_v44 = vpop.xlane.xlu0 %616  ;;  %v747_v45 = vpop.permute.xlu1 %746 }
 0x4a3   : > { %v1963_v32 = vpop.eup %1962 }
 0x4a4   : > { %v1965_v33 = vpop.eup %1964  ;;  %v638_v36 = vmul.f32 %v1963_v32, %v1951_v52  ;;  %v749_v49 = vpop.permute.xlu1 %748 }
 0x4a5   : > { %v1967_v34 = vpop.eup %1966  ;;  %v635_v37 = vmul.f32 %v1965_v33, %v2269_v47  ;;  %v768_v47 = vsel %vm166_vm0, %v747_v45, 0  ;;  %v771_v14 = vsel %vm166_vm0, %v749_v49, 0 }
 0x4a6   : > { %v637_v39 = vmul.f32 %v1967_v34, %v2265_v42 }
 0x4a7   : > { %v1969_v35 = vpop.eup %1968 }
 0x4a8   : > { %v636_v38 = vmul.f32 %v1969_v35, %v1953_v55  ;;  %v644_v41 = vpack.c.bf16 %v638_v36, %v637_v39 }
 0x4aa   : > { %v643_v40 = vpack.c.bf16 %v636_v38, %v635_v37 }
 0x4ac   : > { %1738 = vmatprep.mubr.msk.bf16.mxu0 %vm256_vm1, %v643_v40 }
 0x4ad   : > { %1739 = vmatmul.mubr.msk.bf16.vlgmr.msra.gmra.mrb[8].mxu0 %vm256_vm1, %v644_v41 }
 0x4cc   : > { %v626_v46 = vpop.xlane.xlu0 %625 }
 0x4cd   : > { %1970 = vrcp.f32 %v626_v46 }
 0x4ce   : > { %1972 = vrcp.f32 %v617_v44 }
 0x4cf   : > { %1974 = vrcp.f32 %v623_v43 }
 0x4d0   : > { %v745_v48 = vpop.permute.xlu0 %744 }
 0x4d1   : > { %v765_v50 = vsel %vm166_vm0, %v745_v48, 0  ;;  %1818 = vmatprep.subr.msk.bf16.mxu0 %vm166_vm0, %v745_v48 }
 0x4d2   : > { %1747 = vmatpush3.bf16.xpose.msra.mxu0 %v765_v50 }
 0x4d3   : > { %1819 = vmatprep.subr.msk.bf16.mxu0 %vm166_vm0, %v747_v45 }
 0x4d4   : > { %v737_v21 = vpop.permute.xlu0 %736 }
 0x4d5   : > { %v620_v42 = vpop.xlane.xlu1 %619 }
 0x4d6   : > { %1976 = vrcp.f32 %v620_v42 }
 0x4d7   : > { %v1971_v51 = vpop.eup %1970 }
 0x4d8   : > { %v1973_v52 = vpop.eup %1972  ;;  %v642_v58 = vmul.f32 %v1971_v51, %v1959_v26 }
 0x4d9   : > { %v1975_v53 = vpop.eup %1974  ;;  %v751_v13 = vpop.permute.xlu1 %750  ;;  %v639_v16 = vmul.f32 %v1973_v52, %v2279_v15 }
 0x4da   : > { %1749 = vmatpush3.bf16.xpose.msra.mxu0 %v768_v47  ;;  %v641_v18 = vmul.f32 %v1975_v53, %v2274_v12  ;;  %v774_v23 = vsel %vm166_vm0, %v751_v13, 0  ;;  %v741_v15 = vpop.permute.xlu0 %740 }
 0x4db   : > { %1820 = vmatprep.subr.msk.bf16.mxu0 %vm166_vm0, %v749_v49 }
 0x4dc   : > { %v646_v20 = vpack.c.bf16 %v642_v58, %v641_v18 }
 0x4dd   : > { %v739_v25 = vpop.permute.xlu1 %738 }
 0x4e0   : > { %v1977_v55 = vpop.eup %1976 }
 0x4e1   : > { %v640_v17 = vmul.f32 %v1977_v55, %v1961_v28  ;;  %v743_v12 = vpop.permute.xlu1 %742 }
 0x4e2   : > { %1751 = vmatpush3.bf16.xpose.msra.mxu0 %v771_v14 }
 0x4e3   : > { %v645_v19 = vpack.c.bf16 %v640_v17, %v639_v16  ;;  %1821 = vmatprep.subr.msk.bf16.mxu0 %vm166_vm0, %v751_v13 }
 0x4e5   : > { %1742 = vmatprep.mubr.msk.bf16.mxu0 %vm256_vm1, %v645_v19 }
 0x4e6   : > { %1743 = vmatmul.mubr.msk.bf16.gmra.mrb[12].mxu0 %vm256_vm1, %v646_v20 }
 0x4e7   : > { %1754 = vmatprep.mubr.msk.bf16.mxu0 %vm166_vm0, %v737_v21 }
 0x4ea   : > { %1753 = vmatpush3.bf16.xpose.msra.mxu0 %v774_v23 }
 0x4f1   : > { %1755 = vmatmul.mubr.msk.bf16.vlgmr.msra.gmra.mrb[16].mxu0 %vm166_vm0, %v739_v25 }
 0x4f2   : > { %1758 = vmatprep.mubr.msk.bf16.mxu0 %vm166_vm0, %v741_v15 }
 0x4f9   : > { %1759 = vmatmul.mubr.msk.bf16.gmra.mrb[20].mxu0 %vm166_vm0, %v743_v12 }
 0x580   : > { %v2323_v26 = vpop.f32.mrb[8].mxu0 }
 0x581   : > { %v2325_v27 = vpop.f32.mrb[9].mxu0 }
 0x582   : > { %v2327_v28 = vpop.f32.mrb[10].mxu0 }
 0x583   : > { %v1843_v29 = vpack.i.bf16 %v2327_v28, %v2323_v26  ;;  %v2331_v22 = vpop.f32.mrb[11].mxu0 }
 0x584   : > { %v1838_v24 = vpack.i.bf16 %v2331_v22, %v2325_v27 }
 0x5b9   : > { %v2335_v30 = vpop.f32.mrb[12].mxu0 }
 0x5ba   : > { %v2337_v31 = vpop.f32.mrb[13].mxu0 }
 0x5bb   : > { %v2339_v32 = vpop.f32.mrb[14].mxu0 }
 0x5bc   : > { %v1853_v33 = vpack.i.bf16 %v2339_v32, %v2335_v30  ;;  %v2343_v34 = vpop.f32.mrb[15].mxu0 }
 0x5bd   : > { %v1848_v35 = vpack.i.bf16 %v2343_v34, %v2337_v31  ;;  %v2045_v34 = vld [vmem:[%s2081_s11 + $0x50] ss:$12 sps:$4 sm:$0xff]  }
 0x5c4   : > { %v1756_v36 = vpop.f32.mrb[16].mxu0 }
 0x5c5   : > { %v810_v37 = vpop.f32.mrb[17].mxu0  ;;  %v847_v38 = vsel %vm256_vm1, %v1756_v36, -inf }
 0x5c6   : > { %848 = vmax.xlane.f32.xlu0 %v847_v38  ;;  %v1757_v39 = vpop.f32.mrb[18].mxu0  ;;  %v841_v43 = vsel %vm256_vm1, %v810_v37, -inf }
 0x5c7   : > { %v813_v40 = vpop.f32.mrb[19].mxu0  ;;  %v850_v45 = vsel %vm256_vm1, %v1757_v39, -inf }
 0x5c8   : > { %v844_v41 = vsel %vm256_vm1, %v813_v40, -inf }
 0x5c9   : > { %845 = vmax.xlane.f32.xlu1 %v844_v41 }
 0x5ca   : > { %842 = vmax.xlane.f32.xlu0 %v841_v43 }
 0x5cc   : > { %v1760_v44 = vpop.f32.mrb[20].mxu0 }
 0x5cd   : > { %v826_v46 = vpop.f32.mrb[21].mxu0  ;;  %v859_v49 = vsel %vm256_vm1, %v1760_v44, -inf }
 0x5ce   : > { %851 = vmax.xlane.f32.xlu0 %v850_v45  ;;  %v2351_v48 = vpop.f32.mrb[22].mxu0  ;;  %v853_v42 = vsel %vm256_vm1, %v826_v46, -inf }
 0x5cf   : > { %v2354_v50 = vpop.f32.mrb[23].mxu0  ;;  %v862_v47 = vsel %vm256_vm1, %v2351_v48, -inf }
 0x5d0   : > { %v856_v51 = vsel %vm256_vm1, %v2354_v50, -inf }
 0x5d2   : > { %860 = vmax.xlane.f32.xlu0 %v859_v49 }
 0x5d6   : > { %854 = vmax.xlane.f32.xlu0 %v853_v42 }
 0x5da   : > { %935 = vrot.lane.b32.xlu1 %v2172_v59, %s2055_s13 }
 0x5de   : > { %937 = vrot.lane.b32.xlu1 %v2177_v60, %s2055_s13 }
 0x5ec   : > { %933 = vrot.lane.b32.xlu0 %v2165_v57, %s2055_s13 }
 0x602   : > { %863 = vmax.xlane.f32.xlu1 %v862_v47 }
 0x606   : > { %857 = vmax.xlane.f32.xlu1 %v856_v51 }
 0x617   : > { %939 = vrot.lane.b32.xlu1 %v2184_v61, %s2055_s13 }
 0x653   : > { %v849_v52 = vpop.xlane.xlu0 %848 }
 0x654   : > { %v867_v53 = vsub.f32 %v1756_v36, %v849_v52 }
 0x656   : > { %v877_v59 = vmul.f32 1.442695, %v867_v53  ;;  %v846_v55 = vpop.xlane.xlu1 %845 }
 0x657   : > { %v843_v58 = vpop.xlane.xlu0 %842  ;;  %v866_v13 = vsub.f32 %v813_v40, %v846_v55 }
 0x658   : > { %1978 = vpow2.f32 %v877_v59  ;;  %v865_v60 = vsub.f32 %v810_v37, %v843_v58 }
 0x659   : > { %v875_v17 = vmul.f32 1.442695, %v866_v13 }
 0x65a   : > { %v873_v57 = vmul.f32 1.442695, %v865_v60  ;;  %v936_v37 = vpop.permute.xlu1 %935 }
 0x65b   : > { %v852_v14 = vpop.xlane.xlu0 %851 }
 0x65c   : > { %1980 = vpow2.f32 %v873_v57  ;;  %v868_v16 = vsub.f32 %v1757_v39, %v852_v14 }
 0x65e   : > { %v879_v18 = vmul.f32 1.442695, %v868_v16 }
 0x65f   : > { %v861_v19 = vpop.xlane.xlu0 %860 }
 0x660   : > { %1982 = vpow2.f32 %v879_v18  ;;  %v871_v20 = vsub.f32 %v1760_v44, %v861_v19  ;;  %v938_v44 = vpop.permute.xlu1 %937 }
 0x661   : > { %1984 = vpow2.f32 %v875_v17 }
 0x662   : > { %v2369_v21 = vpop.eup %1978  ;;  %v885_v61 = vmul.f32 1.442695, %v871_v20 }
 0x663   : > { %v855_v23 = vpop.xlane.xlu0 %854  ;;  %v895_v25 = vsel %vm256_vm1, %v2369_v21, 0.0 }
 0x664   : > { %1986 = vpow2.f32 %v885_v61  ;;  %v869_v15 = vsub.f32 %v826_v46, %v855_v23  ;;  %896 = vadd.xlane.f32.xlu0 %v895_v25 }
 0x666   : > { %v2373_v12 = vpop.eup %1980  ;;  %v881_v36 = vmul.f32 1.442695, %v869_v15 }
 0x667   : > { %v934_v38 = vpop.permute.xlu0 %933  ;;  %v889_v39 = vsel %vm256_vm1, %v2373_v12, 0.0 }
 0x668   : > { %1988 = vpow2.f32 %v881_v36  ;;  %890 = vadd.xlane.f32.xlu0 %v889_v39  ;;  %1762 = vmatprep.subr.bf16.mxu1 %v934_v38 }
 0x669   : > { %1763 = vmatpush3.bf16.msra.mxu1 %v934_v38 }
 0x66a   : > { %v1983_v40 = vpop.eup %1982  ;;  %1764 = vmatprep.subr.bf16.mxu1 %v936_v37 }
 0x66b   : > { %v898_v41 = vsel %vm256_vm1, %v1983_v40, 0.0  ;;  %v1985_v43 = vpop.eup %1984 }
 0x66c   : > { %899 = vadd.xlane.f32.xlu1 %v898_v41  ;;  %v892_v49 = vsel %vm256_vm1, %v1985_v43, 0.0 }
 0x66d   : > { %1765 = vmatpush3.bf16.msra.mxu1 %v936_v37 }
 0x66e   : > { %v2378_v45 = vpop.eup %1986  ;;  %1766 = vmatprep.subr.bf16.mxu1 %v938_v44 }
 0x66f   : > { %v907_v46 = vsel %vm256_vm1, %v2378_v45, 0.0 }
 0x670   : > { %908 = vadd.xlane.f32.xlu0 %v907_v46  ;;  %893 = vadd.xlane.f32.xlu1 %v892_v49 }
 0x671   : > { %1767 = vmatpush3.bf16.msra.mxu1 %v938_v44 }
 0x672   : > { %v2383_v42 = vpop.eup %1988 }
 0x673   : > { %v901_v47 = vsel %vm256_vm1, %v2383_v42, 0.0 }
 0x674   : > { %902 = vadd.xlane.f32.xlu0 %v901_v47 }
 0x681   : > { %1032 = vrot.lane.b32.xlu1 %v2087_v1, %s2056_s14 }
 0x685   : > { %1034 = vrot.lane.b32.xlu1 %v2099_v4, %s2056_s14 }
 0x68f   : > { %v864_v51 = vpop.xlane.xlu1 %863 }
 0x690   : > { %v872_v52 = vsub.f32 %v2351_v48, %v864_v51 }
 0x692   : > { %v887_v53 = vmul.f32 1.442695, %v872_v52 }
 0x693   : > { %v858_v59 = vpop.xlane.xlu1 %857 }
 0x694   : > { %1990 = vpow2.f32 %v887_v53  ;;  %v870_v55 = vsub.f32 %v2354_v50, %v858_v59 }
 0x696   : > { %v883_v58 = vmul.f32 1.442695, %v870_v55 }
 0x697   : > { %v940_v60 = vpop.permute.xlu1 %939 }
 0x698   : > { %1768 = vmatprep.subr.bf16.mxu1 %v940_v60  ;;  %1992 = vpow2.f32 %v883_v58 }
 0x699   : > { %1769 = vmatpush3.bf16.msra.mxu1 %v940_v60 }
 0x69e   : > { %v1991_v13 = vpop.eup %1990 }
 0x69f   : > { %v910_v57 = vsel %vm256_vm1, %v1991_v13, 0.0 }
 0x6a0   : > { %911 = vadd.xlane.f32.xlu0 %v910_v57 }
 0x6a2   : > { %v1993_v1 = vpop.eup %1992 }
 0x6a3   : > { %v904_v4 = vsel %vm256_vm1, %v1993_v1, 0.0 }
 0x6a9   : > { %905 = vadd.xlane.f32.xlu1 %v904_v4 }
 0x6b6   : > { %1030 = vrot.lane.b32.xlu0 %v2084_v0, %s2056_s14 }
 0x6ba   : > { %1036 = vrot.lane.b32.xlu1 %v2110_v7, %s2056_s14  ;;  %1022 = vrot.lane.b32.xlu0 %v2096_v3, %s2056_s14 }
 0x6be   : > { %1024 = vrot.lane.b32.xlu1 %v2117_v9, %s2056_s14  ;;  %1026 = vrot.lane.b32.xlu0 %v2120_v10, %s2056_s14 }
 0x6c2   : > { %1028 = vrot.lane.b32.xlu1 %v2127_v11, %s2056_s14 }
 0x6f1   : > { %v897_v48 = vpop.xlane.xlu0 %896 }
 0x6f5   : > { %v891_v14 = vpop.xlane.xlu0 %890 }
 0x6f9   : > { %v900_v50 = vpop.xlane.xlu1 %899 }
 0x6fa   : > { %1994 = vrcp.f32 %v900_v50 }
 0x6fb   : > { %1996 = vrcp.f32 %v891_v14 }
 0x6fc   : > { %1998 = vrcp.f32 %v897_v48 }
 0x6fd   : > { %v894_v0 = vpop.xlane.xlu1 %893  ;;  %v909_v61 = vpop.xlane.xlu0 %908 }
 0x6fe   : > { %2000 = vrcp.f32 %v894_v0 }
 0x701   : > { %v903_v23 = vpop.xlane.xlu0 %902  ;;  %v1033_v25 = vpop.permute.xlu1 %1032 }
 0x704   : > { %v1995_v7 = vpop.eup %1994 }
 0x705   : > { %v1997_v16 = vpop.eup %1996  ;;  %v924_v18 = vmul.f32 %v1995_v7, %v1983_v40  ;;  %v1035_v37 = vpop.permute.xlu1 %1034 }
 0x706   : > { %v1999_v3 = vpop.eup %1998  ;;  %v921_v9 = vmul.f32 %v1997_v16, %v2373_v12  ;;  %v1054_v12 = vsel %vm166_vm0, %v1033_v25, 0  ;;  %v1057_v49 = vsel %vm166_vm0, %v1035_v37, 0 }
 0x707   : > { %v923_v10 = vmul.f32 %v1999_v3, %v2369_v21 }
 0x708   : > { %v2001_v17 = vpop.eup %2000 }
 0x709   : > { %v922_v19 = vmul.f32 %v2001_v17, %v1985_v43  ;;  %v930_v11 = vpack.c.bf16 %v924_v18, %v923_v10 }
 0x70b   : > { %v929_v20 = vpack.c.bf16 %v922_v19, %v921_v9 }
 0x70d   : > { %1770 = vmatprep.mubr.msk.bf16.mxu1 %vm256_vm1, %v929_v20 }
 0x70e   : > { %1771 = vmatmul.mubr.msk.bf16.vlgmr.msra.gmra.mrb[16].mxu1 %vm256_vm1, %v930_v11 }
 0x72d   : > { %v912_v15 = vpop.xlane.xlu0 %911 }
 0x72e   : > { %2002 = vrcp.f32 %v912_v15 }
 0x72f   : > { %2004 = vrcp.f32 %v903_v23 }
 0x730   : > { %2006 = vrcp.f32 %v909_v61 }
 0x731   : > { %v1031_v36 = vpop.permute.xlu0 %1030 }
 0x732   : > { %v1051_v38 = vsel %vm166_vm0, %v1031_v36, 0  ;;  %1822 = vmatprep.subr.msk.bf16.mxu1 %vm166_vm0, %v1031_v36 }
 0x733   : > { %1779 = vmatpush3.bf16.xpose.msra.mxu1 %v1051_v38 }
 0x734   : > { %1823 = vmatprep.subr.msk.bf16.mxu1 %vm166_vm0, %v1033_v25 }
 0x735   : > { %v1023_v55 = vpop.permute.xlu0 %1022 }
 0x736   : > { %v906_v21 = vpop.xlane.xlu1 %905 }
 0x737   : > { %2008 = vrcp.f32 %v906_v21 }
 0x738   : > { %v2003_v39 = vpop.eup %2002 }
 0x739   : > { %v2005_v40 = vpop.eup %2004  ;;  %v928_v44 = vmul.f32 %v2003_v39, %v1991_v13 }
 0x73a   : > { %v2007_v41 = vpop.eup %2006  ;;  %v1037_v46 = vpop.permute.xlu1 %1036  ;;  %v925_v47 = vmul.f32 %v2005_v40, %v2383_v42 }
 0x73b   : > { %1781 = vmatpush3.bf16.xpose.msra.mxu1 %v1054_v12  ;;  %v927_v52 = vmul.f32 %v2007_v41, %v2378_v45  ;;  %v1060_v58 = vsel %vm166_vm0, %v1037_v46, 0  ;;  %v1027_v42 = vpop.permute.xlu0 %1026 }
 0x73c   : > { %1824 = vmatprep.subr.msk.bf16.mxu1 %vm166_vm0, %v1035_v37 }
 0x73d   : > { %v932_v59 = vpack.c.bf16 %v928_v44, %v927_v52 }
 0x73e   : > { %v1025_v60 = vpop.permute.xlu1 %1024 }
 0x741   : > { %v2009_v43 = vpop.eup %2008 }
 0x742   : > { %v926_v51 = vmul.f32 %v2009_v43, %v1993_v1  ;;  %v1029_v45 = vpop.permute.xlu1 %1028 }
 0x743   : > { %1783 = vmatpush3.bf16.xpose.msra.mxu1 %v1057_v49 }
 0x744   : > { %v931_v53 = vpack.c.bf16 %v926_v51, %v925_v47  ;;  %1825 = vmatprep.subr.msk.bf16.mxu1 %vm166_vm0, %v1037_v46 }
 0x746   : > { %1774 = vmatprep.mubr.msk.bf16.mxu1 %vm256_vm1, %v931_v53 }
 0x747   : > { %1775 = vmatmul.mubr.msk.bf16.gmra.mrb[20].mxu1 %vm256_vm1, %v932_v59 }
 0x748   : > { %1786 = vmatprep.mubr.msk.bf16.mxu1 %vm166_vm0, %v1023_v55 }
 0x74b   : > { %1785 = vmatpush3.bf16.xpose.msra.mxu1 %v1060_v58 }
 0x752   : > { %1787 = vmatmul.mubr.msk.bf16.vlgmr.msra.gmra.mrb[24].mxu1 %vm166_vm0, %v1025_v60 }
 0x753   : > { %1790 = vmatprep.mubr.msk.bf16.mxu1 %vm166_vm0, %v1027_v42 }
 0x75a   : > { %1791 = vmatmul.mubr.msk.bf16.gmra.mrb[28].mxu1 %vm166_vm0, %v1029_v45 }
 0x7e1   : > { %v2427_v13 = vpop.f32.mrb[16].mxu1 }
 0x7e2   : > { %v2429_v57 = vpop.f32.mrb[17].mxu1 }
 0x7e3   : > { %v2431_v1 = vpop.f32.mrb[18].mxu1 }
 0x7e4   : > { %v1863_v4 = vpack.i.bf16 %v2431_v1, %v2427_v13  ;;  %v2435_v48 = vpop.f32.mrb[19].mxu1 }
 0x7e5   : > { %v1858_v50 = vpack.i.bf16 %v2435_v48, %v2429_v57 }
 0x81a   : > { %v2439_v14 = vpop.f32.mrb[20].mxu1 }
 0x81b   : > { %v2441_v0 = vpop.f32.mrb[21].mxu1 }
 0x81c   : > { %v2443_v7 = vpop.f32.mrb[22].mxu1 }
 0x81d   : > { %v1873_v16 = vpack.i.bf16 %v2443_v7, %v2439_v14  ;;  %v2447_v3 = vpop.f32.mrb[23].mxu1 }
 0x81e   : > { %v1868_v17 = vpack.i.bf16 %v2447_v3, %v2441_v0 }
 0x825   : > { %v1788_v18 = vpop.f32.mrb[24].mxu1 }
 0x826   : > { %v1096_v9 = vpop.f32.mrb[25].mxu1  ;;  %v1133_v61 = vsel %vm256_vm1, %v1788_v18, -inf }
 0x827   : > { %v1789_v19 = vpop.f32.mrb[26].mxu1  ;;  %v1127_v10 = vsel %vm256_vm1, %v1096_v9, -inf }
 0x828   : > { %1128 = vmax.xlane.f32.xlu0 %v1127_v10  ;;  %v1099_v20 = vpop.f32.mrb[27].mxu1  ;;  %v1136_v36 = vsel %vm256_vm1, %v1789_v19, -inf }
 0x829   : > { %v1130_v11 = vsel %vm256_vm1, %v1099_v20, -inf }
 0x82a   : > { %1131 = vmax.xlane.f32.xlu1 %v1130_v11 }
 0x82c   : > { %1134 = vmax.xlane.f32.xlu0 %v1133_v61 }
 0x82d   : > { %v1792_v23 = vpop.f32.mrb[28].mxu1 }
 0x82e   : > { %v1112_v25 = vpop.f32.mrb[29].mxu1  ;;  %v1145_v39 = vsel %vm256_vm1, %v1792_v23, -inf }
 0x82f   : > { %v2454_v15 = vpop.f32.mrb[30].mxu1  ;;  %v1139_v21 = vsel %vm256_vm1, %v1112_v25, -inf }
 0x830   : > { %1137 = vmax.xlane.f32.xlu0 %v1136_v36  ;;  %v2457_v37 = vpop.f32.mrb[31].mxu1  ;;  %v1148_v12 = vsel %vm256_vm1, %v2454_v15, -inf }
 0x831   : > { %v1142_v38 = vsel %vm256_vm1, %v2457_v37, -inf }
 0x832   : > { %1143 = vmax.xlane.f32.xlu1 %v1142_v38 }
 0x834   : > { %1140 = vmax.xlane.f32.xlu0 %v1139_v21 }
 0x836   : > { %1149 = vmax.xlane.f32.xlu1 %v1148_v12 }
 0x838   : > { %1146 = vmax.xlane.f32.xlu0 %v1145_v39 }
 0x8b5   : > { %v1129_v40 = vpop.xlane.xlu0 %1128 }
 0x8b6   : > { %v1151_v41 = vsub.f32 %v1096_v9, %v1129_v40  ;;  %v2042_v40 = vld [vmem:[%s2081_s11 + $0x20] ss:$12 sps:$4 sm:$0xff]  }
 0x8b7   : > { %v1132_v43 = vpop.xlane.xlu1 %1131 }
 0x8b8   : > { %v1159_v49 = vmul.f32 1.442695, %v1151_v41  ;;  %v1152_v47 = vsub.f32 %v1099_v20, %v1132_v43  ;;  %v2043_v41 = vld [vmem:[%s2081_s11 + $0x38] ss:$12 sps:$4 sm:$0xff]  }
 0x8b9   : > { %v1135_v44 = vpop.xlane.xlu0 %1134 }
 0x8ba   : > { %v1153_v46 = vsub.f32 %v1788_v18, %v1135_v44  ;;  %v1161_v59 = vmul.f32 1.442695, %v1152_v47  ;;  %v2044_v44 = vld [vmem:[%s2081_s11 + $0x8] ss:$12 sps:$4 sm:$0xff]  }
 0x8bc   : > { %v1163_v51 = vmul.f32 1.442695, %v1153_v46 }
 0x8bd   : > { %v1138_v52 = vpop.xlane.xlu0 %1137 }
 0x8be   : > { %2010 = vpow2.f32 %v1163_v51  ;;  %v1154_v53 = vsub.f32 %v1789_v19, %v1138_v52 }
 0x8bf   : > { %2012 = vpow2.f32 %v1159_v49  ;;  %v1144_v43 = vpop.xlane.xlu1 %1143 }
 0x8c0   : > { %v1165_v55 = vmul.f32 1.442695, %v1154_v53  ;;  %v1156_v47 = vsub.f32 %v2457_v37, %v1144_v43 }
 0x8c1   : > { %v1141_v58 = vpop.xlane.xlu0 %1140 }
 0x8c2   : > { %2014 = vpow2.f32 %v1165_v55  ;;  %v1155_v60 = vsub.f32 %v1112_v25, %v1141_v58  ;;  %v1169_v52 = vmul.f32 1.442695, %v1156_v47 }
 0x8c3   : > { %2016 = vpow2.f32 %v1161_v59  ;;  %v1150_v46 = vpop.xlane.xlu1 %1149 }
 0x8c4   : > { %v1167_v9 = vmul.f32 1.442695, %v1155_v60  ;;  %v1158_v49 = vsub.f32 %v2454_v15, %v1150_v46 }
 0x8c5   : > { %v1147_v42 = vpop.xlane.xlu0 %1146 }
 0x8c6   : > { %v1157_v45 = vsub.f32 %v1792_v23, %v1147_v42  ;;  %v1173_v51 = vmul.f32 1.442695, %v1158_v49 }
 0x8c8   : > { %v2465_v10 = vpop.eup %2010  ;;  %v1171_v11 = vmul.f32 1.442695, %v1157_v45 }
 0x8c9   : > { %v1181_v18 = vsel %vm256_vm1, %v2465_v10, 0.0  ;;  %v2013_v20 = vpop.eup %2012 }
 0x8ca   : > { %2018 = vpow2.f32 %v1171_v11  ;;  %1182 = vadd.xlane.f32.xlu0 %v1181_v18  ;;  %v1175_v61 = vsel %vm256_vm1, %v2013_v20, 0.0 }
 0x8cb   : > { %2020 = vpow2.f32 %v1167_v9 }
 0x8cc   : > { %v2469_v19 = vpop.eup %2014  ;;  %2022 = vpow2.f32 %v1173_v51 }
 0x8cd   : > { %v1184_v23 = vsel %vm256_vm1, %v2469_v19, 0.0  ;;  %v2017_v25 = vpop.eup %2016  ;;  %2024 = vpow2.f32 %v1169_v52 }
 0x8ce   : > { %1176 = vadd.xlane.f32.xlu0 %v1175_v61  ;;  %1185 = vadd.xlane.f32.xlu1 %v1184_v23  ;;  %v1178_v36 = vsel %vm256_vm1, %v2017_v25, 0.0 }
 0x8d2   : > { %1179 = vadd.xlane.f32.xlu1 %v1178_v36 }
 0x8d4   : > { %v2475_v38 = vpop.eup %2018 }
 0x8d5   : > { %v1193_v21 = vsel %vm256_vm1, %v2475_v38, 0.0  ;;  %v2479_v12 = vpop.eup %2020 }
 0x8d6   : > { %1194 = vadd.xlane.f32.xlu0 %v1193_v21  ;;  %v1187_v39 = vsel %vm256_vm1, %v2479_v12, 0.0  ;;  %v2023_v27 = vpop.eup %2022 }
 0x8d7   : > { %v1196_v22 = vsel %vm256_vm1, %v2023_v27, 0.0 }
 0x8da   : > { %1188 = vadd.xlane.f32.xlu0 %v1187_v39 }
 0x8e3   : > { %1221 = vrot.lane.b32.xlu1 %v2042_v40, %s2056_s14 }
 0x8e7   : > { %1223 = vrot.lane.b32.xlu1 %v2043_v41, %s2056_s14 }
 0x8f0   : > { %1219 = vrot.lane.b32.xlu0 %v2044_v44, %s2056_s14 }
 0x8f4   : > { %1839 = vrot.lane.b32.xlu0 %v1838_v24, %s2056_s14  ;;  %v2025_v24 = vpop.eup %2024 }
 0x8f5   : > { %v1190_v31 = vsel %vm256_vm1, %v2025_v24, 0.0 }
 0x8f8   : > { %1849 = vrot.lane.b32.xlu0 %v1848_v35, %s2056_s14 }
 0x8fc   : > { %1859 = vrot.lane.b32.xlu0 %v1858_v50, %s2055_s13 }
 0x900   : > { %1869 = vrot.lane.b32.xlu0 %v1868_v17, %s2055_s13 }
 0x90b   : > { %1197 = vadd.xlane.f32.xlu1 %v1196_v22 }
 0x90f   : > { %1191 = vadd.xlane.f32.xlu1 %v1190_v31 }
 0x920   : > { %1225 = vrot.lane.b32.xlu1 %v2045_v34, %s2056_s14 }
 0x924   : > { %1844 = vrot.lane.b32.xlu1 %v1843_v29, %s2056_s14 }
 0x928   : > { %1854 = vrot.lane.b32.xlu1 %v1853_v33, %s2056_s14 }
 0x92c   : > { %1864 = vrot.lane.b32.xlu1 %v1863_v4, %s2055_s13 }
 0x930   : > { %1874 = vrot.lane.b32.xlu1 %v1873_v16, %s2055_s13 }
 0x957   : > { %v1183_v35 = vpop.xlane.xlu0 %1182 }
 0x95b   : > { %v1177_v57 = vpop.xlane.xlu0 %1176  ;;  %v1186_v48 = vpop.xlane.xlu1 %1185 }
 0x95c   : > { %2026 = vrcp.f32 %v1177_v57 }
 0x95f   : > { %v1180_v26 = vpop.xlane.xlu1 %1179 }
 0x960   : > { %2028 = vrcp.f32 %v1180_v26 }
 0x961   : > { %2030 = vrcp.f32 %v1186_v48 }
 0x962   : > { %2032 = vrcp.f32 %v1183_v35 }
 0x963   : > { %v1195_v28 = vpop.xlane.xlu0 %1194  ;;  %v1222_v33 = vpop.permute.xlu1 %1221 }
 0x966   : > { %v2027_v30 = vpop.eup %2026 }
 0x967   : > { %v1189_v29 = vpop.xlane.xlu0 %1188  ;;  %v1207_v0 = vmul.f32 %v2027_v30, %v2013_v20  ;;  %v1224_v4 = vpop.permute.xlu1 %1223 }
 0x96a   : > { %v2029_v32 = vpop.eup %2028 }
 0x96b   : > { %v1220_v50 = vpop.permute.xlu0 %1219  ;;  %v1208_v13 = vmul.f32 %v2029_v32, %v2017_v25  ;;  %v2031_v7 = vpop.eup %2030 }
 0x96c   : > { %1794 = vmatprep.subr.bf16.mxu0 %v1220_v50  ;;  %v2033_v3 = vpop.eup %2032  ;;  %v1210_v17 = vmul.f32 %v2031_v7, %v2469_v19 }
 0x96d   : > { %1795 = vmatpush3.bf16.msra.mxu0 %v1220_v50  ;;  %v1215_v1 = vpack.c.bf16 %v1208_v13, %v1207_v0  ;;  %v1209_v37 = vmul.f32 %v2033_v3, %v2465_v10 }
 0x96e   : > { %1796 = vmatprep.subr.bf16.mxu0 %v1222_v33 }
 0x96f   : > { %1802 = vmatprep.mubr.msk.bf16.mxu0 %vm256_vm1, %v1215_v1  ;;  %v1216_v53 = vpack.c.bf16 %v1210_v17, %v1209_v37  ;;  %v1840_v44 = vpop.permute.xlu0 %1839 }
 0x970   : > { %v1842_v52 = vunpack.i.h.bf16 %v1840_v44 }
 0x971   : > { %1797 = vmatpush3.bf16.msra.mxu0 %v1222_v33 }
 0x972   : > { %1798 = vmatprep.subr.bf16.mxu0 %v1224_v4 }
 0x973   : > { %v1850_v49 = vpop.permute.xlu0 %1849 }
 0x974   : > { %v1852_v30 = vunpack.i.h.bf16 %v1850_v49  ;;  %v1851_v3 = vunpack.i.l.bf16 %v1850_v49 }
 0x975   : > { %1799 = vmatpush3.bf16.msra.mxu0 %v1224_v4 }
 0x977   : > { %v1860_v51 = vpop.permute.xlu0 %1859 }
 0x978   : > { %v1862_v48 = vunpack.i.h.bf16 %v1860_v51  ;;  %v1861_v26 = vunpack.i.l.bf16 %v1860_v51 }
 0x998   : > { %v1198_v14 = vpop.xlane.xlu1 %1197 }
 0x999   : > { %2034 = vrcp.f32 %v1198_v14 }
 0x99a   : > { %2036 = vrcp.f32 %v1189_v29 }
 0x99b   : > { %2038 = vrcp.f32 %v1195_v28  ;;  %v1405_v28 = vsel %vm166_vm0, %v2233_v63, %v1842_v52 }
 0x99c   : > { %v1192_v16 = vpop.xlane.xlu1 %1191 }
 0x99d   : > { %2040 = vrcp.f32 %v1192_v16  ;;  %v1413_v16 = vsel %vm256_vm1, %v1405_v28, %v1862_v48 }
 0x9a0   : > { %v1226_v15 = vpop.permute.xlu1 %1225 }
 0x9a1   : > { %1800 = vmatprep.subr.bf16.mxu0 %v1226_v15 }
 0x9a2   : > { %1801 = vmatpush3.bf16.msra.mxu0 %v1226_v15 }
 0x9a3   : > { %v2035_v59 = vpop.eup %2034 }
 0x9a4   : > { %v2037_v55 = vpop.eup %2036  ;;  %v1214_v42 = vmul.f32 %v2035_v59, %v2023_v27  ;;  %v1845_v43 = vpop.permute.xlu1 %1844  ;;  %v1841_v27 = vunpack.i.l.bf16 %v1840_v44 }
 0x9a5   : > { %1803 = vmatmul.mubr.msk.bf16.vlgmr.msra.gmra.mrb[24].mxu0 %vm256_vm1, %v1216_v53  ;;  %v2039_v58 = vpop.eup %2038  ;;  %v1211_v45 = vmul.f32 %v2037_v55, %v2479_v12  ;;  %v1847_v31 = vunpack.i.h.bf16 %v1845_v43  ;;  %v1846_v34 = vunpack.i.l.bf16 %v1845_v43 }
 0x9a6   : > { %v1213_v11 = vmul.f32 %v2039_v58, %v2475_v38  ;;  %v1404_v29 = vsel %vm166_vm0, %v2229_v54, %v1841_v27 }
 0x9a7   : > { %v2041_v60 = vpop.eup %2040  ;;  %v1407_v33 = vsel %vm166_vm0, %v2231_v62, %v1847_v31  ;;  %v1406_v50 = vsel %vm166_vm0, %v2227_v56, %v1846_v34  ;;  %v1412_v54 = vsel %vm256_vm1, %v1404_v29, %v1861_v26 }
 0x9a8   : > { %v1212_v9 = vmul.f32 %v2041_v60, %v2025_v24  ;;  %v1218_v20 = vpack.c.bf16 %v1214_v42, %v1213_v11  ;;  %v1855_v46 = vpop.permute.xlu1 %1854  ;;  %v1870_v24 = vpop.permute.xlu0 %1869  ;;  %v1408_v11 = vsel %vm166_vm0, %v2237_v5, %v1851_v3 }
 0x9a9   : > { %v1857_v53 = vunpack.i.h.bf16 %v1855_v46  ;;  %v1856_v59 = vunpack.i.l.bf16 %v1855_v46  ;;  %v1872_v42 = vunpack.i.h.bf16 %v1870_v24 }
 0x9aa   : > { %v1217_v18 = vpack.c.bf16 %v1212_v9, %v1211_v45  ;;  %v1871_v45 = vunpack.i.l.bf16 %v1870_v24  ;;  %v1409_v9 = vsel %vm166_vm0, %v2241_v8, %v1852_v30 }
 0x9ac   : > { %1806 = vmatprep.mubr.msk.bf16.mxu0 %vm256_vm1, %v1217_v18  ;;  %v1865_v47 = vpop.permute.xlu1 %1864  ;;  %v1416_v5 = vsel %vm256_vm1, %v1408_v11, %v1871_v45 }
 0x9ad   : > { %1807 = vmatmul.mubr.msk.bf16.gmra.mrb[28].mxu0 %vm256_vm1, %v1218_v20  ;;  %v1867_v35 = vunpack.i.h.bf16 %v1865_v47  ;;  %v1866_v57 = vunpack.i.l.bf16 %v1865_v47  ;;  %v1411_v20 = vsel %vm166_vm0, %v2239_v6, %v1857_v53 }
 0x9af   : > { %v1414_v4 = vsel %vm256_vm1, %v1406_v50, %v1866_v57  ;;  %v1415_v63 = vsel %vm256_vm1, %v1407_v33, %v1867_v35 }
 0x9b0   : > { %v1875_v22 = vpop.permute.xlu1 %1874 }
 0x9b1   : > { %v1877_v58 = vunpack.i.h.bf16 %v1875_v22  ;;  %v1876_v60 = vunpack.i.l.bf16 %v1875_v22 }
 0xa78   : > { %v1804_v10 = vpop.f32.mrb[24].mxu0 }
 0xa79   : > { %v1277_v19 = vpop.f32.mrb[25].mxu0 }
 0xa7a   : > { %v1805_v61 = vpop.f32.mrb[26].mxu0 }
 0xa7b   : > { %v1878_v23 = vpack.i.bf16 %v1805_v61, %v1804_v10  ;;  %v1280_v25 = vpop.f32.mrb[27].mxu0  ;;  %v1410_v10 = vsel %vm166_vm0, %v2235_v2, %v1856_v59 }
 0xa7c   : > { %v1883_v36 = vpack.i.bf16 %v1280_v25, %v1277_v19  ;;  %v1418_v25 = vsel %vm256_vm1, %v1410_v10, %v1876_v60 }
 0xa7d   : > { %1879 = vrot.lane.b32.xlu1 %v1878_v23, %s2054_s12 }
 0xa7e   : > { %1884 = vrot.lane.b32.xlu0 %v1883_v36, %s2054_s12  ;;  %v1419_v36 = vsel %vm256_vm1, %v1411_v20, %v1877_v58 }
 0xa80   : > { %v1808_v21 = vpop.f32.mrb[28].mxu0 }
 0xa81   : > { %v1293_v12 = vpop.f32.mrb[29].mxu0 }
 0xa82   : > { %v1809_v39 = vpop.f32.mrb[30].mxu0 }
 0xa83   : > { %v1893_v38 = vpack.i.bf16 %v1809_v39, %v1808_v21  ;;  %v1296_v40 = vpop.f32.mrb[31].mxu0 }
 0xa84   : > { %v1888_v41 = vpack.i.bf16 %v1296_v40, %v1293_v12  ;;  %v1417_v12 = vsel %vm256_vm1, %v1409_v9, %v1872_v42 }
 0xa85   : > { %1894 = vrot.lane.b32.xlu1 %v1893_v38, %s2054_s12 }
 0xa86   : > { %1889 = vrot.lane.b32.xlu0 %v1888_v41, %s2054_s12 }
 0xaef   : > { %v1880_v32 = vpop.permute.xlu1 %1879 }
 0xaf0   : > { %v1882_v0 = vunpack.i.h.bf16 %v1880_v32  ;;  %v1881_v13 = vunpack.i.l.bf16 %v1880_v32  ;;  %v1885_v1 = vpop.permute.xlu0 %1884 }
 0xaf1   : > { %v1887_v14 = vunpack.i.h.bf16 %v1885_v1  ;;  %v1886_v7 = vunpack.i.l.bf16 %v1885_v1 }
 0xaf2   : > { %v1423_v56 = vsel %vm1420_vm2, %v1414_v4, %v1881_v13  ;;  %v1424_v62 = vsel %vm1420_vm2, %v1415_v63, %v1882_v0 }
 0xaf3   : > { %v1603_v17 = vpack.c.bf16 %v1424_v62, %v1423_v56  ;;  %v1422_v15 = vsel %vm1420_vm2, %v1413_v16, %v1887_v14  ;;  %v1421_v37 = vsel %vm1420_vm2, %v1412_v54, %v1886_v7 }
 0xaf4   : > { %v1598_v55 = vpack.c.bf16 %v1422_v15, %v1421_v37 }
 0xaf5   : > { %1615 = vst [vmem:[%s2555_s18 + $0x8] sm:$0xff] %v1603_v17  }
 0xaf6   : > { %1599 = vst [vmem:[%s2555_s18] sm:$0xff] %v1598_v55  }
 0xaf7   : > { %v1895_v18 = vpop.permute.xlu1 %1894 }
 0xaf8   : > { %v1897_v19 = vunpack.i.h.bf16 %v1895_v18  ;;  %v1896_v61 = vunpack.i.l.bf16 %v1895_v18  ;;  %v1890_v23 = vpop.permute.xlu0 %1889 }
 0xaf9   : > { %v1892_v8 = vunpack.i.h.bf16 %v1890_v23  ;;  %v1891_v21 = vunpack.i.l.bf16 %v1890_v23 }
 0xafa   : > { %v1427_v6 = vsel %vm1420_vm2, %v1418_v25, %v1896_v61  ;;  %v1428_v39 = vsel %vm1420_vm2, %v1419_v36, %v1897_v19 }
 0xafb   : > { %v1613_v2 = vpack.c.bf16 %v1428_v39, %v1427_v6  ;;  %v1426_v38 = vsel %vm1420_vm2, %v1417_v12, %v1892_v8  ;;  %v1425_v40 = vsel %vm1420_vm2, %v1416_v5, %v1891_v21 }
 0xafc   : > { %v1608_v41 = vpack.c.bf16 %v1426_v38, %v1425_v40 }
 0xafd   : > { %1617 = vst [vmem:[%s2555_s18 + $0x18] sm:$0xff] %v1613_v2  }
 0xafe   : > { %1616 = vst [vmem:[%s2555_s18 + $0x10] sm:$0xff] %v1608_v41  }
 0xaff PF: > { %s11_s6 = sadd.s32 1, %s2052_s6  }
 0xb00   : > { %p8_p4 = scmp.ge.s32.totalorder %s11_s6, 4  }
 0xb02   :  { %10 = sbr.rel (!%p8_p4) target bundleno = 1 (0x1), region = 54 }

// kernel: vit_forward.16
= control target key start
LH: loop header
LB: loop body
LE: loop exit
PB: predicated region body
PF: predicated region fallthrough
CT: control target
= control target key end

     0   :  { %s1341_s18 = smov 0   ;;  %s1343_s19 = smov 0   ;;  %s1609_s0 = inlined_call_operand.vmem [shape: f32[128,128], index: 0, kind: input, shape index: {}]   ;;  %s1610_s1 = inlined_call_operand.vmem [shape: bf16[128,256], index: 1, kind: input, shape index: {}]   ;;  %s1611_s2 = inlined_call_operand.vmem [shape: f32[1,256], index: 2, kind: input, shape index: {}]   ;;  %s1612_s3 = inlined_call_operand.vmem [shape: f32[1,128], index: 3, kind: input, shape index: {}]   ;;  %s1613_s4 = inlined_call_operand.vmem [shape: f32[1,128], index: 4, kind: input, shape index: {}]   ;;  %s1614_s5 = inlined_call_operand.vmem [shape: bf16[128,256], index: 5, kind: output, shape index: {}]  }
   0x1   :  { %s1345_s20 = smov 0  }
   0x2 LB: > { %s34_s21 = sadd.s32 1, %s1304_s19  ;;  %p1130_p0 = scmp.ge.s32.totalorder %s1308_s20, 1  ;;  %s1308_s20 = sphi %s1345_s20, %s15_s20   ;;  %s1304_s19 = sphi %s1343_s19, %s1616_s19   ;;  %s1300_s18 = sphi %s1341_s18, %s1615_s18  }
   0x3   : > { %p36_p1 = scmp.ge.s32.totalorder %s34_s21, 2  ;;  %p259_p2 = scmp.lt.s32.totalorder %s1308_s20, 3 }
   0x5   : > { %s1618_s21 = smov (%p36_p1, %s34_s21), 0  ;;  %p260_p3 = pnand %p1130_p0, %p259_p2 }
   0x6   : > { %s1131_s22 = sshll.u32 (!%p260_p3), %s1300_s18, 3  ;;  %v1214_v8 = vld [vmem:[%s1610_s1 + $0x4] ss:$8 sps:$4 sm:$0xff] (!%p260_p3)   ;;  %v1216_v9 = vld [vmem:[%s1610_s1] ss:$8 sps:$4 sm:$0xff] (!%p260_p3)   ;;  %v1310_v56 = vmov (!%p260_p3), 0  }
   0x7   : > { %263 = sbr.rel (%p260_p3) target bundleno = 607 (0x25f), region = 40  ;;  %p316_p4 = scmp.lt.s32.totalorder (!%p260_p3), %s1131_s22, 15  ;;  %v1217_v10 = vld [vmem:[%s1610_s1 + $0x14] ss:$8 sps:$4 sm:$0xff] (!%p260_p3)   ;;  %623 = vmatprep.subr.bf16.mxu0 (!%p260_p3), %v1214_v8  ;;  %1173 = vmatprep.subr.bf16.mxu1 (!%p260_p3), %v1214_v8  ;;  %v1219_v43 = vld [vmem:[%s1610_s1 + $0x10] ss:$8 sps:$4 sm:$0xff] (!%p260_p3)  }
   0x8   : > { %624 = vmatpush1.bf16.msra.mxu0 (!%p260_p3), %v1216_v9  ;;  %1181 = vmatpush1.bf16.msra.mxu1 (!%p260_p3), %v1216_v9  ;;  %v1220_v44 = vld [vmem:[%s1610_s1 + $0x24] ss:$8 sps:$4 sm:$0xff] (!%p260_p3)   ;;  %v1222_v45 = vld [vmem:[%s1610_s1 + $0x20] ss:$8 sps:$4 sm:$0xff] (!%p260_p3)   ;;  %v1223_v46 = vld [vmem:[%s1610_s1 + $0x34] ss:$8 sps:$4 sm:$0xff] (!%p260_p3)  }
   0x9   : > { %625 = vmatprep.subr.bf16.mxu0 (!%p260_p3), %v1217_v10  ;;  %1174 = vmatprep.subr.bf16.mxu1 (!%p260_p3), %v1217_v10  ;;  %v1225_v47 = vld [vmem:[%s1610_s1 + $0x30] ss:$8 sps:$4 sm:$0xff] (!%p260_p3)   ;;  %v1226_v48 = vld [vmem:[%s1610_s1 + $0x44] ss:$8 sps:$4 sm:$0xff] (!%p260_p3)   ;;  %v1228_v49 = vld [vmem:[%s1610_s1 + $0x40] ss:$8 sps:$4 sm:$0xff] (!%p260_p3)  }
   0xa   : > { %v1229_v50 = vld [vmem:[%s1610_s1 + $0x54] ss:$8 sps:$4 sm:$0xff] (!%p260_p3)   ;;  %v1231_v51 = vld [vmem:[%s1610_s1 + $0x50] ss:$8 sps:$4 sm:$0xff] (!%p260_p3)   ;;  %v1232_v52 = vld [vmem:[%s1610_s1 + $0x64] ss:$8 sps:$4 sm:$0xff] (!%p260_p3)   ;;  %655 = vmatprep.mubr.bf16.mxu0 (!%p260_p3), %v1310_v56  ;;  %675 = vmatprep.mubr.bf16.mxu1 (!%p260_p3), %v1310_v56 }
   0xb   : > { %v1234_v53 = vld [vmem:[%s1610_s1 + $0x60] ss:$8 sps:$4 sm:$0xff] (!%p260_p3)   ;;  %v1235_v54 = vld [vmem:[%s1610_s1 + $0x74] ss:$8 sps:$4 sm:$0xff] (!%p260_p3)   ;;  %v1237_v55 = vld [vmem:[%s1610_s1 + $0x70] ss:$8 sps:$4 sm:$0xff] (!%p260_p3)  }
   0xc   : > { %626 = vmatpush1.bf16.msra.mxu0 (!%p260_p3), %v1219_v43  ;;  %1182 = vmatpush1.bf16.msra.mxu1 (!%p260_p3), %v1219_v43 }
   0xd   : > { %627 = vmatprep.subr.bf16.mxu0 (!%p260_p3), %v1220_v44  ;;  %1175 = vmatprep.subr.bf16.mxu1 (!%p260_p3), %v1220_v44 }
   0xe   : > { %s1620_s22 = smov (!%p316_p4, %s1131_s22), 15 }
   0xf   : > { %s1132_s23 = sshll.u32 %s1620_s22, 3 }
  0x10   : > { %s322_s26 = scalar_lea.vmem %s1609_s0, %s1132_s23  ;;  %628 = vmatpush1.bf16.msra.mxu0 %v1222_v45  ;;  %1183 = vmatpush1.bf16.msra.mxu1 %v1222_v45  ;;  %s1556_s27 = scalar_lea.vmem %s1614_s5, %s1132_s23 }
  0x11   : > { %v380_v0 = vld [vmem:[%s322_s26] sm:$0xff]  ;;  %v381_v2 = vld [vmem:[%s322_s26 + $0x8] sm:$0xff]  ;;  %v382_v4 = vld [vmem:[%s322_s26 + $0x10] sm:$0xff]  ;;  %629 = vmatprep.subr.bf16.mxu0 %v1223_v46  ;;  %1176 = vmatprep.subr.bf16.mxu1 %v1223_v46 }
  0x12   : > { %v384_v1 = vld [vmem:[%s322_s26 + $0x20] sm:$0xff]  ;;  %388 = vadd.xlane.f32.xlu0 %v380_v0  ;;  %v385_v3 = vld [vmem:[%s322_s26 + $0x28] sm:$0xff]  ;;  %v383_v5 = vld [vmem:[%s322_s26 + $0x18] sm:$0xff] }
  0x13   : > { %396 = vadd.xlane.f32.xlu1 %v384_v1  ;;  %v386_v6 = vld [vmem:[%s322_s26 + $0x30] sm:$0xff]  ;;  %v387_v7 = vld [vmem:[%s322_s26 + $0x38] sm:$0xff] }
  0x14   : > { %630 = vmatpush1.bf16.msra.mxu0 %v1225_v47  ;;  %1184 = vmatpush1.bf16.msra.mxu1 %v1225_v47 }
  0x15   : > { %631 = vmatprep.subr.bf16.mxu0 %v1226_v48  ;;  %1177 = vmatprep.subr.bf16.mxu1 %v1226_v48 }
  0x16   : > { %390 = vadd.xlane.f32.xlu0 %v381_v2 }
  0x17   : > { %398 = vadd.xlane.f32.xlu1 %v385_v3 }
  0x18   : > { %632 = vmatpush1.bf16.msra.mxu0 %v1228_v49  ;;  %1185 = vmatpush1.bf16.msra.mxu1 %v1228_v49 }
  0x19   : > { %633 = vmatprep.subr.bf16.mxu0 %v1229_v50  ;;  %1178 = vmatprep.subr.bf16.mxu1 %v1229_v50 }
  0x1a   : > { %392 = vadd.xlane.f32.xlu0 %v382_v4 }
  0x1b   : > { %394 = vadd.xlane.f32.xlu1 %v383_v5 }
  0x1c   : > { %634 = vmatpush1.bf16.msra.mxu0 %v1231_v51  ;;  %1186 = vmatpush1.bf16.msra.mxu1 %v1231_v51 }
  0x1d   : > { %635 = vmatprep.subr.bf16.mxu0 %v1232_v52  ;;  %1179 = vmatprep.subr.bf16.mxu1 %v1232_v52 }
  0x1e   : > { %400 = vadd.xlane.f32.xlu0 %v386_v6 }
  0x1f   : > { %402 = vadd.xlane.f32.xlu1 %v387_v7 }
  0x20   : > { %636 = vmatpush1.bf16.msra.mxu0 %v1234_v53  ;;  %1187 = vmatpush1.bf16.msra.mxu1 %v1234_v53 }
  0x21   : > { %637 = vmatprep.subr.bf16.mxu0 %v1235_v54  ;;  %1180 = vmatprep.subr.bf16.mxu1 %v1235_v54 }
  0x24   : > { %638 = vmatpush1.bf16.msra.mxu0 %v1237_v55  ;;  %1188 = vmatpush1.bf16.msra.mxu1 %v1237_v55 }
  0x9f   : > { %v389_v11 = vpop.xlane.xlu0 %388 }
  0xa0   : > { %v397_v12 = vpop.xlane.xlu1 %396  ;;  %v405_v13 = vmul.f32 0.0078125, %v389_v11 }
  0xa1   : > { %v409_v14 = vmul.f32 0.0078125, %v397_v12 }
  0xa2   : > { %v1376_v15 = vsub.f32 %v380_v0, %v405_v13 }
  0xa3   : > { %v1378_v16 = vsub.f32 %v384_v1, %v409_v14  ;;  %v391_v17 = vpop.xlane.xlu0 %390 }
  0xa4   : > { %v399_v18 = vpop.xlane.xlu1 %398  ;;  %v406_v19 = vmul.f32 0.0078125, %v391_v17  ;;  %v421_v20 = vmul.f32 %v1376_v15, %v1376_v15 }
  0xa5   : > { %v410_v21 = vmul.f32 0.0078125, %v399_v18  ;;  %v425_v24 = vmul.f32 %v1378_v16, %v1378_v16 }
  0xa6   : > { %v1382_v22 = vsub.f32 %v381_v2, %v406_v19  ;;  %429 = vadd.xlane.f32.xlu0 %v421_v20  ;;  %v1136_v20 = vld [vmem:[%s1612_s3] ss:$0 sm:$0xff] }
  0xa7   : > { %v1384_v23 = vsub.f32 %v385_v3, %v410_v21  ;;  %v393_v25 = vpop.xlane.xlu0 %392 }
  0xa8   : > { %v395_v26 = vpop.xlane.xlu1 %394  ;;  %v407_v27 = vmul.f32 0.0078125, %v393_v25  ;;  %v422_v28 = vmul.f32 %v1382_v22, %v1382_v22 }
  0xa9   : > { %v408_v29 = vmul.f32 0.0078125, %v395_v26  ;;  %v426_v32 = vmul.f32 %v1384_v23, %v1384_v23 }
  0xaa   : > { %v1390_v30 = vsub.f32 %v382_v4, %v407_v27  ;;  %437 = vadd.xlane.f32.xlu0 %v425_v24  ;;  %431 = vadd.xlane.f32.xlu1 %v422_v28  ;;  %v1137_v28 = vld [vmem:[%s1613_s4] ss:$0 sm:$0xff] }
  0xab   : > { %v1392_v31 = vsub.f32 %v383_v5, %v408_v29  ;;  %v401_v33 = vpop.xlane.xlu0 %400 }
  0xac   : > { %v403_v34 = vpop.xlane.xlu1 %402  ;;  %v411_v35 = vmul.f32 0.0078125, %v401_v33  ;;  %v423_v36 = vmul.f32 %v1390_v30, %v1390_v30 }
  0xad   : > { %v412_v37 = vmul.f32 0.0078125, %v403_v34  ;;  %v424_v40 = vmul.f32 %v1392_v31, %v1392_v31 }
  0xae   : > { %v1398_v38 = vsub.f32 %v386_v6, %v411_v35  ;;  %439 = vadd.xlane.f32.xlu1 %v426_v32  ;;  %433 = vadd.xlane.f32.xlu0 %v423_v36 }
  0xaf   : > { %v1400_v39 = vsub.f32 %v387_v7, %v412_v37 }
  0xb0   : > { %v427_v41 = vmul.f32 %v1398_v38, %v1398_v38 }
  0xb1   : > { %v428_v42 = vmul.f32 %v1400_v39, %v1400_v39 }
  0xb2   : > { %435 = vadd.xlane.f32.xlu1 %v424_v40  ;;  %441 = vadd.xlane.f32.xlu0 %v427_v41 }
  0xb6   : > { %443 = vadd.xlane.f32.xlu1 %v428_v42 }
 0x133   : > { %v430_v57 = vpop.xlane.xlu0 %429 }
 0x134   : > { %v445_v58 = vmul.f32 0.0078125, %v430_v57 }
 0x136   : > { %v453_v59 = vadd.f32 1e-05, %v445_v58  ;;  %v749_v58 = vlaneseq }
 0x137   : > { %v432_v60 = vpop.xlane.xlu1 %431  ;;  %v438_v61 = vpop.xlane.xlu0 %437 }
 0x138   : > { %1238 = vrsqrt.f32 %v453_v59  ;;  %v446_v62 = vmul.f32 0.0078125, %v432_v60  ;;  %v449_v63 = vmul.f32 0.0078125, %v438_v61  ;;  %v747_v60 = vld [vmem:[%s1611_s2] sm:$0x3] }
 0x13a   : > { %v454_v0 = vadd.f32 1e-05, %v446_v62  ;;  %v457_v1 = vadd.f32 1e-05, %v449_v63 }
 0x13b   : > { %v440_v2 = vpop.xlane.xlu1 %439  ;;  %v434_v3 = vpop.xlane.xlu0 %433 }
 0x13c   : > { %1240 = vrsqrt.f32 %v454_v0  ;;  %v450_v4 = vmul.f32 0.0078125, %v440_v2  ;;  %v447_v5 = vmul.f32 0.0078125, %v434_v3 }
 0x13d   : > { %1242 = vrsqrt.f32 %v457_v1 }
 0x13e   : > { %v458_v6 = vadd.f32 1e-05, %v450_v4  ;;  %v455_v7 = vadd.f32 1e-05, %v447_v5 }
 0x13f   : > { %v436_v8 = vpop.xlane.xlu1 %435  ;;  %v442_v9 = vpop.xlane.xlu0 %441 }
 0x140   : > { %1244 = vrsqrt.f32 %v458_v6  ;;  %v448_v10 = vmul.f32 0.0078125, %v436_v8  ;;  %v451_v11 = vmul.f32 0.0078125, %v442_v9 }
 0x141   : > { %1246 = vrsqrt.f32 %v455_v7 }
 0x142   : > { %v1239_v12 = vpop.eup %1238  ;;  %v456_v13 = vadd.f32 1e-05, %v448_v10  ;;  %v459_v14 = vadd.f32 1e-05, %v451_v11 }
 0x143   : > { %v444_v17 = vpop.xlane.xlu1 %443  ;;  %v469_v18 = vmul.f32 %v1239_v12, %v1376_v15 }
 0x144   : > { %1248 = vrsqrt.f32 %v456_v13  ;;  %v452_v19 = vmul.f32 0.0078125, %v444_v17 }
 0x145   : > { %1250 = vrsqrt.f32 %v459_v14  ;;  %v484_v27 = vmul.f32 %v1136_v20, %v469_v18 }
 0x146   : > { %v1241_v21 = vpop.eup %1240  ;;  %v460_v24 = vadd.f32 1e-05, %v452_v19 }
 0x147   : > { %v1243_v25 = vpop.eup %1242  ;;  %v470_v26 = vmul.f32 %v1241_v21, %v1382_v22  ;;  %v499_v34 = vadd.f32 %v1137_v28, %v484_v27 }
 0x148   : > { %1252 = vrsqrt.f32 %v460_v24  ;;  %v473_v15 = vmul.f32 %v1243_v25, %v1378_v16 }
 0x149   : > { %v485_v29 = vmul.f32 %v1136_v20, %v470_v26 }
 0x14a   : > { %v1245_v32 = vpop.eup %1244  ;;  %v488_v37 = vmul.f32 %v1136_v20, %v473_v15 }
 0x14b   : > { %v1247_v33 = vpop.eup %1246  ;;  %v500_v35 = vadd.f32 %v1137_v28, %v485_v29  ;;  %v474_v36 = vmul.f32 %v1245_v32, %v1384_v23 }
 0x14c   : > { %v471_v40 = vmul.f32 %v1247_v33, %v1390_v30  ;;  %v503_v44 = vadd.f32 %v1137_v28, %v488_v37 }
 0x14d   : > { %v523_v41 = vpack.c.bf16 %v500_v35, %v499_v34  ;;  %v489_v22 = vmul.f32 %v1136_v20, %v474_v36 }
 0x14e   : > { %v1249_v42 = vpop.eup %1248  ;;  %v486_v16 = vmul.f32 %v1136_v20, %v471_v40 }
 0x14f   : > { %v1251_v43 = vpop.eup %1250  ;;  %656 = vmatmul.mubr.bf16.vlgmr.msra.gmra.mrb[0].mxu0 %v523_v41  ;;  %v504_v45 = vadd.f32 %v1137_v28, %v489_v22  ;;  %v472_v46 = vmul.f32 %v1249_v42, %v1392_v31 }
 0x150   : > { %665 = vmatprep.mubr.bf16.mxu0 %v1310_v56  ;;  %v475_v47 = vmul.f32 %v1251_v43, %v1398_v38  ;;  %v501_v50 = vadd.f32 %v1137_v28, %v486_v16  ;;  %v750_v38 = vshrl.u32 %v749_v58, 7 }
 0x151   : > { %v525_v48 = vpack.c.bf16 %v504_v45, %v503_v44  ;;  %v487_v49 = vmul.f32 %v1136_v20, %v472_v46 }
 0x152   : > { %v1253_v23 = vpop.eup %1252  ;;  %v490_v52 = vmul.f32 %v1136_v20, %v475_v47  ;;  %v751_v59 = vsub.s32 0, %v750_v38  ;;  %v755_v61 = vsub.s32 1, %v750_v38 }
 0x153   : > { %676 = vmatmul.mubr.bf16.vlgmr.msra.gmra.mrb[0].mxu1 %v525_v48  ;;  %v502_v30 = vadd.f32 %v1137_v28, %v487_v49  ;;  %v476_v51 = vmul.f32 %v1253_v23, %v1400_v39 }
 0x154   : > { %685 = vmatprep.mubr.bf16.mxu1 %v1310_v56  ;;  %v505_v31 = vadd.f32 %v1137_v28, %v490_v52  ;;  %v1468_v62 = vrot.slane %v747_v60, %v751_v59  ;;  %v1470_v39 = vrot.slane %v747_v60, %v755_v61 }
 0x155   : > { %v524_v53 = vpack.c.bf16 %v502_v30, %v501_v50  ;;  %v491_v54 = vmul.f32 %v1136_v20, %v476_v51 }
 0x157   : > { %666 = vmatmul.mubr.bf16.gmra.mrb[4].mxu0 %v524_v53  ;;  %v506_v55 = vadd.f32 %v1137_v28, %v491_v54 }
 0x159   : > { %v526_v57 = vpack.c.bf16 %v506_v55, %v505_v31 }
 0x15b   : > { %686 = vmatmul.mubr.bf16.gmra.mrb[4].mxu1 %v526_v57 }
 0x222   : > { %v657_v56 = vpop.f32.mrb[0].mxu0 }
 0x223   : > { %v759_v63 = vadd.f32 %v1468_v62, %v657_v56  ;;  %v659_v0 = vpop.f32.mrb[1].mxu0 }
 0x224   : > { %v760_v1 = vadd.f32 %v1470_v39, %v659_v0  ;;  %v661_v2 = vpop.f32.mrb[2].mxu0 }
 0x225   : > { %v791_v3 = vmul.f32 0.044715, %v759_v63  ;;  %v761_v4 = vadd.f32 %v1468_v62, %v661_v2  ;;  %v663_v5 = vpop.f32.mrb[3].mxu0  ;;  %v775_v49 = vmul.f32 0.5, %v759_v63 }
 0x226   : > { %v792_v6 = vmul.f32 0.044715, %v760_v1  ;;  %v1476_v7 = vadd.f32 %v1470_v39, %v663_v5  ;;  %v677_v8 = vpop.f32.mrb[0].mxu1  ;;  %v776_v61 = vmul.f32 0.5, %v760_v1 }
 0x227   : > { %v807_v9 = vmul.f32 %v791_v3, %v759_v63  ;;  %v793_v10 = vmul.f32 0.044715, %v761_v4  ;;  %v1479_v11 = vadd.f32 %v1468_v62, %v677_v8  ;;  %v679_v12 = vpop.f32.mrb[1].mxu1  ;;  %v777_v0 = vmul.f32 0.5, %v761_v4 }
 0x228   : > { %v808_v13 = vmul.f32 %v792_v6, %v760_v1  ;;  %v794_v14 = vmul.f32 0.044715, %v1476_v7  ;;  %v1483_v17 = vadd.f32 %v1470_v39, %v679_v12  ;;  %v681_v18 = vpop.f32.mrb[2].mxu1 }
 0x229   : > { %v823_v19 = vmul.f32 %v807_v9, %v759_v63  ;;  %v809_v20 = vmul.f32 %v793_v10, %v761_v4  ;;  %v799_v21 = vmul.f32 0.044715, %v1479_v11  ;;  %v683_v24 = vpop.f32.mrb[3].mxu1  ;;  %v1490_v33 = vadd.f32 %v1468_v62, %v681_v18 }
 0x22a   : > { %v824_v25 = vmul.f32 %v808_v13, %v760_v1  ;;  %v810_v26 = vmul.f32 %v794_v14, %v1476_v7  ;;  %v800_v27 = vmul.f32 0.044715, %v1483_v17  ;;  %v667_v28 = vpop.f32.mrb[4].mxu0  ;;  %v1496_v43 = vadd.f32 %v1470_v39, %v683_v24 }
 0x22b   : > { %v839_v15 = vadd.f32 %v823_v19, %v759_v63  ;;  %v825_v29 = vmul.f32 %v809_v20, %v761_v4  ;;  %v815_v32 = vmul.f32 %v799_v21, %v1479_v11  ;;  %v669_v34 = vpop.f32.mrb[5].mxu0  ;;  %v801_v47 = vmul.f32 0.044715, %v1490_v33 }
 0x22c   : > { %v840_v35 = vadd.f32 %v824_v25, %v760_v1  ;;  %v826_v36 = vmul.f32 %v810_v26, %v1476_v7  ;;  %v816_v37 = vmul.f32 %v800_v27, %v1483_v17  ;;  %v671_v40 = vpop.f32.mrb[6].mxu0  ;;  %v802_v55 = vmul.f32 0.044715, %v1496_v43 }
 0x22d   : > { %v855_v41 = vmul.f32 0.7978846, %v839_v15  ;;  %v841_v22 = vadd.f32 %v825_v29, %v761_v4  ;;  %v831_v42 = vmul.f32 %v815_v32, %v1479_v11  ;;  %v673_v44 = vpop.f32.mrb[7].mxu0  ;;  %v817_v53 = vmul.f32 %v801_v47, %v1490_v33 }
 0x22e   : > { %v856_v45 = vmul.f32 0.7978846, %v840_v35  ;;  %v842_v46 = vadd.f32 %v826_v36, %v1476_v7  ;;  %v832_v16 = vmul.f32 %v816_v37, %v1483_v17  ;;  %v687_v48 = vpop.f32.mrb[4].mxu1  ;;  %v1508_v57 = vadd.f32 %v1468_v62, %v667_v28 }
 0x22f   : > { %1254 = vtanh.f32 %v855_v41  ;;  %v857_v23 = vmul.f32 0.7978846, %v841_v22  ;;  %v847_v50 = vadd.f32 %v831_v42, %v1479_v11  ;;  %v689_v30 = vpop.f32.mrb[5].mxu1  ;;  %v833_v59 = vmul.f32 %v817_v53, %v1490_v33 }
 0x230   : > { %1256 = vtanh.f32 %v856_v45  ;;  %v858_v51 = vmul.f32 0.7978846, %v842_v46  ;;  %v848_v52 = vadd.f32 %v832_v16, %v1483_v17  ;;  %v1504_v54 = vpop.f32.mrb[6].mxu1  ;;  %v1514_v60 = vadd.f32 %v1470_v39, %v669_v34 }
 0x231   : > { %1258 = vtanh.f32 %v857_v23  ;;  %v863_v31 = vmul.f32 0.7978846, %v847_v50  ;;  %v1510_v58 = vpop.f32.mrb[7].mxu1  ;;  %v818_v56 = vmul.f32 %v802_v55, %v1496_v43  ;;  %v795_v63 = vmul.f32 0.044715, %v1508_v57 }
 0x232   : > { %1260 = vtanh.f32 %v858_v51  ;;  %v864_v38 = vmul.f32 0.7978846, %v848_v52  ;;  %v849_v2 = vadd.f32 %v833_v59, %v1490_v33  ;;  %v796_v3 = vmul.f32 0.044715, %v1514_v60 }
 0x233   : > { %1262 = vtanh.f32 %v863_v31  ;;  %v834_v5 = vmul.f32 %v818_v56, %v1496_v43  ;;  %v811_v6 = vmul.f32 %v795_v63, %v1508_v57  ;;  %v1523_v8 = vadd.f32 %v1468_v62, %v671_v40 }
 0x234   : > { %1264 = vtanh.f32 %v864_v38  ;;  %v1526_v1 = vadd.f32 %v1470_v39, %v673_v44  ;;  %v778_v9 = vmul.f32 0.5, %v1476_v7  ;;  %v865_v10 = vmul.f32 0.7978846, %v849_v2 }
 0x235   : > { %v812_v4 = vmul.f32 %v796_v3, %v1514_v60  ;;  %v1531_v12 = vadd.f32 %v1468_v62, %v687_v48  ;;  %v783_v13 = vmul.f32 0.5, %v1479_v11  ;;  %v850_v14 = vadd.f32 %v834_v5, %v1496_v43 }
 0x236   : > { %v827_v18 = vmul.f32 %v811_v6, %v1508_v57  ;;  %v797_v19 = vmul.f32 0.044715, %v1523_v8  ;;  %v784_v20 = vmul.f32 0.5, %v1483_v17  ;;  %1266 = vtanh.f32 %v865_v10 }
 0x237   : > { %v828_v21 = vmul.f32 %v812_v4, %v1514_v60  ;;  %v798_v7 = vmul.f32 0.044715, %v1526_v1  ;;  %v866_v25 = vmul.f32 0.7978846, %v850_v14  ;;  %v1543_v11 = vadd.f32 %v1470_v39, %v689_v30 }
 0x238   : > { %v843_v26 = vadd.f32 %v827_v18, %v1508_v57  ;;  %v813_v27 = vmul.f32 %v797_v19, %v1523_v8  ;;  %v803_v32 = vmul.f32 0.044715, %v1531_v12  ;;  %v1565_v2 = vadd.f32 %v1468_v62, %v1504_v54 }
 0x239   : > { %v1255_v24 = vpop.eup %1254  ;;  %v844_v29 = vadd.f32 %v828_v21, %v1514_v60  ;;  %v814_v17 = vmul.f32 %v798_v7, %v1526_v1  ;;  %1268 = vtanh.f32 %v866_v25  ;;  %v804_v56 = vmul.f32 0.044715, %v1543_v11 }
 0x23a   : > { %v1257_v28 = vpop.eup %1256  ;;  %v887_v15 = vadd.f32 1.0, %v1255_v24  ;;  %v859_v36 = vmul.f32 0.7978846, %v843_v26  ;;  %v829_v37 = vmul.f32 %v813_v27, %v1523_v8  ;;  %v819_v38 = vmul.f32 %v803_v32, %v1531_v12 }
 0x23b   : > { %v1259_v34 = vpop.eup %1258  ;;  %v888_v35 = vadd.f32 1.0, %v1257_v28  ;;  %v860_v42 = vmul.f32 0.7978846, %v844_v29  ;;  %v830_v44 = vmul.f32 %v814_v17, %v1526_v1  ;;  %v1569_v3 = vadd.f32 %v1470_v39, %v1510_v58 }
 0x23c   : > { %v1261_v40 = vpop.eup %1260  ;;  %v903_v41 = vmul.f32 %v887_v15, %v775_v49  ;;  %v889_v22 = vadd.f32 1.0, %v1259_v34  ;;  %1270 = vtanh.f32 %v859_v36  ;;  %v845_v47 = vadd.f32 %v829_v37, %v1523_v8 }
 0x23d   : > { %v1263_v45 = vpop.eup %1262  ;;  %v904_v46 = vmul.f32 %v888_v35, %v776_v61  ;;  %v890_v16 = vadd.f32 1.0, %v1261_v40  ;;  %1272 = vtanh.f32 %v860_v42  ;;  %v846_v50 = vadd.f32 %v830_v44, %v1526_v1 }
 0x23e   : > { %v1265_v48 = vpop.eup %1264  ;;  %v905_v23 = vmul.f32 %v889_v22, %v777_v0  ;;  %v895_v49 = vadd.f32 1.0, %v1263_v45  ;;  %v861_v53 = vmul.f32 0.7978846, %v845_v47  ;;  %v835_v0 = vmul.f32 %v819_v38, %v1531_v12 }
 0x23f   : > { %v1165_v30 = vpack.c.bf16 %v904_v46, %v903_v41  ;;  %v906_v51 = vmul.f32 %v890_v16, %v778_v9  ;;  %v896_v52 = vadd.f32 1.0, %v1265_v48  ;;  %v862_v55 = vmul.f32 0.7978846, %v846_v50 }
 0x240   : > { %v911_v31 = vmul.f32 %v895_v49, %v783_v13  ;;  %1274 = vtanh.f32 %v861_v53  ;;  %v1267_v63 = vpop.eup %1266  ;;  %v820_v9 = vmul.f32 %v804_v56, %v1543_v11  ;;  %v785_v10 = vmul.f32 0.5, %v1490_v33 }
 0x241   : > { %967 = vst [vmem:[%s1556_s27] sm:$0xff] %v1165_v30  ;;  %v1166_v59 = vpack.c.bf16 %v906_v51, %v905_v23  ;;  %v912_v61 = vmul.f32 %v896_v52, %v784_v20  ;;  %1276 = vtanh.f32 %v862_v55  ;;  %v897_v6 = vadd.f32 1.0, %v1267_v63 }
 0x242   : > { %v851_v4 = vadd.f32 %v835_v0, %v1531_v12  ;;  %v805_v13 = vmul.f32 0.044715, %v1565_v2  ;;  %v786_v62 = vmul.f32 0.5, %v1496_v43  ;;  %v836_v54 = vmul.f32 %v820_v9, %v1543_v11 }
 0x243   : > { %968 = vst [vmem:[%s1556_s27 + $0x8] sm:$0xff] %v1166_v59  ;;  %v1169_v5 = vpack.c.bf16 %v912_v61, %v911_v31  ;;  %v1269_v14 = vpop.eup %1268  ;;  %v806_v39 = vmul.f32 0.044715, %v1569_v3  ;;  %v913_v58 = vmul.f32 %v897_v6, %v785_v10  ;;  %v779_v33 = vmul.f32 0.5, %v1508_v57 }
 0x244   : > { %v898_v18 = vadd.f32 1.0, %v1269_v14  ;;  %v867_v19 = vmul.f32 0.7978846, %v851_v4  ;;  %v821_v20 = vmul.f32 %v805_v13, %v1565_v2  ;;  %v852_v7 = vadd.f32 %v836_v54, %v1543_v11 }
 0x245   : > { %971 = vst [vmem:[%s1556_s27 + $0x20] sm:$0xff] %v1169_v5  ;;  %v822_v24 = vmul.f32 %v806_v39, %v1569_v3  ;;  %v780_v28 = vmul.f32 0.5, %v1514_v60  ;;  %v781_v41 = vmul.f32 0.5, %v1523_v8  ;;  %v782_v44 = vmul.f32 0.5, %v1526_v1 }
 0x246   : > { %v1271_v21 = vpop.eup %1270  ;;  %v914_v26 = vmul.f32 %v898_v18, %v786_v62  ;;  %1278 = vtanh.f32 %v867_v19  ;;  %v837_v27 = vmul.f32 %v821_v20, %v1565_v2  ;;  %v868_v29 = vmul.f32 0.7978846, %v852_v7 }
 0x247   : > { %v1273_v25 = vpop.eup %1272  ;;  %v891_v43 = vadd.f32 1.0, %v1271_v21  ;;  %v838_v17 = vmul.f32 %v822_v24, %v1569_v3  ;;  %v787_v50 = vmul.f32 0.5, %v1531_v12  ;;  %v788_v51 = vmul.f32 0.5, %v1543_v11 }
 0x248   : > { %v892_v15 = vadd.f32 1.0, %v1273_v25  ;;  %v1170_v32 = vpack.c.bf16 %v914_v26, %v913_v58  ;;  %v853_v57 = vadd.f32 %v837_v27, %v1565_v2  ;;  %1280 = vtanh.f32 %v868_v29 }
 0x249   : > { %v907_v34 = vmul.f32 %v891_v43, %v779_v33  ;;  %v854_v37 = vadd.f32 %v838_v17, %v1569_v3  ;;  %v789_v55 = vmul.f32 0.5, %v1565_v2  ;;  %v790_v61 = vmul.f32 0.5, %v1569_v3 }
 0x24a   : > { %v1275_v35 = vpop.eup %1274  ;;  %v908_v36 = vmul.f32 %v892_v15, %v780_v28  ;;  %972 = vst [vmem:[%s1556_s27 + $0x28] sm:$0xff] %v1170_v32  ;;  %v869_v22 = vmul.f32 0.7978846, %v853_v57 }
 0x24b   : > { %v1277_v40 = vpop.eup %1276  ;;  %v893_v60 = vadd.f32 1.0, %v1275_v35  ;;  %v870_v46 = vmul.f32 0.7978846, %v854_v37 }
 0x24c   : > { %v1167_v42 = vpack.c.bf16 %v908_v36, %v907_v34  ;;  %v894_v45 = vadd.f32 1.0, %v1277_v40  ;;  %1282 = vtanh.f32 %v869_v22 }
 0x24d   : > { %v909_v16 = vmul.f32 %v893_v60, %v781_v41  ;;  %1284 = vtanh.f32 %v870_v46 }
 0x24e   : > { %969 = vst [vmem:[%s1556_s27 + $0x10] sm:$0xff] %v1167_v42  ;;  %v910_v47 = vmul.f32 %v894_v45, %v782_v44 }
 0x250   : > { %v1168_v48 = vpack.c.bf16 %v910_v47, %v909_v16  ;;  %v1279_v23 = vpop.eup %1278 }
 0x251   : > { %v899_v49 = vadd.f32 1.0, %v1279_v23 }
 0x252   : > { %970 = vst [vmem:[%s1556_s27 + $0x18] sm:$0xff] %v1168_v48  ;;  %v1281_v8 = vpop.eup %1280 }
 0x253   : > { %v915_v30 = vmul.f32 %v899_v49, %v787_v50  ;;  %v900_v1 = vadd.f32 1.0, %v1281_v8 }
 0x255   : > { %v916_v53 = vmul.f32 %v900_v1, %v788_v51 }
 0x256   : > { %v1283_v52 = vpop.eup %1282 }
 0x257   : > { %v1285_v31 = vpop.eup %1284  ;;  %v901_v38 = vadd.f32 1.0, %v1283_v52  ;;  %v1171_v59 = vpack.c.bf16 %v916_v53, %v915_v30 }
 0x258   : > { %v902_v56 = vadd.f32 1.0, %v1285_v31 }
 0x259   : > { %v917_v63 = vmul.f32 %v901_v38, %v789_v55  ;;  %973 = vst [vmem:[%s1556_s27 + $0x30] sm:$0xff] %v1171_v59 }
 0x25a   : > { %v918_v0 = vmul.f32 %v902_v56, %v790_v61 }
 0x25c   : > { %v1172_v12 = vpack.c.bf16 %v918_v0, %v917_v63 }
 0x25e   : > { %974 = vst [vmem:[%s1556_s27 + $0x38] sm:$0xff] %v1172_v12 }
 0x25f PF: > { %s15_s20 = sadd.s32 1, %s1308_s20   ;;  %s1615_s18 = smov %s1304_s19 }
 0x260   : > { %p12_p5 = scmp.ge.s32.totalorder %s15_s20, 4   ;;  %s1616_s19 = smov %s1618_s21 }
 0x262   :  { %14 = sbr.rel (!%p12_p5) target bundleno = 2 (0x2), region = 90 }

// kernel: vit_forward.17
= control target key start
LH: loop header
LB: loop body
LE: loop exit
PB: predicated region body
PF: predicated region fallthrough
CT: control target
= control target key end

     0   :  { %s983_s15 = smov 0   ;;  %s985_s16 = smov 0   ;;  %s1105_s0 = inlined_call_operand.vmem [shape: bf16[128,256], index: 0, kind: input, shape index: {}]   ;;  %s1106_s1 = inlined_call_operand.vmem [shape: bf16[256,128], index: 1, kind: input, shape index: {}]   ;;  %s1107_s2 = inlined_call_operand.vmem [shape: f32[1,128], index: 2, kind: input, shape index: {}]   ;;  %s1108_s3 = inlined_call_operand.vmem [shape: f32[128,128], index: 3, kind: input, shape index: {}]   ;;  %s1109_s4 = inlined_call_operand.vmem [shape: f32[128,128], index: 4, kind: output, shape index: {}]  }
   0x1   :  { %s987_s17 = smov 0  }
   0x2 LB: > { %s33_s18 = sadd.s32 1, %s952_s16  ;;  %p790_p0 = scmp.ge.s32.totalorder %s956_s17, 1  ;;  %s956_s17 = sphi %s987_s17, %s14_s17   ;;  %s952_s16 = sphi %s985_s16, %s1111_s16   ;;  %s948_s15 = sphi %s983_s15, %s1110_s15  }
   0x3   : > { %p35_p1 = scmp.ge.s32.totalorder %s33_s18, 2  ;;  %p232_p2 = scmp.lt.s32.totalorder %s956_s17, 3 }
   0x5   : > { %s1113_s18 = smov (%p35_p1, %s33_s18), 0  ;;  %p233_p3 = pnand %p790_p0, %p232_p2 }
   0x6   : > { %v906_v0 = vld [vmem:[%s1106_s1 + $0x40] sm:$0xff] (!%p233_p3)   ;;  %s791_s21 = sshll.u32 (!%p233_p3), %s948_s15, 3  ;;  %v908_v2 = vld [vmem:[%s1106_s1 + $0x48] sm:$0xff] (!%p233_p3)   ;;  %v910_v4 = vld [vmem:[%s1106_s1 + $0x50] sm:$0xff] (!%p233_p3)  }
   0x7   : > { %236 = sbr.rel (%p233_p3) target bundleno = 269 (0x10d), region = 36  ;;  %v907_v1 = vld [vmem:[%s1106_s1] sm:$0xff] (!%p233_p3)   ;;  %826 = vmatprep.subr.bf16.mxu0 (!%p233_p3), %v906_v0  ;;  %866 = vmatprep.subr.bf16.mxu1 (!%p233_p3), %v906_v0  ;;  %v909_v3 = vld [vmem:[%s1106_s1 + $0x8] sm:$0xff] (!%p233_p3)   ;;  %p287_p4 = scmp.lt.s32.totalorder (!%p233_p3), %s791_s21, 15  ;;  %v911_v5 = vld [vmem:[%s1106_s1 + $0x10] sm:$0xff] (!%p233_p3)  }
   0x8   : > { %827 = vmatpush3.bf16.msra.mxu0 (!%p233_p3), %v907_v1  ;;  %874 = vmatpush3.bf16.msra.mxu1 (!%p233_p3), %v907_v1  ;;  %v912_v6 = vld [vmem:[%s1106_s1 + $0x58] sm:$0xff] (!%p233_p3)   ;;  %v914_v8 = vld [vmem:[%s1106_s1 + $0x60] sm:$0xff] (!%p233_p3)   ;;  %v916_v10 = vld [vmem:[%s1106_s1 + $0x68] sm:$0xff] (!%p233_p3)  }
   0x9   : > { %828 = vmatprep.subr.bf16.mxu0 (!%p233_p3), %v908_v2  ;;  %867 = vmatprep.subr.bf16.mxu1 (!%p233_p3), %v908_v2  ;;  %v913_v7 = vld [vmem:[%s1106_s1 + $0x18] sm:$0xff] (!%p233_p3)   ;;  %v915_v9 = vld [vmem:[%s1106_s1 + $0x20] sm:$0xff] (!%p233_p3)   ;;  %v917_v13 = vld [vmem:[%s1106_s1 + $0x28] sm:$0xff] (!%p233_p3)  }
   0xa   : > { %v918_v14 = vld [vmem:[%s1106_s1 + $0x70] sm:$0xff] (!%p233_p3)   ;;  %v920_v16 = vld [vmem:[%s1106_s1 + $0x78] sm:$0xff] (!%p233_p3)   ;;  %v822_v27 = vld [vmem:[%s1107_s2] ss:$0 sm:$0xff] (!%p233_p3) }
   0xb   : > { %v919_v15 = vld [vmem:[%s1106_s1 + $0x30] sm:$0xff] (!%p233_p3)   ;;  %v921_v17 = vld [vmem:[%s1106_s1 + $0x38] sm:$0xff] (!%p233_p3)  }
   0xc   : > { %829 = vmatpush3.bf16.msra.mxu0 (!%p233_p3), %v909_v3  ;;  %875 = vmatpush3.bf16.msra.mxu1 (!%p233_p3), %v909_v3 }
   0xd   : > { %830 = vmatprep.subr.bf16.mxu0 (!%p233_p3), %v910_v4  ;;  %868 = vmatprep.subr.bf16.mxu1 (!%p233_p3), %v910_v4 }
   0xe   : > { %s1115_s21 = smov (!%p287_p4, %s791_s21), 15 }
   0xf   : > { %s1025_s10 = sshll.u32 %s1115_s21, 3 }
  0x10   : > { %831 = vmatpush3.bf16.msra.mxu0 %v911_v5  ;;  %876 = vmatpush3.bf16.msra.mxu1 %v911_v5  ;;  %s1034_s15 = scalar_lea.vmem %s1105_s0, %s1025_s10  ;;  %s1069_s9 = scalar_lea.vmem %s1108_s3, %s1025_s10 }
  0x11   : > { %832 = vmatprep.subr.bf16.mxu0 %v912_v6  ;;  %869 = vmatprep.subr.bf16.mxu1 %v912_v6  ;;  %v924_v11 = vld [vmem:[%s1034_s15 + $0x4] ss:$8 sps:$4 sm:$0xff]   ;;  %v922_v18 = vld [vmem:[%s1034_s15] ss:$8 sps:$4 sm:$0xff]   ;;  %v928_v20 = vld [vmem:[%s1034_s15 + $0x14] ss:$8 sps:$4 sm:$0xff]  }
  0x12   : > { %v927_v12 = vld [vmem:[%s1034_s15 + $0x24] ss:$8 sps:$4 sm:$0xff]   ;;  %556 = vmatprep.mubr.bf16.mxu0 %v924_v11  ;;  %v925_v19 = vld [vmem:[%s1034_s15 + $0x20] ss:$8 sps:$4 sm:$0xff]   ;;  %v930_v21 = vld [vmem:[%s1034_s15 + $0x34] ss:$8 sps:$4 sm:$0xff]  }
  0x13   : > { %572 = vmatprep.mubr.bf16.mxu1 %v927_v12  ;;  %v932_v22 = vld [vmem:[%s1034_s15 + $0x10] ss:$8 sps:$4 sm:$0xff]   ;;  %v631_v33 = vld [vmem:[%s1069_s9] sm:$0xff]  ;;  %v632_v41 = vld [vmem:[%s1069_s9 + $0x8] sm:$0xff] }
  0x14   : > { %833 = vmatpush3.bf16.msra.mxu0 %v913_v7  ;;  %877 = vmatpush3.bf16.msra.mxu1 %v913_v7  ;;  %v933_v23 = vld [vmem:[%s1034_s15 + $0x30] ss:$8 sps:$4 sm:$0xff]   ;;  %v635_v34 = vld [vmem:[%s1069_s9 + $0x20] sm:$0xff]  ;;  %s1080_s15 = scalar_lea.vmem %s1109_s4, %s1025_s10  ;;  %v636_v42 = vld [vmem:[%s1069_s9 + $0x28] sm:$0xff] }
  0x15   : > { %834 = vmatprep.subr.bf16.mxu0 %v914_v8  ;;  %870 = vmatprep.subr.bf16.mxu1 %v914_v8  ;;  %v633_v57 = vld [vmem:[%s1069_s9 + $0x10] sm:$0xff]  ;;  %v634_v1 = vld [vmem:[%s1069_s9 + $0x18] sm:$0xff] }
  0x16   : > { %v637_v58 = vld [vmem:[%s1069_s9 + $0x30] sm:$0xff]  ;;  %v638_v2 = vld [vmem:[%s1069_s9 + $0x38] sm:$0xff] }
  0x18   : > { %835 = vmatpush3.bf16.msra.mxu0 %v915_v9  ;;  %878 = vmatpush3.bf16.msra.mxu1 %v915_v9 }
  0x19   : > { %836 = vmatprep.subr.bf16.mxu0 %v916_v10  ;;  %871 = vmatprep.subr.bf16.mxu1 %v916_v10 }
  0x1c   : > { %837 = vmatpush3.bf16.msra.mxu0 %v917_v13  ;;  %879 = vmatpush3.bf16.msra.mxu1 %v917_v13 }
  0x1d   : > { %838 = vmatprep.subr.bf16.mxu0 %v918_v14  ;;  %872 = vmatprep.subr.bf16.mxu1 %v918_v14 }
  0x20   : > { %839 = vmatpush3.bf16.msra.mxu0 %v919_v15  ;;  %880 = vmatpush3.bf16.msra.mxu1 %v919_v15 }
  0x21   : > { %840 = vmatprep.subr.bf16.mxu0 %v920_v16  ;;  %873 = vmatprep.subr.bf16.mxu1 %v920_v16 }
  0x24   : > { %841 = vmatpush3.bf16.msra.mxu0 %v921_v17  ;;  %881 = vmatpush3.bf16.msra.mxu1 %v921_v17 }
  0x27   : > { %557 = vmatmul.mubr.bf16.vlgmr.msra.gmra.mrb[0].mxu0 %v922_v18  ;;  %573 = vmatmul.mubr.bf16.vlgmr.msra.gmra.mrb[0].mxu1 %v925_v19 }
  0x28   : > { %564 = vmatprep.mubr.bf16.mxu0 %v928_v20  ;;  %580 = vmatprep.mubr.bf16.mxu1 %v930_v21 }
  0x2f   : > { %565 = vmatmul.mubr.bf16.gmra.mrb[4].mxu0 %v932_v22  ;;  %581 = vmatmul.mubr.bf16.gmra.mrb[4].mxu1 %v933_v23 }
  0xfa   : > { %v842_v24 = vpop.f32.mrb[0].mxu0  ;;  %v854_v25 = vpop.f32.mrb[0].mxu1 }
  0xfb   : > { %v843_v26 = vpop.f32.mrb[1].mxu0  ;;  %v855_v28 = vpop.f32.mrb[1].mxu1 }
  0xfc   : > { %v844_v29 = vadd.f32 %v843_v26, %v842_v24  ;;  %v856_v30 = vadd.f32 %v855_v28, %v854_v25  ;;  %v845_v31 = vpop.f32.mrb[2].mxu0  ;;  %v857_v32 = vpop.f32.mrb[2].mxu1 }
  0xfd   : > { %v846_v35 = vpop.f32.mrb[3].mxu0  ;;  %v858_v36 = vpop.f32.mrb[3].mxu1 }
  0xfe   : > { %v623_v37 = vadd.f32 %v844_v29, %v822_v27  ;;  %v627_v38 = vadd.f32 %v856_v30, %v822_v27  ;;  %v847_v39 = vadd.f32 %v846_v35, %v845_v31  ;;  %v859_v40 = vadd.f32 %v858_v36, %v857_v32 }
 0x100   : > { %v639_v43 = vadd.f32 %v631_v33, %v623_v37  ;;  %v643_v44 = vadd.f32 %v635_v34, %v627_v38  ;;  %v624_v45 = vadd.f32 %v847_v39, %v822_v27  ;;  %v628_v46 = vadd.f32 %v859_v40, %v822_v27 }
 0x102   : > { %647 = vst [vmem:[%s1080_s15] sm:$0xff] %v639_v43  ;;  %651 = vst [vmem:[%s1080_s15 + $0x20] sm:$0xff] %v643_v44  ;;  %v640_v47 = vadd.f32 %v632_v41, %v624_v45  ;;  %v644_v48 = vadd.f32 %v636_v42, %v628_v46  ;;  %v848_v49 = vpop.f32.mrb[4].mxu0  ;;  %v860_v50 = vpop.f32.mrb[4].mxu1 }
 0x103   : > { %v849_v51 = vpop.f32.mrb[5].mxu0  ;;  %v861_v52 = vpop.f32.mrb[5].mxu1 }
 0x104   : > { %648 = vst [vmem:[%s1080_s15 + $0x8] sm:$0xff] %v640_v47  ;;  %652 = vst [vmem:[%s1080_s15 + $0x28] sm:$0xff] %v644_v48  ;;  %v850_v53 = vadd.f32 %v849_v51, %v848_v49  ;;  %v862_v54 = vadd.f32 %v861_v52, %v860_v50  ;;  %v851_v55 = vpop.f32.mrb[6].mxu0  ;;  %v863_v56 = vpop.f32.mrb[6].mxu1 }
 0x105   : > { %v852_v59 = vpop.f32.mrb[7].mxu0  ;;  %v864_v60 = vpop.f32.mrb[7].mxu1 }
 0x106   : > { %v625_v61 = vadd.f32 %v850_v53, %v822_v27  ;;  %v629_v62 = vadd.f32 %v862_v54, %v822_v27  ;;  %v853_v63 = vadd.f32 %v852_v59, %v851_v55  ;;  %v865_v0 = vadd.f32 %v864_v60, %v863_v56 }
 0x108   : > { %v641_v3 = vadd.f32 %v633_v57, %v625_v61  ;;  %v645_v4 = vadd.f32 %v637_v58, %v629_v62  ;;  %v626_v5 = vadd.f32 %v853_v63, %v822_v27  ;;  %v630_v6 = vadd.f32 %v865_v0, %v822_v27 }
 0x10a   : > { %649 = vst [vmem:[%s1080_s15 + $0x10] sm:$0xff] %v641_v3  ;;  %653 = vst [vmem:[%s1080_s15 + $0x30] sm:$0xff] %v645_v4  ;;  %v642_v7 = vadd.f32 %v634_v1, %v626_v5  ;;  %v646_v8 = vadd.f32 %v638_v2, %v630_v6 }
 0x10c   : > { %650 = vst [vmem:[%s1080_s15 + $0x18] sm:$0xff] %v642_v7  ;;  %654 = vst [vmem:[%s1080_s15 + $0x38] sm:$0xff] %v646_v8 }
 0x10d PF: > { %s14_s17 = sadd.s32 1, %s956_s17   ;;  %s1110_s15 = smov %s952_s16 }
 0x10e   : > { %p11_p5 = scmp.ge.s32.totalorder %s14_s17, 4   ;;  %s1111_s16 = smov %s1113_s18 }
 0x110   :  { %13 = sbr.rel (!%p11_p5) target bundleno = 2 (0x2), region = 83 }

// kernel: vit_forward.23
= control target key start
LH: loop header
LB: loop body
LE: loop exit
PB: predicated region body
PF: predicated region fallthrough
CT: control target
= control target key end

     0   :  { %s732_s12 = smov 0   ;;  %s734_s13 = smov 0   ;;  %s809_s0 = inlined_call_operand.vmem [shape: f32[128,128], index: 0, kind: input, shape index: {}]   ;;  %s810_s1 = inlined_call_operand.vmem [shape: bf16[128,128], index: 1, kind: input, shape index: {}]   ;;  %s811_s2 = inlined_call_operand.vmem [shape: f32[1,128], index: 2, kind: input, shape index: {}]   ;;  %s812_s3 = inlined_call_operand.vmem [shape: f32[128,128], index: 3, kind: output, shape index: {}]  }
   0x1   :  { %s736_s14 = smov 0  }
   0x2 LB: > { %s32_s15 = sadd.s32 1, %s706_s13  ;;  %p588_p0 = scmp.ge.s32.totalorder %s710_s14, 1  ;;  %s710_s14 = sphi %s736_s14, %s13_s14   ;;  %s706_s13 = sphi %s734_s13, %s814_s13   ;;  %s702_s12 = sphi %s732_s12, %s813_s12  }
   0x3   : > { %p34_p1 = scmp.ge.s32.totalorder %s32_s15, 2  ;;  %p188_p2 = scmp.lt.s32.totalorder %s710_s14, 3 }
   0x5   : > { %s816_s15 = smov (%p34_p1, %s32_s15), 0  ;;  %p189_p3 = pnand %p588_p0, %p188_p2 }
   0x6   : > { %v680_v0 = vld [vmem:[%s810_s1] sm:$0xff] (!%p189_p3)   ;;  %s589_s18 = sshll.u32 (!%p189_p3), %s702_s12, 3  ;;  %v681_v1 = vld [vmem:[%s810_s1 + $0x8] sm:$0xff] (!%p189_p3)   ;;  %v682_v2 = vld [vmem:[%s810_s1 + $0x10] sm:$0xff] (!%p189_p3)  }
   0x7   : > { %192 = sbr.rel (%p189_p3) target bundleno = 258 (0x102), region = 32  ;;  %p230_p4 = scmp.lt.s32.totalorder (!%p189_p3), %s589_s18, 15  ;;  %616 = vmatprep.subr.bf16.mxu0 (!%p189_p3), %v680_v0  ;;  %640 = vmatprep.subr.bf16.mxu1 (!%p189_p3), %v680_v0  ;;  %v683_v3 = vld [vmem:[%s810_s1 + $0x18] sm:$0xff] (!%p189_p3)   ;;  %v684_v10 = vld [vmem:[%s810_s1 + $0x20] sm:$0xff] (!%p189_p3)   ;;  %v685_v11 = vld [vmem:[%s810_s1 + $0x28] sm:$0xff] (!%p189_p3)  }
   0x8   : > { %617 = vmatpush3.bf16.msra.mxu0 (!%p189_p3), %v680_v0  ;;  %648 = vmatpush3.bf16.msra.mxu1 (!%p189_p3), %v680_v0  ;;  %v686_v12 = vld [vmem:[%s810_s1 + $0x30] sm:$0xff] (!%p189_p3)   ;;  %v687_v13 = vld [vmem:[%s810_s1 + $0x38] sm:$0xff] (!%p189_p3)   ;;  %v601_v20 = vld [vmem:[%s811_s2] ss:$0 sm:$0xff] (!%p189_p3) }
   0x9   : > { %618 = vmatprep.subr.bf16.mxu0 (!%p189_p3), %v681_v1  ;;  %641 = vmatprep.subr.bf16.mxu1 (!%p189_p3), %v681_v1 }
   0xc   : > { %619 = vmatpush3.bf16.msra.mxu0 (!%p189_p3), %v681_v1  ;;  %649 = vmatpush3.bf16.msra.mxu1 (!%p189_p3), %v681_v1 }
   0xd   : > { %620 = vmatprep.subr.bf16.mxu0 (!%p189_p3), %v682_v2  ;;  %642 = vmatprep.subr.bf16.mxu1 (!%p189_p3), %v682_v2 }
   0xe   : > { %s818_s18 = smov (!%p230_p4, %s589_s18), 15 }
   0xf   : > { %s590_s23 = sshll.u32 %s818_s18, 3 }
  0x10   : > { %s767_s26 = scalar_lea.vmem %s809_s0, %s590_s23  ;;  %621 = vmatpush3.bf16.msra.mxu0 %v682_v2  ;;  %650 = vmatpush3.bf16.msra.mxu1 %v682_v2  ;;  %s257_s17 = scalar_lea.vmem %s812_s3, %s590_s23 }
  0x11   : > { %v272_v4 = vld [vmem:[%s767_s26] sm:$0xff]  ;;  %v273_v5 = vld [vmem:[%s767_s26 + $0x8] sm:$0xff]  ;;  %622 = vmatprep.subr.bf16.mxu0 %v683_v3  ;;  %643 = vmatprep.subr.bf16.mxu1 %v683_v3  ;;  %v274_v14 = vld [vmem:[%s767_s26 + $0x10] sm:$0xff] }
  0x12   : > { %v276_v6 = vld [vmem:[%s767_s26 + $0x20] sm:$0xff]  ;;  %v288_v7 = vpack.c.bf16 %v273_v5, %v272_v4  ;;  %v277_v8 = vld [vmem:[%s767_s26 + $0x28] sm:$0xff]  ;;  %v275_v15 = vld [vmem:[%s767_s26 + $0x18] sm:$0xff] }
  0x13   : > { %v290_v9 = vpack.c.bf16 %v277_v8, %v276_v6  ;;  %v278_v16 = vld [vmem:[%s767_s26 + $0x30] sm:$0xff]  ;;  %v279_v17 = vld [vmem:[%s767_s26 + $0x38] sm:$0xff]  ;;  %v289_v18 = vpack.c.bf16 %v275_v15, %v274_v14 }
  0x14   : > { %632 = vmatprep.mubr.bf16.mxu0 %v288_v7  ;;  %623 = vmatpush3.bf16.msra.mxu0 %v683_v3  ;;  %v291_v19 = vpack.c.bf16 %v279_v17, %v278_v16 }
  0x15   : > { %636 = vmatprep.mubr.bf16.mxu1 %v290_v9  ;;  %651 = vmatpush3.bf16.msra.mxu1 %v683_v3 }
  0x16   : > { %624 = vmatprep.subr.bf16.mxu0 %v684_v10  ;;  %644 = vmatprep.subr.bf16.mxu1 %v684_v10 }
  0x18   : > { %625 = vmatpush3.bf16.msra.mxu0 %v684_v10 }
  0x19   : > { %652 = vmatpush3.bf16.msra.mxu1 %v684_v10  ;;  %626 = vmatprep.subr.bf16.mxu0 %v685_v11 }
  0x1a   : > { %645 = vmatprep.subr.bf16.mxu1 %v685_v11 }
  0x1c   : > { %627 = vmatpush3.bf16.msra.mxu0 %v685_v11 }
  0x1d   : > { %653 = vmatpush3.bf16.msra.mxu1 %v685_v11  ;;  %628 = vmatprep.subr.bf16.mxu0 %v686_v12 }
  0x1e   : > { %646 = vmatprep.subr.bf16.mxu1 %v686_v12 }
  0x20   : > { %629 = vmatpush3.bf16.msra.mxu0 %v686_v12 }
  0x21   : > { %654 = vmatpush3.bf16.msra.mxu1 %v686_v12  ;;  %630 = vmatprep.subr.bf16.mxu0 %v687_v13 }
  0x22   : > { %647 = vmatprep.subr.bf16.mxu1 %v687_v13 }
  0x24   : > { %631 = vmatpush3.bf16.msra.mxu0 %v687_v13 }
  0x25   : > { %655 = vmatpush3.bf16.msra.mxu1 %v687_v13 }
  0x27   : > { %633 = vmatmul.mubr.bf16.vlgmr.msra.gmra.mrb[0].mxu0 %v289_v18 }
  0x28   : > { %637 = vmatmul.mubr.bf16.vlgmr.msra.gmra.mrb[0].mxu1 %v291_v19 }
  0xfa   : > { %v634_v21 = vpop.f32.mrb[0].mxu0 }
  0xfb   : > { %v638_v22 = vpop.f32.mrb[0].mxu1  ;;  %v457_v23 = vadd.f32 %v634_v21, %v601_v20  ;;  %v390_v25 = vpop.f32.mrb[1].mxu0 }
  0xfc   : > { %v461_v24 = vadd.f32 %v638_v22, %v601_v20  ;;  %v406_v26 = vpop.f32.mrb[1].mxu1  ;;  %v455_v27 = vadd.f32 %v601_v20, %v390_v25  ;;  %v635_v29 = vpop.f32.mrb[2].mxu0 }
  0xfd   : > { %v459_v28 = vadd.f32 %v601_v20, %v406_v26  ;;  %v639_v30 = vpop.f32.mrb[2].mxu1  ;;  %465 = vst [vmem:[%s257_s17 + $0x10] sm:$0xff] %v457_v23  ;;  %v458_v31 = vadd.f32 %v635_v29, %v601_v20  ;;  %v393_v33 = vpop.f32.mrb[3].mxu0 }
  0xfe   : > { %469 = vst [vmem:[%s257_s17 + $0x30] sm:$0xff] %v461_v24  ;;  %v462_v32 = vadd.f32 %v639_v30, %v601_v20  ;;  %v409_v34 = vpop.f32.mrb[3].mxu1  ;;  %463 = vst [vmem:[%s257_s17] sm:$0xff] %v455_v27  ;;  %v456_v35 = vadd.f32 %v601_v20, %v393_v33 }
  0xff   : > { %467 = vst [vmem:[%s257_s17 + $0x20] sm:$0xff] %v459_v28  ;;  %v460_v36 = vadd.f32 %v601_v20, %v409_v34  ;;  %466 = vst [vmem:[%s257_s17 + $0x18] sm:$0xff] %v458_v31 }
 0x100   : > { %470 = vst [vmem:[%s257_s17 + $0x38] sm:$0xff] %v462_v32  ;;  %464 = vst [vmem:[%s257_s17 + $0x8] sm:$0xff] %v456_v35 }
 0x101   : > { %468 = vst [vmem:[%s257_s17 + $0x28] sm:$0xff] %v460_v36 }
 0x102 PF: > { %s13_s14 = sadd.s32 1, %s710_s14   ;;  %s813_s12 = smov %s706_s13 }
 0x103   : > { %p10_p5 = scmp.ge.s32.totalorder %s13_s14, 4   ;;  %s814_s13 = smov %s816_s15 }
 0x105   :  { %12 = sbr.rel (!%p10_p5) target bundleno = 2 (0x2), region = 76 }

</bundles_post_ra>
